<compile_context>
chip_gen: v7x
topology: tpu7x:2x2x1
jax: 0.10.0
libtpu: 0.0.40
codegen_flags: <defaults>
</compile_context>

<pallas_src>
import functools

import jax
import jax.numpy as jnp
from jax.experimental import pallas as pl
from jax.experimental.pallas import tpu as pltpu


# ----------------------------------------------------------------------------
# Fused ASPP Pallas kernel (one grid step = one batch element x one row tile)
# ----------------------------------------------------------------------------
def _fused_aspp_kernel(xp_ref, w0_ref, wd_ref, w4_ref, bb_ref, pw_ref, pb_ref,
                       o_ref, acc_ref, *, H, W, TH, Cin, Cout, pad, rates):
    """Fused 5-branch ASPP + projection.

    xp_ref : (Hp, Wp, Cin)        shared zero-padded NHWC input (pad = max rate)
    w0_ref : (Cin, Cout)          1x1 branch weight (BN scale folded in)
    wd_ref : (R, 9*Cin, Cout)     dilated branch weights, tap-major, scale folded
    w4_ref : (Cin, Cout)          pooling branch weight (scale folded)
    bb_ref : (R+2, Cout)          per-branch folded BN bias
    pw_ref : (R+2, Cout, Cout)    projection weight chunks (proj BN scale folded)
    pb_ref : (1, Cout)            projection folded BN bias
    o_ref  : (TH, W, Cout)        output row tile
    acc_ref: (TH*W, Cout) f32     VMEM projection accumulator
    """
    nb = len(rates) + 2                       # 1x1 + dilated branches + pooling
    r = pl.program_id(1)
    row0 = pl.multiple_of(r * TH, TH)         # first output row of this tile

    # ---- branch 0: 1x1 conv (+ folded BN bias, ReLU), then projection chunk
    p0 = xp_ref[pl.ds(pad + row0, TH), pad:pad + W, :].reshape(TH * W, Cin)
    y = jnp.dot(p0, w0_ref[...], preferred_element_type=jnp.float32)
    y = jnp.maximum(y + bb_ref[0:1, :], 0.0)
    acc_ref[...] = jnp.dot(y, pw_ref[0], preferred_element_type=jnp.float32)

    # ---- branches 1..R: 3x3 dilated convs as ONE contraction over 9*Cin ----
    for bi, d in enumerate(rates):
        off = pad - d                         # makes effective padding == d
        taps = []
        for ky in range(3):
            rs = row0 + off + ky * d          # dynamic row start, static cols
            for kx in range(3):
                c0 = off + kx * d
                taps.append(xp_ref[pl.ds(rs, TH), c0:c0 + W, :])   # (TH, W, Cin)
        lhs = jnp.concatenate(taps, axis=-1).reshape(TH * W, 9 * Cin)  # im2col
        y = jnp.dot(lhs, wd_ref[bi], preferred_element_type=jnp.float32)
        y = jnp.maximum(y + bb_ref[bi + 1:bi + 2, :], 0.0)
        acc_ref[...] += jnp.dot(y, pw_ref[bi + 1],
                                preferred_element_type=jnp.float32)

    # ---- pooling branch: global mean -> 1x1 conv -> BN/ReLU ----------------
    # (bilinear upsample of a 1x1 map with align_corners=False is a broadcast,
    #  so its projection contribution is a per-pixel constant vector.)
    xin = xp_ref[pad:pad + H, pad:pad + W, :]
    xm = jnp.mean(xin, axis=(0, 1), keepdims=True)[0]          # (1, Cin)
    y = jnp.dot(xm, w4_ref[...], preferred_element_type=jnp.float32)
    y = jnp.maximum(y + bb_ref[nb - 1:nb, :], 0.0)             # (1, Cout)
    pooled = jnp.dot(y, pw_ref[nb - 1], preferred_element_type=jnp.float32)

    # ---- projection epilogue: folded BN bias + pooled constant + ReLU ------
    const = pooled + pb_ref[...]                               # (1, Cout)
    out = jnp.maximum(acc_ref[...] + const, 0.0)
    o_ref[...] = out.reshape(TH, W, Cout)


# ----------------------------------------------------------------------------
# Parameter folding / packing for the fused kernel
# ----------------------------------------------------------------------------
def _pack_fused_operands(params, rates, Cout):
    """Fold BN scales into weights and pack per-branch operands."""
    w0 = params["b0_w"][0] * params["b0_scale"]                        # (Cin, Cout)
    wd = jnp.stack([params[f"b{i+1}_w"].reshape(-1, Cout) * params[f"b{i+1}_scale"]
                    for i in range(len(rates))])                        # (R, 9*Cin, Cout)
    w4 = params["b4_w"] * params["b4_scale"]                            # (Cin, Cout)
    bb = jnp.concatenate(
        [params["b0_bias"]]
        + [params[f"b{i+1}_bias"] for i in range(len(rates))]
        + [params["b4_bias"]], axis=0)                                  # (R+2, Cout)
    pw = (params["proj_w"][0] * params["proj_scale"]).reshape(-1, Cout, Cout)
    pb = params["proj_bias"]                                            # (1, Cout)
    return w0, wd, w4, bb, pw, pb


# ----------------------------------------------------------------------------
# ASPP forward (single fused pallas_call)
# ----------------------------------------------------------------------------
@functools.partial(jax.jit, static_argnames=("atrous_rates",))
def aspp_forward(x_nchw, params, atrous_rates):
    rates = tuple(int(r) for r in atrous_rates)
    x = jnp.transpose(x_nchw, (0, 2, 3, 1)).astype(jnp.float32)   # NCHW -> NHWC
    N, H, W, Cin = x.shape
    Cout = params["b0_w"].shape[-1]
    nb = len(rates) + 2

    assert W % 8 == 0, "W must be a multiple of 8 (sublane-friendly reshapes)"
    TH = 8 if H % 8 == 0 else H                # output row-tile height
    n_row = H // TH

    pad = max(rates)                           # pad ONCE to the max atrous rate
    Hp, Wp = H + 2 * pad, W + 2 * pad
    xp = jnp.pad(x, ((0, 0), (pad, pad), (pad, pad), (0, 0)))

    w0, wd, w4, bb, pw, pb = _pack_fused_operands(params, rates, Cout)

    kern = functools.partial(_fused_aspp_kernel, H=H, W=W, TH=TH,
                             Cin=Cin, Cout=Cout, pad=pad, rates=rates)

    # Explicit VMEM budget: double-buffered blocks + weights + scratch, with
    # headroom, clamped to stay safe on every generation (v7x has 64 MiB/TC).
    flt = 4
    need = (2 * (Hp * Wp * Cin + TH * W * Cout
                 + w0.size + wd.size + w4.size + bb.size + pw.size + pb.size)
            + TH * W * Cout) * flt
    vmem_limit = int(min(max(2 * need, 16 * 2**20), 64 * 2**20))

    out_nhwc = pl.pallas_call(
        kern,
        out_shape=jax.ShapeDtypeStruct((N, H, W, Cout), jnp.float32),
        grid=(N, n_row),
        in_specs=[
            # full padded image per batch element (block index constant in r,
            # so it is fetched once per n and reused across row tiles)
            pl.BlockSpec((None, Hp, Wp, Cin), lambda n, r: (n, 0, 0, 0)),
            pl.BlockSpec((Cin, Cout), lambda n, r: (0, 0)),
            pl.BlockSpec((len(rates), 9 * Cin, Cout), lambda n, r: (0, 0, 0)),
            pl.BlockSpec((Cin, Cout), lambda n, r: (0, 0)),
            pl.BlockSpec((nb, Cout), lambda n, r: (0, 0)),
            pl.BlockSpec((nb, Cout, Cout), lambda n, r: (0, 0, 0)),
            pl.BlockSpec((1, Cout), lambda n, r: (0, 0)),
        ],
        out_specs=pl.BlockSpec((None, TH, W, Cout), lambda n, r: (n, r, 0, 0)),
        scratch_shapes=[pltpu.VMEM((TH * W, Cout), jnp.float32)],
        compiler_params=pltpu.CompilerParams(
            dimension_semantics=("parallel", "parallel"),
            vmem_limit_bytes=vmem_limit),
    )(xp, w0, wd, w4, bb, pw, pb)

    # Dropout(0.1) in the projection head: identity at inference.
    return jnp.transpose(out_nhwc, (0, 3, 1, 2))   # NHWC -> NCHW


# ----------------------------------------------------------------------------
# Parameter construction (deterministic, synthetic)
# ----------------------------------------------------------------------------
def _fold_bn(gamma, beta, mean, var, eps=1e-5):
    scale = gamma / jnp.sqrt(var + eps)
    bias = beta - mean * scale
    return scale[None, :].astype(jnp.float32), bias[None, :].astype(jnp.float32)


def make_aspp_params(key, in_channels, atrous_rates, out_channels=256):
    params = {}

    def bn_params(k, c):
        k1, k2, k3, k4 = jax.random.split(k, 4)
        gamma = 1.0 + 0.1 * jax.random.normal(k1, (c,), jnp.float32)
        beta = 0.1 * jax.random.normal(k2, (c,), jnp.float32)
        mean = 0.1 * jax.random.normal(k3, (c,), jnp.float32)
        var = 0.5 + 0.1 * jnp.abs(jax.random.normal(k4, (c,), jnp.float32))
        return _fold_bn(gamma, beta, mean, var)

    keys = jax.random.split(key, 16)
    ki = iter(keys)

    # branch 0: 1x1 conv
    params["b0_w"] = 0.1 * jax.random.normal(next(ki), (1, in_channels, out_channels), jnp.float32)
    params["b0_scale"], params["b0_bias"] = bn_params(next(ki), out_channels)

    # branches 1..3: 3x3 dilated convs, weight layout (K*K, Cin, Cout), tap-major (ky*3+kx)
    for i, _r in enumerate(atrous_rates):
        params[f"b{i+1}_w"] = 0.1 * jax.random.normal(
            next(ki), (9, in_channels, out_channels), jnp.float32)
        params[f"b{i+1}_scale"], params[f"b{i+1}_bias"] = bn_params(next(ki), out_channels)

    # branch 4: pooling + 1x1 conv
    params["b4_w"] = 0.1 * jax.random.normal(next(ki), (in_channels, out_channels), jnp.float32)
    params["b4_scale"], params["b4_bias"] = bn_params(next(ki), out_channels)

    # projection: 1x1 conv over 5*out_channels
    params["proj_w"] = 0.05 * jax.random.normal(
        next(ki), (1, 5 * out_channels, out_channels), jnp.float32)
    params["proj_scale"], params["proj_bias"] = bn_params(next(ki), out_channels)
    return params


# ----------------------------------------------------------------------------
# Pure-JAX reference (for correctness check)
# ----------------------------------------------------------------------------
def _ref_conv_bn_relu(x_nhwc, w, scale, bias, *, K, dil, pad):
    Cin, Cout = w.shape[-2], w.shape[-1]
    w_hwio = w.reshape(K, K, Cin, Cout)
    y = jax.lax.conv_general_dilated(
        x_nhwc, w_hwio, window_strides=(1, 1),
        padding=((pad, pad), (pad, pad)), rhs_dilation=(dil, dil),
        dimension_numbers=("NHWC", "HWIO", "NHWC"))
    return jnp.maximum(y * scale[0] + bias[0], 0.0)


def aspp_reference(x_nchw, params, atrous_rates):
    x = jnp.transpose(x_nchw, (0, 2, 3, 1)).astype(jnp.float32)
    N, H, W, _ = x.shape
    branches = [_ref_conv_bn_relu(x, params["b0_w"], params["b0_scale"],
                                  params["b0_bias"], K=1, dil=1, pad=0)]
    for i, r in enumerate(atrous_rates):
        branches.append(_ref_conv_bn_relu(x, params[f"b{i+1}_w"],
                                          params[f"b{i+1}_scale"],
                                          params[f"b{i+1}_bias"],
                                          K=3, dil=r, pad=r))
    xm = jnp.mean(x, axis=(1, 2))                               # (N, Cin)
    yp = jnp.maximum(xm @ params["b4_w"] * params["b4_scale"][0]
                     + params["b4_bias"][0], 0.0)               # (N, Cout)
    branches.append(jnp.broadcast_to(yp[:, None, None, :], (N, H, W, yp.shape[-1])))
    cat = jnp.concatenate(branches, axis=-1)
    out = _ref_conv_bn_relu(cat, params["proj_w"], params["proj_scale"],
                            params["proj_bias"], K=1, dil=1, pad=0)
    return jnp.transpose(out, (0, 3, 1, 2))


# ----------------------------------------------------------------------------
if __name__ == "__main__":
    key = jax.random.PRNGKey(0)
    k_x, k_p = jax.random.split(key)

    N, C_IN, H, W = 2, 4, 16, 16
    ATROUS_RATES = (2, 4, 6)

    x = jax.random.normal(k_x, (N, C_IN, H, W), jnp.float32)   # NCHW like PyTorch
    params = make_aspp_params(k_p, C_IN, ATROUS_RATES)

    out = aspp_forward(x, params, atrous_rates=ATROUS_RATES)
    out = jax.block_until_ready(out)

    ref = jax.block_until_ready(aspp_reference(x, params, ATROUS_RATES))
    assert out.shape == (N, 256, H, W), out.shape
    assert jnp.allclose(out, ref, rtol=1e-4, atol=1e-4), \
        f"max abs err {jnp.max(jnp.abs(out - ref))}"

    print("KERNEL_OK")
</pallas_src>

<mosaic_0001>
module attributes {stable_mosaic.version = 11 : i64} {
  func.func @_fused_aspp_kernel(%arg0: i32, %arg1: i32, %arg2: memref<1x28x28x4xf32, #tpu.memory_space<vmem>>, %arg3: memref<4x256xf32, #tpu.memory_space<vmem>>, %arg4: memref<3x36x256xf32, #tpu.memory_space<vmem>>, %arg5: memref<4x256xf32, #tpu.memory_space<vmem>>, %arg6: memref<5x256xf32, #tpu.memory_space<vmem>>, %arg7: memref<5x256x256xf32, #tpu.memory_space<vmem>>, %arg8: memref<1x256xf32, #tpu.memory_space<vmem>>, %arg9: memref<1x8x16x256xf32, #tpu.memory_space<vmem>>, %arg10: memref<128x256xf32, #tpu.memory_space<vmem>>) attributes {dimension_semantics = [#tpu.dimension_semantics<parallel>, #tpu.dimension_semantics<parallel>], iteration_bounds = array<i64: 2, 2>, scalar_prefetch = 0 : i64, scratch_operands = 1 : i64, tpu.core_type = #tpu.core_type<tc>, window_params = [{transform_indices = @transform_0, window_bounds = array<i64: 1, 28, 28, 4>}, {pipeline_mode = #tpu.pipeline_mode<synchronous>, transform_indices = @transform_1, window_bounds = array<i64: 4, 256>}, {pipeline_mode = #tpu.pipeline_mode<synchronous>, transform_indices = @transform_2, window_bounds = array<i64: 3, 36, 256>}, {pipeline_mode = #tpu.pipeline_mode<synchronous>, transform_indices = @transform_3, window_bounds = array<i64: 4, 256>}, {pipeline_mode = #tpu.pipeline_mode<synchronous>, transform_indices = @transform_4, window_bounds = array<i64: 5, 256>}, {pipeline_mode = #tpu.pipeline_mode<synchronous>, transform_indices = @transform_5, window_bounds = array<i64: 5, 256, 256>}, {pipeline_mode = #tpu.pipeline_mode<synchronous>, transform_indices = @transform_6, window_bounds = array<i64: 1, 256>}, {transform_indices = @transform_7, window_bounds = array<i64: 1, 8, 16, 256>}]} {
    %c8_i32 = arith.constant 8 : i32
    %0 = arith.muli %arg1, %c8_i32 : i32
    %1 = tpu.assume_multiple %0, 8 : i32
    %c6_i32 = arith.constant 6 : i32
    %2 = arith.addi %c6_i32, %1 : i32
    %c0 = arith.constant 0 : index
    %3 = arith.index_cast %2 : i32 to index
    %c6 = arith.constant 6 : index
    %c0_0 = arith.constant 0 : index
    %4 = vector.load %arg2[%c0, %3, %c6, %c0_0] : memref<1x28x28x4xf32, #tpu.memory_space<vmem>>, vector<1x8x16x4xf32>
    %5 = vector.shape_cast %4 : vector<1x8x16x4xf32> to vector<8x16x4xf32>
    %6 = vector.shape_cast %5 : vector<8x16x4xf32> to vector<128x4xf32>
    %c0_1 = arith.constant 0 : index
    %c0_2 = arith.constant 0 : index
    %7 = vector.load %arg3[%c0_1, %c0_2] : memref<4x256xf32, #tpu.memory_space<vmem>>, vector<4x256xf32>
    %cst = arith.constant dense<0.000000e+00> : vector<128x256xf32>
    %8 = tpu.matmul %6, %7, %cst {dimension_numbers = #tpu.dot_dimension_numbers<[1], [0], [0], [1], [0, 0, 1, 1], [], []>} : vector<128x4xf32>, vector<4x256xf32>, vector<128x256xf32> -> vector<128x256xf32>
    %c0_3 = arith.constant 0 : index
    %c0_4 = arith.constant 0 : index
    %9 = vector.load %arg6[%c0_3, %c0_4] : memref<5x256xf32, #tpu.memory_space<vmem>>, vector<1x256xf32>
    %10 = vector.broadcast %9 : vector<1x256xf32> to vector<128x256xf32>
    %11 = arith.addf %8, %10 : vector<128x256xf32>
    %cst_5 = arith.constant 0.000000e+00 : f32
    %12 = vector.broadcast %cst_5 : f32 to vector<128x256xf32>
    %13 = arith.maximumf %11, %12 : vector<128x256xf32>
    %c0_6 = arith.constant 0 : index
    %c0_7 = arith.constant 0 : index
    %c0_8 = arith.constant 0 : index
    %14 = vector.load %arg7[%c0_6, %c0_7, %c0_8] : memref<5x256x256xf32, #tpu.memory_space<vmem>>, vector<1x256x256xf32>
    %15 = vector.shape_cast %14 : vector<1x256x256xf32> to vector<256x256xf32>
    %cst_9 = arith.constant dense<0.000000e+00> : vector<128x256xf32>
    %16 = tpu.matmul %13, %15, %cst_9 {dimension_numbers = #tpu.dot_dimension_numbers<[1], [0], [0], [1], [0, 0, 1, 1], [], []>} : vector<128x256xf32>, vector<256x256xf32>, vector<128x256xf32> -> vector<128x256xf32>
    %c0_10 = arith.constant 0 : index
    %c0_11 = arith.constant 0 : index
    %17 = vector.load %arg10[%c0_10, %c0_11] : memref<128x256xf32, #tpu.memory_space<vmem>>, vector<128x256xf32>
    tpu.vector_store %arg10[%c0_10, %c0_11], %16 {strides = array<i32>} : memref<128x256xf32, #tpu.memory_space<vmem>>, vector<128x256xf32>,
    %c4_i32 = arith.constant 4 : i32
    %18 = arith.addi %1, %c4_i32 : i32
    %c0_i32 = arith.constant 0 : i32
    %19 = arith.addi %18, %c0_i32 : i32
    %c0_12 = arith.constant 0 : index
    %20 = arith.index_cast %19 : i32 to index
    %c4 = arith.constant 4 : index
    %c0_13 = arith.constant 0 : index
    %21 = vector.load %arg2[%c0_12, %20, %c4, %c0_13] : memref<1x28x28x4xf32, #tpu.memory_space<vmem>>, vector<1x8x16x4xf32>
    %22 = vector.shape_cast %21 : vector<1x8x16x4xf32> to vector<8x16x4xf32>
    %c0_14 = arith.constant 0 : index
    %23 = arith.index_cast %19 : i32 to index
    %c6_15 = arith.constant 6 : index
    %c0_16 = arith.constant 0 : index
    %24 = vector.load %arg2[%c0_14, %23, %c6_15, %c0_16] : memref<1x28x28x4xf32, #tpu.memory_space<vmem>>, vector<1x8x16x4xf32>
    %25 = vector.shape_cast %24 : vector<1x8x16x4xf32> to vector<8x16x4xf32>
    %c0_17 = arith.constant 0 : index
    %26 = arith.index_cast %19 : i32 to index
    %c8 = arith.constant 8 : index
    %c0_18 = arith.constant 0 : index
    %27 = vector.load %arg2[%c0_17, %26, %c8, %c0_18] : memref<1x28x28x4xf32, #tpu.memory_space<vmem>>, vector<1x8x16x4xf32>
    %28 = vector.shape_cast %27 : vector<1x8x16x4xf32> to vector<8x16x4xf32>
    %c4_i32_19 = arith.constant 4 : i32
    %29 = arith.addi %1, %c4_i32_19 : i32
    %c2_i32 = arith.constant 2 : i32
    %30 = arith.addi %29, %c2_i32 : i32
    %c0_20 = arith.constant 0 : index
    %31 = arith.index_cast %30 : i32 to index
    %c4_21 = arith.constant 4 : index
    %c0_22 = arith.constant 0 : index
    %32 = vector.load %arg2[%c0_20, %31, %c4_21, %c0_22] : memref<1x28x28x4xf32, #tpu.memory_space<vmem>>, vector<1x8x16x4xf32>
    %33 = vector.shape_cast %32 : vector<1x8x16x4xf32> to vector<8x16x4xf32>
    %c0_23 = arith.constant 0 : index
    %34 = arith.index_cast %30 : i32 to index
    %c6_24 = arith.constant 6 : index
    %c0_25 = arith.constant 0 : index
    %35 = vector.load %arg2[%c0_23, %34, %c6_24, %c0_25] : memref<1x28x28x4xf32, #tpu.memory_space<vmem>>, vector<1x8x16x4xf32>
    %36 = vector.shape_cast %35 : vector<1x8x16x4xf32> to vector<8x16x4xf32>
    %c0_26 = arith.constant 0 : index
    %37 = arith.index_cast %30 : i32 to index
    %c8_27 = arith.constant 8 : index
    %c0_28 = arith.constant 0 : index
    %38 = vector.load %arg2[%c0_26, %37, %c8_27, %c0_28] : memref<1x28x28x4xf32, #tpu.memory_space<vmem>>, vector<1x8x16x4xf32>
    %39 = vector.shape_cast %38 : vector<1x8x16x4xf32> to vector<8x16x4xf32>
    %c4_i32_29 = arith.constant 4 : i32
    %40 = arith.addi %1, %c4_i32_29 : i32
    %c4_i32_30 = arith.constant 4 : i32
    %41 = arith.addi %40, %c4_i32_30 : i32
    %c0_31 = arith.constant 0 : index
    %42 = arith.index_cast %41 : i32 to index
    %c4_32 = arith.constant 4 : index
    %c0_33 = arith.constant 0 : index
    %43 = vector.load %arg2[%c0_31, %42, %c4_32, %c0_33] : memref<1x28x28x4xf32, #tpu.memory_space<vmem>>, vector<1x8x16x4xf32>
    %44 = vector.shape_cast %43 : vector<1x8x16x4xf32> to vector<8x16x4xf32>
    %c0_34 = arith.constant 0 : index
    %45 = arith.index_cast %41 : i32 to index
    %c6_35 = arith.constant 6 : index
    %c0_36 = arith.constant 0 : index
    %46 = vector.load %arg2[%c0_34, %45, %c6_35, %c0_36] : memref<1x28x28x4xf32, #tpu.memory_space<vmem>>, vector<1x8x16x4xf32>
    %47 = vector.shape_cast %46 : vector<1x8x16x4xf32> to vector<8x16x4xf32>
    %c0_37 = arith.constant 0 : index
    %48 = arith.index_cast %41 : i32 to index
    %c8_38 = arith.constant 8 : index
    %c0_39 = arith.constant 0 : index
    %49 = vector.load %arg2[%c0_37, %48, %c8_38, %c0_39] : memref<1x28x28x4xf32, #tpu.memory_space<vmem>>, vector<1x8x16x4xf32>
    %50 = vector.shape_cast %49 : vector<1x8x16x4xf32> to vector<8x16x4xf32>
    %51 = tpu.concatenate %22, %25, %28, %33, %36, %39, %44, %47, %50 in 2 : vector<8x16x4xf32>, vector<8x16x4xf32>, vector<8x16x4xf32>, vector<8x16x4xf32>, vector<8x16x4xf32>, vector<8x16x4xf32>, vector<8x16x4xf32>, vector<8x16x4xf32>, vector<8x16x4xf32> -> vector<8x16x36xf32>
    %52 = vector.shape_cast %51 : vector<8x16x36xf32> to vector<128x36xf32>
    %c0_40 = arith.constant 0 : index
    %c0_41 = arith.constant 0 : index
    %c0_42 = arith.constant 0 : index
    %53 = vector.load %arg4[%c0_40, %c0_41, %c0_42] : memref<3x36x256xf32, #tpu.memory_space<vmem>>, vector<1x36x256xf32>
    %54 = vector.shape_cast %53 : vector<1x36x256xf32> to vector<36x256xf32>
    %cst_43 = arith.constant dense<0.000000e+00> : vector<128x256xf32>
    %55 = tpu.matmul %52, %54, %cst_43 {dimension_numbers = #tpu.dot_dimension_numbers<[1], [0], [0], [1], [0, 0, 1, 1], [], []>} : vector<128x36xf32>, vector<36x256xf32>, vector<128x256xf32> -> vector<128x256xf32>
    %c1 = arith.constant 1 : index
    %c0_44 = arith.constant 0 : index
    %56 = vector.load %arg6[%c1, %c0_44] : memref<5x256xf32, #tpu.memory_space<vmem>>, vector<1x256xf32>
    %57 = vector.broadcast %56 : vector<1x256xf32> to vector<128x256xf32>
    %58 = arith.addf %55, %57 : vector<128x256xf32>
    %cst_45 = arith.constant 0.000000e+00 : f32
    %59 = vector.broadcast %cst_45 : f32 to vector<128x256xf32>
    %60 = arith.maximumf %58, %59 : vector<128x256xf32>
    %c0_46 = arith.constant 0 : index
    %c0_47 = arith.constant 0 : index
    %61 = vector.load %arg10[%c0_46, %c0_47] : memref<128x256xf32, #tpu.memory_space<vmem>>, vector<128x256xf32>
    %c1_48 = arith.constant 1 : index
    %c0_49 = arith.constant 0 : index
    %c0_50 = arith.constant 0 : index
    %62 = vector.load %arg7[%c1_48, %c0_49, %c0_50] : memref<5x256x256xf32, #tpu.memory_space<vmem>>, vector<1x256x256xf32>
    %63 = vector.shape_cast %62 : vector<1x256x256xf32> to vector<256x256xf32>
    %cst_51 = arith.constant dense<0.000000e+00> : vector<128x256xf32>
    %64 = tpu.matmul %60, %63, %cst_51 {dimension_numbers = #tpu.dot_dimension_numbers<[1], [0], [0], [1], [0, 0, 1, 1], [], []>} : vector<128x256xf32>, vector<256x256xf32>, vector<128x256xf32> -> vector<128x256xf32>
    %65 = arith.addf %61, %64 : vector<128x256xf32>
    %c0_52 = arith.constant 0 : index
    %c0_53 = arith.constant 0 : index
    %66 = vector.load %arg10[%c0_52, %c0_53] : memref<128x256xf32, #tpu.memory_space<vmem>>, vector<128x256xf32>
    tpu.vector_store %arg10[%c0_52, %c0_53], %65 {strides = array<i32>} : memref<128x256xf32, #tpu.memory_space<vmem>>, vector<128x256xf32>,
    %c2_i32_54 = arith.constant 2 : i32
    %67 = arith.addi %1, %c2_i32_54 : i32
    %c0_i32_55 = arith.constant 0 : i32
    %68 = arith.addi %67, %c0_i32_55 : i32
    %c0_56 = arith.constant 0 : index
    %69 = arith.index_cast %68 : i32 to index
    %c2 = arith.constant 2 : index
    %c0_57 = arith.constant 0 : index
    %70 = vector.load %arg2[%c0_56, %69, %c2, %c0_57] : memref<1x28x28x4xf32, #tpu.memory_space<vmem>>, vector<1x8x16x4xf32>
    %71 = vector.shape_cast %70 : vector<1x8x16x4xf32> to vector<8x16x4xf32>
    %c0_58 = arith.constant 0 : index
    %72 = arith.index_cast %68 : i32 to index
    %c6_59 = arith.constant 6 : index
    %c0_60 = arith.constant 0 : index
    %73 = vector.load %arg2[%c0_58, %72, %c6_59, %c0_60] : memref<1x28x28x4xf32, #tpu.memory_space<vmem>>, vector<1x8x16x4xf32>
    %74 = vector.shape_cast %73 : vector<1x8x16x4xf32> to vector<8x16x4xf32>
    %c0_61 = arith.constant 0 : index
    %75 = arith.index_cast %68 : i32 to index
    %c10 = arith.constant 10 : index
    %c0_62 = arith.constant 0 : index
    %76 = vector.load %arg2[%c0_61, %75, %c10, %c0_62] : memref<1x28x28x4xf32, #tpu.memory_space<vmem>>, vector<1x8x16x4xf32>
    %77 = vector.shape_cast %76 : vector<1x8x16x4xf32> to vector<8x16x4xf32>
    %c2_i32_63 = arith.constant 2 : i32
    %78 = arith.addi %1, %c2_i32_63 : i32
    %c4_i32_64 = arith.constant 4 : i32
    %79 = arith.addi %78, %c4_i32_64 : i32
    %c0_65 = arith.constant 0 : index
    %80 = arith.index_cast %79 : i32 to index
    %c2_66 = arith.constant 2 : index
    %c0_67 = arith.constant 0 : index
    %81 = vector.load %arg2[%c0_65, %80, %c2_66, %c0_67] : memref<1x28x28x4xf32, #tpu.memory_space<vmem>>, vector<1x8x16x4xf32>
    %82 = vector.shape_cast %81 : vector<1x8x16x4xf32> to vector<8x16x4xf32>
    %c0_68 = arith.constant 0 : index
    %83 = arith.index_cast %79 : i32 to index
    %c6_69 = arith.constant 6 : index
    %c0_70 = arith.constant 0 : index
    %84 = vector.load %arg2[%c0_68, %83, %c6_69, %c0_70] : memref<1x28x28x4xf32, #tpu.memory_space<vmem>>, vector<1x8x16x4xf32>
    %85 = vector.shape_cast %84 : vector<1x8x16x4xf32> to vector<8x16x4xf32>
    %c0_71 = arith.constant 0 : index
    %86 = arith.index_cast %79 : i32 to index
    %c10_72 = arith.constant 10 : index
    %c0_73 = arith.constant 0 : index
    %87 = vector.load %arg2[%c0_71, %86, %c10_72, %c0_73] : memref<1x28x28x4xf32, #tpu.memory_space<vmem>>, vector<1x8x16x4xf32>
    %88 = vector.shape_cast %87 : vector<1x8x16x4xf32> to vector<8x16x4xf32>
    %c2_i32_74 = arith.constant 2 : i32
    %89 = arith.addi %1, %c2_i32_74 : i32
    %c8_i32_75 = arith.constant 8 : i32
    %90 = arith.addi %89, %c8_i32_75 : i32
    %c0_76 = arith.constant 0 : index
    %91 = arith.index_cast %90 : i32 to index
    %c2_77 = arith.constant 2 : index
    %c0_78 = arith.constant 0 : index
    %92 = vector.load %arg2[%c0_76, %91, %c2_77, %c0_78] : memref<1x28x28x4xf32, #tpu.memory_space<vmem>>, vector<1x8x16x4xf32>
    %93 = vector.shape_cast %92 : vector<1x8x16x4xf32> to vector<8x16x4xf32>
    %c0_79 = arith.constant 0 : index
    %94 = arith.index_cast %90 : i32 to index
    %c6_80 = arith.constant 6 : index
    %c0_81 = arith.constant 0 : index
    %95 = vector.load %arg2[%c0_79, %94, %c6_80, %c0_81] : memref<1x28x28x4xf32, #tpu.memory_space<vmem>>, vector<1x8x16x4xf32>
    %96 = vector.shape_cast %95 : vector<1x8x16x4xf32> to vector<8x16x4xf32>
    %c0_82 = arith.constant 0 : index
    %97 = arith.index_cast %90 : i32 to index
    %c10_83 = arith.constant 10 : index
    %c0_84 = arith.constant 0 : index
    %98 = vector.load %arg2[%c0_82, %97, %c10_83, %c0_84] : memref<1x28x28x4xf32, #tpu.memory_space<vmem>>, vector<1x8x16x4xf32>
    %99 = vector.shape_cast %98 : vector<1x8x16x4xf32> to vector<8x16x4xf32>
    %100 = tpu.concatenate %71, %74, %77, %82, %85, %88, %93, %96, %99 in 2 : vector<8x16x4xf32>, vector<8x16x4xf32>, vector<8x16x4xf32>, vector<8x16x4xf32>, vector<8x16x4xf32>, vector<8x16x4xf32>, vector<8x16x4xf32>, vector<8x16x4xf32>, vector<8x16x4xf32> -> vector<8x16x36xf32>
    %101 = vector.shape_cast %100 : vector<8x16x36xf32> to vector<128x36xf32>
    %c1_85 = arith.constant 1 : index
    %c0_86 = arith.constant 0 : index
    %c0_87 = arith.constant 0 : index
    %102 = vector.load %arg4[%c1_85, %c0_86, %c0_87] : memref<3x36x256xf32, #tpu.memory_space<vmem>>, vector<1x36x256xf32>
    %103 = vector.shape_cast %102 : vector<1x36x256xf32> to vector<36x256xf32>
    %cst_88 = arith.constant dense<0.000000e+00> : vector<128x256xf32>
    %104 = tpu.matmul %101, %103, %cst_88 {dimension_numbers = #tpu.dot_dimension_numbers<[1], [0], [0], [1], [0, 0, 1, 1], [], []>} : vector<128x36xf32>, vector<36x256xf32>, vector<128x256xf32> -> vector<128x256xf32>
    %c2_89 = arith.constant 2 : index
    %c0_90 = arith.constant 0 : index
    %105 = vector.load %arg6[%c2_89, %c0_90] : memref<5x256xf32, #tpu.memory_space<vmem>>, vector<1x256xf32>
    %106 = vector.broadcast %105 : vector<1x256xf32> to vector<128x256xf32>
    %107 = arith.addf %104, %106 : vector<128x256xf32>
    %cst_91 = arith.constant 0.000000e+00 : f32
    %108 = vector.broadcast %cst_91 : f32 to vector<128x256xf32>
    %109 = arith.maximumf %107, %108 : vector<128x256xf32>
    %c0_92 = arith.constant 0 : index
    %c0_93 = arith.constant 0 : index
    %110 = vector.load %arg10[%c0_92, %c0_93] : memref<128x256xf32, #tpu.memory_space<vmem>>, vector<128x256xf32>
    %c2_94 = arith.constant 2 : index
    %c0_95 = arith.constant 0 : index
    %c0_96 = arith.constant 0 : index
    %111 = vector.load %arg7[%c2_94, %c0_95, %c0_96] : memref<5x256x256xf32, #tpu.memory_space<vmem>>, vector<1x256x256xf32>
    %112 = vector.shape_cast %111 : vector<1x256x256xf32> to vector<256x256xf32>
    %cst_97 = arith.constant dense<0.000000e+00> : vector<128x256xf32>
    %113 = tpu.matmul %109, %112, %cst_97 {dimension_numbers = #tpu.dot_dimension_numbers<[1], [0], [0], [1], [0, 0, 1, 1], [], []>} : vector<128x256xf32>, vector<256x256xf32>, vector<128x256xf32> -> vector<128x256xf32>
    %114 = arith.addf %110, %113 : vector<128x256xf32>
    %c0_98 = arith.constant 0 : index
    %c0_99 = arith.constant 0 : index
    %115 = vector.load %arg10[%c0_98, %c0_99] : memref<128x256xf32, #tpu.memory_space<vmem>>, vector<128x256xf32>
    tpu.vector_store %arg10[%c0_98, %c0_99], %114 {strides = array<i32>} : memref<128x256xf32, #tpu.memory_space<vmem>>, vector<128x256xf32>,
    %c0_i32_100 = arith.constant 0 : i32
    %116 = arith.addi %1, %c0_i32_100 : i32
    %c0_i32_101 = arith.constant 0 : i32
    %117 = arith.addi %116, %c0_i32_101 : i32
    %c0_102 = arith.constant 0 : index
    %118 = arith.index_cast %117 : i32 to index
    %c0_103 = arith.constant 0 : index
    %c0_104 = arith.constant 0 : index
    %119 = vector.load %arg2[%c0_102, %118, %c0_103, %c0_104] : memref<1x28x28x4xf32, #tpu.memory_space<vmem>>, vector<1x8x16x4xf32>
    %120 = vector.shape_cast %119 : vector<1x8x16x4xf32> to vector<8x16x4xf32>
    %c0_105 = arith.constant 0 : index
    %121 = arith.index_cast %117 : i32 to index
    %c6_106 = arith.constant 6 : index
    %c0_107 = arith.constant 0 : index
    %122 = vector.load %arg2[%c0_105, %121, %c6_106, %c0_107] : memref<1x28x28x4xf32, #tpu.memory_space<vmem>>, vector<1x8x16x4xf32>
    %123 = vector.shape_cast %122 : vector<1x8x16x4xf32> to vector<8x16x4xf32>
    %c0_108 = arith.constant 0 : index
    %124 = arith.index_cast %117 : i32 to index
    %c12 = arith.constant 12 : index
    %c0_109 = arith.constant 0 : index
    %125 = vector.load %arg2[%c0_108, %124, %c12, %c0_109] : memref<1x28x28x4xf32, #tpu.memory_space<vmem>>, vector<1x8x16x4xf32>
    %126 = vector.shape_cast %125 : vector<1x8x16x4xf32> to vector<8x16x4xf32>
    %c0_i32_110 = arith.constant 0 : i32
    %127 = arith.addi %1, %c0_i32_110 : i32
    %c6_i32_111 = arith.constant 6 : i32
    %128 = arith.addi %127, %c6_i32_111 : i32
    %c0_112 = arith.constant 0 : index
    %129 = arith.index_cast %128 : i32 to index
    %c0_113 = arith.constant 0 : index
    %c0_114 = arith.constant 0 : index
    %130 = vector.load %arg2[%c0_112, %129, %c0_113, %c0_114] : memref<1x28x28x4xf32, #tpu.memory_space<vmem>>, vector<1x8x16x4xf32>
    %131 = vector.shape_cast %130 : vector<1x8x16x4xf32> to vector<8x16x4xf32>
    %c0_115 = arith.constant 0 : index
    %132 = arith.index_cast %128 : i32 to index
    %c6_116 = arith.constant 6 : index
    %c0_117 = arith.constant 0 : index
    %133 = vector.load %arg2[%c0_115, %132, %c6_116, %c0_117] : memref<1x28x28x4xf32, #tpu.memory_space<vmem>>, vector<1x8x16x4xf32>
    %134 = vector.shape_cast %133 : vector<1x8x16x4xf32> to vector<8x16x4xf32>
    %c0_118 = arith.constant 0 : index
    %135 = arith.index_cast %128 : i32 to index
    %c12_119 = arith.constant 12 : index
    %c0_120 = arith.constant 0 : index
    %136 = vector.load %arg2[%c0_118, %135, %c12_119, %c0_120] : memref<1x28x28x4xf32, #tpu.memory_space<vmem>>, vector<1x8x16x4xf32>
    %137 = vector.shape_cast %136 : vector<1x8x16x4xf32> to vector<8x16x4xf32>
    %c0_i32_121 = arith.constant 0 : i32
    %138 = arith.addi %1, %c0_i32_121 : i32
    %c12_i32 = arith.constant 12 : i32
    %139 = arith.addi %138, %c12_i32 : i32
    %c0_122 = arith.constant 0 : index
    %140 = arith.index_cast %139 : i32 to index
    %c0_123 = arith.constant 0 : index
    %c0_124 = arith.constant 0 : index
    %141 = vector.load %arg2[%c0_122, %140, %c0_123, %c0_124] : memref<1x28x28x4xf32, #tpu.memory_space<vmem>>, vector<1x8x16x4xf32>
    %142 = vector.shape_cast %141 : vector<1x8x16x4xf32> to vector<8x16x4xf32>
    %c0_125 = arith.constant 0 : index
    %143 = arith.index_cast %139 : i32 to index
    %c6_126 = arith.constant 6 : index
    %c0_127 = arith.constant 0 : index
    %144 = vector.load %arg2[%c0_125, %143, %c6_126, %c0_127] : memref<1x28x28x4xf32, #tpu.memory_space<vmem>>, vector<1x8x16x4xf32>
    %145 = vector.shape_cast %144 : vector<1x8x16x4xf32> to vector<8x16x4xf32>
    %c0_128 = arith.constant 0 : index
    %146 = arith.index_cast %139 : i32 to index
    %c12_129 = arith.constant 12 : index
    %c0_130 = arith.constant 0 : index
    %147 = vector.load %arg2[%c0_128, %146, %c12_129, %c0_130] : memref<1x28x28x4xf32, #tpu.memory_space<vmem>>, vector<1x8x16x4xf32>
    %148 = vector.shape_cast %147 : vector<1x8x16x4xf32> to vector<8x16x4xf32>
    %149 = tpu.concatenate %120, %123, %126, %131, %134, %137, %142, %145, %148 in 2 : vector<8x16x4xf32>, vector<8x16x4xf32>, vector<8x16x4xf32>, vector<8x16x4xf32>, vector<8x16x4xf32>, vector<8x16x4xf32>, vector<8x16x4xf32>, vector<8x16x4xf32>, vector<8x16x4xf32> -> vector<8x16x36xf32>
    %150 = vector.shape_cast %149 : vector<8x16x36xf32> to vector<128x36xf32>
    %c2_131 = arith.constant 2 : index
    %c0_132 = arith.constant 0 : index
    %c0_133 = arith.constant 0 : index
    %151 = vector.load %arg4[%c2_131, %c0_132, %c0_133] : memref<3x36x256xf32, #tpu.memory_space<vmem>>, vector<1x36x256xf32>
    %152 = vector.shape_cast %151 : vector<1x36x256xf32> to vector<36x256xf32>
    %cst_134 = arith.constant dense<0.000000e+00> : vector<128x256xf32>
    %153 = tpu.matmul %150, %152, %cst_134 {dimension_numbers = #tpu.dot_dimension_numbers<[1], [0], [0], [1], [0, 0, 1, 1], [], []>} : vector<128x36xf32>, vector<36x256xf32>, vector<128x256xf32> -> vector<128x256xf32>
    %c3 = arith.constant 3 : index
    %c0_135 = arith.constant 0 : index
    %154 = vector.load %arg6[%c3, %c0_135] : memref<5x256xf32, #tpu.memory_space<vmem>>, vector<1x256xf32>
    %155 = vector.broadcast %154 : vector<1x256xf32> to vector<128x256xf32>
    %156 = arith.addf %153, %155 : vector<128x256xf32>
    %cst_136 = arith.constant 0.000000e+00 : f32
    %157 = vector.broadcast %cst_136 : f32 to vector<128x256xf32>
    %158 = arith.maximumf %156, %157 : vector<128x256xf32>
    %c0_137 = arith.constant 0 : index
    %c0_138 = arith.constant 0 : index
    %159 = vector.load %arg10[%c0_137, %c0_138] : memref<128x256xf32, #tpu.memory_space<vmem>>, vector<128x256xf32>
    %c3_139 = arith.constant 3 : index
    %c0_140 = arith.constant 0 : index
    %c0_141 = arith.constant 0 : index
    %160 = vector.load %arg7[%c3_139, %c0_140, %c0_141] : memref<5x256x256xf32, #tpu.memory_space<vmem>>, vector<1x256x256xf32>
    %161 = vector.shape_cast %160 : vector<1x256x256xf32> to vector<256x256xf32>
    %cst_142 = arith.constant dense<0.000000e+00> : vector<128x256xf32>
    %162 = tpu.matmul %158, %161, %cst_142 {dimension_numbers = #tpu.dot_dimension_numbers<[1], [0], [0], [1], [0, 0, 1, 1], [], []>} : vector<128x256xf32>, vector<256x256xf32>, vector<128x256xf32> -> vector<128x256xf32>
    %163 = arith.addf %159, %162 : vector<128x256xf32>
    %c0_143 = arith.constant 0 : index
    %c0_144 = arith.constant 0 : index
    %164 = vector.load %arg10[%c0_143, %c0_144] : memref<128x256xf32, #tpu.memory_space<vmem>>, vector<128x256xf32>
    tpu.vector_store %arg10[%c0_143, %c0_144], %163 {strides = array<i32>} : memref<128x256xf32, #tpu.memory_space<vmem>>, vector<128x256xf32>,
    %c0_145 = arith.constant 0 : index
    %c6_146 = arith.constant 6 : index
    %c6_147 = arith.constant 6 : index
    %c0_148 = arith.constant 0 : index
    %165 = vector.load %arg2[%c0_145, %c6_146, %c6_147, %c0_148] : memref<1x28x28x4xf32, #tpu.memory_space<vmem>>, vector<1x16x16x4xf32>
    %166 = vector.shape_cast %165 : vector<1x16x16x4xf32> to vector<16x16x4xf32>
    %cst_149 = arith.constant dense<0.000000e+00> : vector<4xf32>
    %167 = vector.multi_reduction <add>, %166, %cst_149 [0, 1] : vector<16x16x4xf32> to vector<4xf32>
    %168 = vector.shape_cast %167 : vector<4xf32> to vector<1x1x4xf32>
    %cst_150 = arith.constant 2.560000e+02 : f32
    %169 = vector.broadcast %cst_150 : f32 to vector<1x1x4xf32>
    %170 = arith.divf %168, %169 : vector<1x1x4xf32>
    %171 = vector.shape_cast %170 : vector<1x1x4xf32> to vector<1x4xf32>
    %c0_151 = arith.constant 0 : index
    %c0_152 = arith.constant 0 : index
    %172 = vector.load %arg5[%c0_151, %c0_152] : memref<4x256xf32, #tpu.memory_space<vmem>>, vector<4x256xf32>
    %cst_153 = arith.constant dense<0.000000e+00> : vector<1x256xf32>
    %173 = tpu.matmul %171, %172, %cst_153 {dimension_numbers = #tpu.dot_dimension_numbers<[1], [0], [0], [1], [0, 0, 1, 1], [], []>} : vector<1x4xf32>, vector<4x256xf32>, vector<1x256xf32> -> vector<1x256xf32>
    %c4_154 = arith.constant 4 : index
    %c0_155 = arith.constant 0 : index
    %174 = vector.load %arg6[%c4_154, %c0_155] : memref<5x256xf32, #tpu.memory_space<vmem>>, vector<1x256xf32>
    %175 = arith.addf %173, %174 : vector<1x256xf32>
    %cst_156 = arith.constant 0.000000e+00 : f32
    %176 = vector.broadcast %cst_156 : f32 to vector<1x256xf32>
    %177 = arith.maximumf %175, %176 : vector<1x256xf32>
    %c4_157 = arith.constant 4 : index
    %c0_158 = arith.constant 0 : index
    %c0_159 = arith.constant 0 : index
    %178 = vector.load %arg7[%c4_157, %c0_158, %c0_159] : memref<5x256x256xf32, #tpu.memory_space<vmem>>, vector<1x256x256xf32>
    %179 = vector.shape_cast %178 : vector<1x256x256xf32> to vector<256x256xf32>
    %cst_160 = arith.constant dense<0.000000e+00> : vector<1x256xf32>
    %180 = tpu.matmul %177, %179, %cst_160 {dimension_numbers = #tpu.dot_dimension_numbers<[1], [0], [0], [1], [0, 0, 1, 1], [], []>} : vector<1x256xf32>, vector<256x256xf32>, vector<1x256xf32> -> vector<1x256xf32>
    %c0_161 = arith.constant 0 : index
    %c0_162 = arith.constant 0 : index
    %181 = vector.load %arg8[%c0_161, %c0_162] : memref<1x256xf32, #tpu.memory_space<vmem>>, vector<1x256xf32>
    %182 = arith.addf %180, %181 : vector<1x256xf32>
    %c0_163 = arith.constant 0 : index
    %c0_164 = arith.constant 0 : index
    %183 = vector.load %arg10[%c0_163, %c0_164] : memref<128x256xf32, #tpu.memory_space<vmem>>, vector<128x256xf32>
    %184 = vector.broadcast %182 : vector<1x256xf32> to vector<128x256xf32>
    %185 = arith.addf %183, %184 : vector<128x256xf32>
    %cst_165 = arith.constant 0.000000e+00 : f32
    %186 = vector.broadcast %cst_165 : f32 to vector<128x256xf32>
    %187 = arith.maximumf %185, %186 : vector<128x256xf32>
    %188 = vector.shape_cast %187 : vector<128x256xf32> to vector<8x16x256xf32>
    %c0_166 = arith.constant 0 : index
    %c0_167 = arith.constant 0 : index
    %c0_168 = arith.constant 0 : index
    %c0_169 = arith.constant 0 : index
    %189 = vector.load %arg9[%c0_166, %c0_167, %c0_168, %c0_169] : memref<1x8x16x256xf32, #tpu.memory_space<vmem>>, vector<1x8x16x256xf32>
    %190 = vector.shape_cast %189 : vector<1x8x16x256xf32> to vector<8x16x256xf32>
    %191 = vector.shape_cast %188 : vector<8x16x256xf32> to vector<1x8x16x256xf32>
    tpu.vector_store %arg9[%c0_166, %c0_167, %c0_168, %c0_169], %191 {strides = array<i32>} : memref<1x8x16x256xf32, #tpu.memory_space<vmem>>, vector<1x8x16x256xf32>,
    return
  }
  func.func @transform_0(%arg0: i32, %arg1: i32) -> (i32, i32, i32, i32) {
    %c0_i32 = arith.constant 0 : i32
    %c0_i32_0 = arith.constant 0 : i32
    %c0_i32_1 = arith.constant 0 : i32
    %c0_i32_2 = arith.constant 0 : i32
    return %arg0, %c0_i32, %c0_i32_0, %c0_i32_1 : i32, i32, i32, i32
  }
  func.func @transform_1(%arg0: i32, %arg1: i32) -> (i32, i32) {
    %c0_i32 = arith.constant 0 : i32
    %c0_i32_0 = arith.constant 0 : i32
    %c0_i32_1 = arith.constant 0 : i32
    return %c0_i32, %c0_i32_0 : i32, i32
  }
  func.func @transform_2(%arg0: i32, %arg1: i32) -> (i32, i32, i32) {
    %c0_i32 = arith.constant 0 : i32
    %c0_i32_0 = arith.constant 0 : i32
    %c0_i32_1 = arith.constant 0 : i32
    %c0_i32_2 = arith.constant 0 : i32
    return %c0_i32, %c0_i32_0, %c0_i32_1 : i32, i32, i32
  }
  func.func @transform_3(%arg0: i32, %arg1: i32) -> (i32, i32) {
    %c0_i32 = arith.constant 0 : i32
    %c0_i32_0 = arith.constant 0 : i32
    %c0_i32_1 = arith.constant 0 : i32
    return %c0_i32, %c0_i32_0 : i32, i32
  }
  func.func @transform_4(%arg0: i32, %arg1: i32) -> (i32, i32) {
    %c0_i32 = arith.constant 0 : i32
    %c0_i32_0 = arith.constant 0 : i32
    %c0_i32_1 = arith.constant 0 : i32
    return %c0_i32, %c0_i32_0 : i32, i32
  }
  func.func @transform_5(%arg0: i32, %arg1: i32) -> (i32, i32, i32) {
    %c0_i32 = arith.constant 0 : i32
    %c0_i32_0 = arith.constant 0 : i32
    %c0_i32_1 = arith.constant 0 : i32
    %c0_i32_2 = arith.constant 0 : i32
    return %c0_i32, %c0_i32_0, %c0_i32_1 : i32, i32, i32
  }
  func.func @transform_6(%arg0: i32, %arg1: i32) -> (i32, i32) {
    %c0_i32 = arith.constant 0 : i32
    %c0_i32_0 = arith.constant 0 : i32
    %c0_i32_1 = arith.constant 0 : i32
    return %c0_i32, %c0_i32_0 : i32, i32
  }
  func.func @transform_7(%arg0: i32, %arg1: i32) -> (i32, i32, i32, i32) {
    %c0_i32 = arith.constant 0 : i32
    %c0_i32_0 = arith.constant 0 : i32
    %c0_i32_1 = arith.constant 0 : i32
    return %arg0, %arg1, %c0_i32, %c0_i32_0 : i32, i32, i32, i32
  }
}

</mosaic_0001>

<bundles_post_ra>
// kernel: aspp_forward.1
= control target key start
LH: loop header
LB: loop body
LE: loop exit
PB: predicated region body
PF: predicated region fallthrough
CT: control target
= control target key end

     0   :  { %s10334_s0 = inlined_call_operand.vmem [shape: f32[2,28,28,4], index: 0, kind: input, shape index: {}]   ;;  %s10335_s1 = inlined_call_operand.vmem [shape: f32[4,256], index: 1, kind: input, shape index: {}]   ;;  %s10336_s2 = inlined_call_operand.vmem [shape: f32[3,36,256], index: 2, kind: input, shape index: {}]   ;;  %s10337_s3 = inlined_call_operand.vmem [shape: f32[4,256], index: 3, kind: input, shape index: {}]   ;;  %s10338_s4 = inlined_call_operand.vmem [shape: f32[5,256], index: 4, kind: input, shape index: {}]   ;;  %s10339_s5 = inlined_call_operand.vmem [shape: f32[5,256,256], index: 5, kind: input, shape index: {}]   ;;  %s10340_s6 = inlined_call_operand.vmem [shape: f32[1,256], index: 6, kind: input, shape index: {}]   ;;  %s10341_s7 = inlined_call_operand.hbm [shape: f32[2,16,16,256], index: 7, kind: output, shape index: {}]  }
   0x1   :  { %10365 = sst [smem:[#allocation15_spill]] %s10334_s0 }
   0x2   :  { %10366 = sst [smem:[#allocation16_spill]] %s10335_s1 }
   0x3   :  { %12 = vsyncpa [#allocation4], 0 }
   0x4   :  { %14 = vsyncpa [#allocation4 + $0x1], 0  ;;  %s7035_s24 = smov 0   ;;  %s7037_s25 = smov 0  }
   0x5   :  { %s7039_s26 = smov 0   ;;  %s7041_s27 = smov 0  }
   0x6   :  { %s7043_s28 = smov 0   ;;  %s7045_s29 = smov 0  }
   0x7   :  { %s7047_s30 = smov 0   ;;  %s7049_s8 = smov 0  }
   0x8 LB: > { %10367 = sst [smem:[#allocation6_spill]] %s6962_s26  ;;  %s5549_s9 = sadd.s32 4294967295, %s6982_s8   ;;  %s6982_s8 = sphi %s7049_s8, %s20_s8   ;;  %s6978_s30 = sphi %s7047_s30, %s10397_s30   ;;  %s6974_s29 = sphi %s7045_s29, %s10396_s29   ;;  %s6970_s28 = sphi %s7043_s28, %s10395_s28   ;;  %s6966_s27 = sphi %s7041_s27, %s10394_s27   ;;  %s6962_s26 = sphi %s7039_s26, %s10393_s26   ;;  %s6958_s25 = sphi %s7037_s25, %s10399_s25   ;;  %s6954_s24 = sphi %s7035_s24, %s10398_s24  }
   0x9   : > { %10368 = sst [smem:[#allocation7_spill]] %s6974_s29  ;;  %s5550_s10 = sadd.s32 4294967294, %s6982_s8  }
   0xa   : > { %10369 = sst [smem:[#allocation8_spill]] %s6978_s30  ;;  %s29_s11 = sadd.s32 1, %s6974_s29 }
   0xb   : > { %p30_p0 = scmp.ge.s32.totalorder %s29_s11, 2  ;;  %s32_s12 = sadd.s32 1, %s6978_s30 }
   0xc   : > { %p203_p1 = scmp.ne.s32.totalorder %s6962_s26, %s6958_s25  ;;  %p204_p2 = scmp.eq.s32.totalorder %s5549_s9, 3 }
   0xd   : > { %s10401_s11 = smov (%p30_p0, %s29_s11), 0  ;;  %s10403_s12 = smov (!%p30_p0, %s32_s12), %s6978_s30 }
   0xe   : > { %10370 = sst [smem:[#allocation9_spill]] %s10401_s11  ;;  %s189_s13 = ssub.s32 %s6974_s29, %s10401_s11 }
   0xf   : > { %p7086_p3 = por %p204_p2, %p203_p1  ;;  %p34_p4 = scmp.ge.s32.totalorder %s10403_s12, 2 }
  0x10   : > { %p209_p5 = scmp.ne.s32.totalorder %s6958_s25, %s6954_s24  ;;  %p210_p6 = scmp.eq.s32.totalorder %s5550_s10, 3 }
  0x11   : > { %p5553_p7 = scmp.ge.s32.totalorder %s6982_s8, 1  ;;  %s10405_s12 = smov (%p34_p4, %s10403_s12), 0 }
  0x12   : > { %10372 = sst [smem:[#allocation10_spill]] %s10405_s12  ;;  %p7095_p8 = por %p210_p6, %p209_p5 }
  0x13   : > { %p254_p9 = scmp.lt.s32.totalorder %s6982_s8, 5  ;;  %s188_s16 = ssub.s32 %s6978_s30, %s10405_s12 }
  0x14   : > { %s193_s17 = sadd.s32 1, %s6962_s26  ;;  %s190_s18 = sor.u32 %s189_s13, %s188_s16 }
  0x15   : > { %p255_p10 = pnand %p5553_p7, %p254_p9  ;;  %p191_p11 = scmp.eq.s32.totalorder %s190_s18, 0 }
  0x17   : > { %s7104_s19 = scalar_select %p191_p11, %s6962_s26, %s193_s17  }
  0x18   : > { %258 = sbr.rel (%p255_p10) target bundleno = 1397 (0x575), region = 48 }
  0x19   : > { %10374 = sst [smem:[#allocation11_spill]] %s7104_s19 }
  0x1f   : > { %p286_p12 = scmp.lt.s32.totalorder %s6970_s28, 1  ;;  %s6340_s22 = sshll.u32 %s6966_s27, 8  ;;  %v10362_v6 = vmov 0.0   ;;  %vm376_vm0 = vcmask 1043456   ;;  %vm327_vm1 = vcmask 31744   ;;  %v1629_v35 = vld [vmem:[%s10336_s2 + $0x8] sm:$0xff] }
  0x20   : > { %s10375_s0 = sld [smem:[#allocation15_spill]]  ;;  %s10343_s13 = smov 4   ;;  %445 = vmatprep.mubr.f32.mxu0 %v10362_v6  ;;  %v1631_v36 = vld [vmem:[%s10336_s2 + $0x18] sm:$0xff]  ;;  %v1628_v38 = vld [vmem:[%s10336_s2] sm:$0xff]  ;;  %v1630_v39 = vld [vmem:[%s10336_s2 + $0x10] sm:$0xff]  ;;  %vm1509_vm2 = vcmask 64512  }
  0x21   : > { %s287_s20 = scalar_select %p286_p12, %s6970_s28, 1  ;;  %v6412_v37 = vpack.c.bf16 %v1631_v36, %v1629_v35  ;;  %v6414_v42 = vpack.c.bf16 %v1630_v39, %v1628_v38  ;;  %v1633_v43 = vld [vmem:[%s10336_s2 + $0x28] sm:$0xff]  ;;  %v1635_v44 = vld [vmem:[%s10336_s2 + $0x38] sm:$0xff]  ;;  %v1632_v46 = vld [vmem:[%s10336_s2 + $0x20] sm:$0xff]  ;;  %vm1526_vm3 = vcmask 97280   ;;  %vm1543_vm4 = vcmask 130048  }
  0x22   : > { %s10376_s1 = sld [smem:[#allocation16_spill]]  ;;  %s10345_s18 = smov 8   ;;  %v6416_v45 = vpack.c.bf16 %v1635_v44, %v1633_v43  ;;  %v1634_v47 = vld [vmem:[%s10336_s2 + $0x30] sm:$0xff]  ;;  %v1637_v53 = vld [vmem:[%s10336_s2 + $0x48] sm:$0xf]  ;;  %v577_v36 = vld [vmem:[%s10339_s5 + $0x18] sm:$0xff] }
  0x23   : > { %s6788_s21 = smul.u32 896, %s287_s20  ;;  %s10349_s23 = smov 12   ;;  %v6418_v50 = vpack.c.bf16 %v1634_v47, %v1632_v46  ;;  %v1636_v54 = vld [vmem:[%s10336_s2 + $0x40] sm:$0xf]  ;;  %v575_v35 = vld [vmem:[%s10339_s5 + $0x8] sm:$0xff]  ;;  %v576_v38 = vld [vmem:[%s10339_s5 + $0x10] sm:$0xff] }
  0x24   : > { %s10355_s16 = smov 16   ;;  %s10353_s17 = smov 24   ;;  %v579_v44 = vld [vmem:[%s10339_s5 + $0x28] sm:$0xff]  ;;  %v578_v46 = vld [vmem:[%s10339_s5 + $0x20] sm:$0xff]  ;;  %v580_v47 = vld [vmem:[%s10339_s5 + $0x30] sm:$0xff]  ;;  %vm1560_vm5 = vcmask 162816  }
  0x25   : > { %s10351_s20 = smov 20   ;;  %vm1577_vm6 = vcmask 195584   ;;  %vm1594_vm7 = vcmask 228352   ;;  %vm1611_vm8 = vcmask 261120   ;;  %vm1651_vm9 = vcmask 293888   ;;  %s10387_s29 = smov 4  }
  0x26   : > { %s7112_s10 = scalar_lea.vmem %s10375_s0, %s6788_s21  ;;  %s10347_s21 = smov 28  }
  0x27   : > { %s7115_s12 = scalar_lea.vmem %s7112_s10, %s6340_s22  ;;  %s10378_s22 = smov 24  }
  0x28   : > { %v5613_v0 = vld [vmem:[%s7115_s12 + $0xa6] sm:$0xff]  ;;  %v5614_v2 = vld [vmem:[%s7115_s12 + $0xae] sm:$0xff]  ;;  %s10382_s0 = smov 32   ;;  %s10388_s9 = smov 8  }
  0x29   : > { %v5611_v1 = vld [vmem:[%s7115_s12 + $0x86] sm:$0xff]  ;;  %1001 = vrot.lane.b32.xlu1 %v5613_v0, %s10343_s13  ;;  %v5612_v3 = vld [vmem:[%s7115_s12 + $0x8e] sm:$0xff] }
  0x2a   : > { %997 = vrot.lane.b32.xlu0 %v5611_v1, %s10343_s13  ;;  %v7126_v4 = vld [vmem:[%s7115_s12 + $0xce] sm:$0xff]  ;;  %v7129_v5 = vld [vmem:[%s7115_s12 + $0xc6] sm:$0xff] }
  0x2b   : > { %v7137_v7 = vld [vmem:[%s7115_s12 + $0xee] sm:$0xff]  ;;  %v7140_v8 = vld [vmem:[%s7115_s12 + $0xe6] sm:$0xff] }
  0x2c   : > { %v7147_v9 = vld [vmem:[%s7115_s12 + $0x10e] sm:$0xff]  ;;  %v7150_v10 = vld [vmem:[%s7115_s12 + $0x106] sm:$0xff] }
  0x2d   : > { %1003 = vrot.lane.b32.xlu1 %v5614_v2, %s10343_s13  ;;  %v312_v11 = vld [vmem:[%s10376_s1] sm:$0xff]  ;;  %v7160_v13 = vld [vmem:[%s7115_s12 + $0x12e] sm:$0xff] }
  0x2e   : > { %999 = vrot.lane.b32.xlu0 %v5612_v3, %s10343_s13  ;;  %v326_v12 = vcombine.high %v312_v11, %v312_v11  ;;  %v7163_v14 = vld [vmem:[%s7115_s12 + $0x126] sm:$0xff]  ;;  %v7172_v15 = vld [vmem:[%s7115_s12 + $0x14e] sm:$0xff] }
  0x2f   : > { %v7175_v16 = vld [vmem:[%s7115_s12 + $0x146] sm:$0xff]  ;;  %v7185_v17 = vld [vmem:[%s7115_s12 + $0x16e] sm:$0xff] }
  0x30   : > { %5575 = vmatprep.subr.msk.mxu0 %vm376_vm0, %v326_v12  ;;  %v7188_v18 = vld [vmem:[%s7115_s12 + $0x166] sm:$0xff]  ;;  %v5628_v19 = vld [vmem:[%s7115_s12 + $0x90] sm:$0xff] }
  0x31   : > { %1007 = vrot.lane.b32.xlu1 %v7126_v4, %s10343_s13  ;;  %5576 = vmatpush1.msk.msra.mxu0 %vm376_vm0, %v312_v11  ;;  %v5627_v20 = vld [vmem:[%s7115_s12 + $0x88] sm:$0xff]  ;;  %v5630_v21 = vld [vmem:[%s7115_s12 + $0xb0] sm:$0xff] }
  0x32   : > { %1005 = vrot.lane.b32.xlu0 %v7129_v5, %s10343_s13  ;;  %5577 = vmatmul.mubr.msk.f32.vlgmr.msra.gmra.mrb[0].mxu0 %vm327_vm1, %v7129_v5  ;;  %v5629_v22 = vld [vmem:[%s7115_s12 + $0xa8] sm:$0xff]  ;;  %v7212_v23 = vld [vmem:[%s7115_s12 + $0xd0] sm:$0xff] }
  0x33   : > { %451 = vmatprep.mubr.f32.mxu0 %v10362_v6  ;;  %v7215_v24 = vld [vmem:[%s7115_s12 + $0xc8] sm:$0xff]  ;;  %v7225_v25 = vld [vmem:[%s7115_s12 + $0xf0] sm:$0xff]  ;;  %6413 = vmatprep.subr.bf16.mxu0 %v6412_v37  ;;  %v574_v37 = vld [vmem:[%s10339_s5] sm:$0xff] }
  0x34   : > { %v7228_v26 = vld [vmem:[%s7115_s12 + $0xe8] sm:$0xff]  ;;  %v7238_v27 = vld [vmem:[%s7115_s12 + $0x110] sm:$0xff]  ;;  %6415 = vmatpush1.bf16.msra.mxu0 %v6414_v42  ;;  %v6348_v42 = vpack.c.bf16 %v577_v36, %v575_v35  ;;  %v6350_v43 = vpack.c.bf16 %v576_v38, %v574_v37 }
  0x35   : > { %1011 = vrot.lane.b32.xlu1 %v7137_v7, %s10343_s13  ;;  %v7241_v28 = vld [vmem:[%s7115_s12 + $0x108] sm:$0xff]  ;;  %v7251_v29 = vld [vmem:[%s7115_s12 + $0x130] sm:$0xff]  ;;  %6417 = vmatprep.subr.bf16.mxu0 %v6416_v45  ;;  %v581_v45 = vld [vmem:[%s10339_s5 + $0x38] sm:$0xff] }
  0x36   : > { %1009 = vrot.lane.b32.xlu0 %v7140_v8, %s10343_s13  ;;  %5578 = vmatmul.mubr.msk.f32.gmra.mrb[2].mxu0 %vm327_vm1, %v7126_v4  ;;  %v7254_v30 = vld [vmem:[%s7115_s12 + $0x128] sm:$0xff]  ;;  %v7264_v31 = vld [vmem:[%s7115_s12 + $0x150] sm:$0xff] }
  0x37   : > { %457 = vmatprep.mubr.f32.mxu0 %v10362_v6  ;;  %v7267_v32 = vld [vmem:[%s7115_s12 + $0x148] sm:$0xff]  ;;  %v7277_v33 = vld [vmem:[%s7115_s12 + $0x170] sm:$0xff]  ;;  %6349 = vmatprep.subr.bf16.mxu1 %v6348_v42  ;;  %v589_v42 = vld [vmem:[%s10339_s5 + $0x78] sm:$0xff] }
  0x38   : > { %v7280_v34 = vld [vmem:[%s7115_s12 + $0x168] sm:$0xff]  ;;  %6419 = vmatpush1.bf16.msra.mxu0 %v6418_v50  ;;  %6351 = vmatpush1.bf16.msra.mxu1 %v6350_v43  ;;  %v6352_v50 = vpack.c.bf16 %v581_v45, %v579_v44  ;;  %v586_v43 = vld [vmem:[%s10339_s5 + $0x60] sm:$0xff]  ;;  %v588_v44 = vld [vmem:[%s10339_s5 + $0x70] sm:$0xff] }
  0x39   : > { %1015 = vrot.lane.b32.xlu1 %v7147_v9, %s10343_s13  ;;  %v7302_v40 = vld [vmem:[%s7115_s12 + $0xcc] sm:$0xff]  ;;  %v7305_v41 = vld [vmem:[%s7115_s12 + $0xc4] sm:$0xff]  ;;  %5742 = vmatprep.subr.msk.mxu0 %vm376_vm0, %v1637_v53 }
  0x3a   : > { %1013 = vrot.lane.b32.xlu0 %v7150_v10, %s10343_s13  ;;  %5579 = vmatmul.mubr.msk.f32.gmra.mrb[4].mxu0 %vm327_vm1, %v7140_v8  ;;  %v5646_v48 = vld [vmem:[%s7115_s12 + $0xec] sm:$0xff]  ;;  %v7328_v49 = vld [vmem:[%s7115_s12 + $0xe4] sm:$0xff] }
  0x3b   : > { %463 = vmatprep.mubr.f32.mxu0 %v10362_v6  ;;  %v7337_v51 = vld [vmem:[%s7115_s12 + $0x186] sm:$0xff]  ;;  %v7355_v55 = vld [vmem:[%s7115_s12 + $0x18e] sm:$0xff]  ;;  %6353 = vmatprep.subr.bf16.mxu1 %v6352_v50 }
  0x3c   : > { %v5647_v52 = vld [vmem:[%s7115_s12 + $0x104] sm:$0xff]  ;;  %5743 = vmatpush1.msk.msra.mxu0 %vm376_vm0, %v1636_v54  ;;  %v7370_v57 = vld [vmem:[%s7115_s12 + $0x1ae] sm:$0xff] }
  0x3d   : > { %1019 = vrot.lane.b32.xlu1 %v7160_v13, %s10343_s13  ;;  %v7361_v56 = vld [vmem:[%s7115_s12 + $0x1a6] sm:$0xff] }
  0x3e   : > { %1017 = vrot.lane.b32.xlu0 %v7163_v14, %s10343_s13  ;;  %5580 = vmatmul.mubr.msk.f32.gmra.mrb[6].mxu0 %vm327_vm1, %v7137_v7  ;;  %v5694_v58 = vld [vmem:[%s7115_s12 + $0x10c] sm:$0xff]  ;;  %v5695_v59 = vld [vmem:[%s7115_s12 + $0x124] sm:$0xff] }
  0x3f   : > { %469 = vmatprep.mubr.f32.mxu0 %v10362_v6  ;;  %v5696_v60 = vld [vmem:[%s7115_s12 + $0x12c] sm:$0xff]  ;;  %v5697_v61 = vld [vmem:[%s7115_s12 + $0x144] sm:$0xff] }
  0x40   : > { %v7458_v12 = vld [vmem:[%s7115_s12 + $0x164] sm:$0xff]  ;;  %v7575_v37 = vld [vmem:[%s7115_s12 + $0x18c] sm:$0xff] }
  0x41   : > { %1023 = vrot.lane.b32.xlu1 %v7172_v15, %s10343_s13  ;;  %v7552_v53 = vld [vmem:[%s7115_s12 + $0x188] sm:$0xff] }
  0x42   : > { %1021 = vrot.lane.b32.xlu0 %v7175_v16, %s10343_s13  ;;  %5581 = vmatmul.mubr.msk.f32.gmra.mrb[8].mxu0 %vm327_vm1, %v7150_v10  ;;  %v583_v54 = vld [vmem:[%s10339_s5 + $0x48] sm:$0xff] }
  0x43   : > { %475 = vmatprep.mubr.f32.mxu0 %v10362_v6  ;;  %v587_v38 = vld [vmem:[%s10339_s5 + $0x68] sm:$0xff] }
  0x44   : > { %v591_v50 = vld [vmem:[%s10339_s5 + $0x88] sm:$0xff] }
  0x45   : > { %1027 = vrot.lane.b32.xlu1 %v7185_v17, %s10343_s13 }
  0x46   : > { %1025 = vrot.lane.b32.xlu0 %v7188_v18, %s10343_s13  ;;  %5582 = vmatmul.mubr.msk.f32.gmra.mrb[10].mxu0 %vm327_vm1, %v7147_v9  ;;  %s10357_s13 = smov 32  }
  0x47   : > { %481 = vmatprep.mubr.f32.mxu0 %v10362_v6 }
  0x49   : > { %1063 = vrot.lane.b32.xlu1 %v5628_v19, %s10345_s18 }
  0x4a   : > { %1061 = vrot.lane.b32.xlu0 %v5627_v20, %s10345_s18  ;;  %5583 = vmatmul.mubr.msk.f32.gmra.mrb[12].mxu0 %vm327_vm1, %v7163_v14 }
  0x4b   : > { %487 = vmatprep.mubr.f32.mxu0 %v10362_v6 }
  0x4d   : > { %1067 = vrot.lane.b32.xlu1 %v5630_v21, %s10345_s18 }
  0x4e   : > { %1065 = vrot.lane.b32.xlu0 %v5629_v22, %s10345_s18  ;;  %5584 = vmatmul.mubr.msk.f32.gmra.mrb[14].mxu0 %vm327_vm1, %v7160_v13 }
  0x4f   : > { %493 = vmatprep.mubr.f32.mxu0 %v10362_v6 }
  0x51   : > { %1071 = vrot.lane.b32.xlu1 %v7212_v23, %s10345_s18 }
  0x52   : > { %1069 = vrot.lane.b32.xlu0 %v7215_v24, %s10345_s18  ;;  %5585 = vmatmul.mubr.msk.f32.gmra.mrb[16].mxu0 %vm327_vm1, %v7175_v16 }
  0x53   : > { %499 = vmatprep.mubr.f32.mxu0 %v10362_v6 }
  0x55   : > { %1075 = vrot.lane.b32.xlu1 %v7225_v25, %s10345_s18 }
  0x56   : > { %1073 = vrot.lane.b32.xlu0 %v7228_v26, %s10345_s18  ;;  %5586 = vmatmul.mubr.msk.f32.gmra.mrb[18].mxu0 %vm327_vm1, %v7172_v15 }
  0x57   : > { %505 = vmatprep.mubr.f32.mxu0 %v10362_v6 }
  0x59   : > { %1079 = vrot.lane.b32.xlu1 %v7238_v27, %s10345_s18 }
  0x5a   : > { %1077 = vrot.lane.b32.xlu0 %v7241_v28, %s10345_s18  ;;  %5587 = vmatmul.mubr.msk.f32.gmra.mrb[20].mxu0 %vm327_vm1, %v7188_v18 }
  0x5b   : > { %511 = vmatprep.mubr.f32.mxu0 %v10362_v6 }
  0x5d   : > { %1083 = vrot.lane.b32.xlu1 %v7251_v29, %s10345_s18 }
  0x5e   : > { %1081 = vrot.lane.b32.xlu0 %v7254_v30, %s10345_s18  ;;  %5588 = vmatmul.mubr.msk.f32.gmra.mrb[22].mxu0 %vm327_vm1, %v7185_v17 }
  0x5f   : > { %517 = vmatprep.mubr.f32.mxu0 %v10362_v6 }
  0x61   : > { %1087 = vrot.lane.b32.xlu1 %v7264_v31, %s10345_s18 }
  0x62   : > { %1085 = vrot.lane.b32.xlu0 %v7267_v32, %s10345_s18  ;;  %5589 = vmatmul.mubr.msk.f32.gmra.mrb[24].mxu0 %vm327_vm1, %v7337_v51 }
  0x63   : > { %523 = vmatprep.mubr.f32.mxu0 %v10362_v6 }
  0x65   : > { %1091 = vrot.lane.b32.xlu1 %v7277_v33, %s10345_s18 }
  0x66   : > { %1089 = vrot.lane.b32.xlu0 %v7280_v34, %s10345_s18  ;;  %5590 = vmatmul.mubr.msk.f32.gmra.mrb[26].mxu0 %vm327_vm1, %v7355_v55  ;;  %s10379_s18 = smov 20  }
  0x67   : > { %529 = vmatprep.mubr.f32.mxu0 %v10362_v6 }
  0x69   : > { %1127 = vrot.lane.b32.xlu1 %v7302_v40, %s10349_s23 }
  0x6a   : > { %1125 = vrot.lane.b32.xlu0 %v7305_v41, %s10349_s23  ;;  %5591 = vmatmul.mubr.msk.f32.gmra.mrb[28].mxu0 %vm327_vm1, %v7361_v56 }
  0x6b   : > { %535 = vmatprep.mubr.f32.mxu0 %v10362_v6 }
  0x6d   : > { %1131 = vrot.lane.b32.xlu1 %v5646_v48, %s10349_s23 }
  0x6e   : > { %1129 = vrot.lane.b32.xlu0 %v7328_v49, %s10349_s23  ;;  %5592 = vmatmul.mubr.msk.f32.gmra.mrb[30].mxu0 %vm327_vm1, %v7370_v57 }
  0x6f   : > { %1770 = vmatprep.mubr.f32.mxu0 %v10362_v6 }
  0x71   : > { %1189 = vrot.lane.b32.xlu1 %v7129_v5, %s10355_s16 }
  0x72   : > { %1133 = vrot.lane.b32.xlu0 %v5647_v52, %s10349_s23 }
  0x75   : > { %1317 = vrot.lane.b32.xlu1 %v5647_v52, %s10353_s17  ;;  %v6354_v52 = vpack.c.bf16 %v580_v47, %v578_v46  ;;  %v6360_v46 = vpack.c.bf16 %v589_v42, %v587_v38  ;;  %v6362_v47 = vpack.c.bf16 %v588_v44, %v586_v43  ;;  %v595_v38 = vld [vmem:[%s10339_s5 + $0xa8] sm:$0xff]  ;;  %v597_v42 = vld [vmem:[%s10339_s5 + $0xb8] sm:$0xff]  ;;  %v594_v43 = vld [vmem:[%s10339_s5 + $0xa0] sm:$0xff] }
  0x76   : > { %1253 = vrot.lane.b32.xlu0 %v7215_v24, %s10351_s20  ;;  %v596_v44 = vld [vmem:[%s10339_s5 + $0xb0] sm:$0xff] }
  0x77   : > { %6355 = vmatpush1.bf16.msra.mxu1 %v6354_v52  ;;  %v593_v52 = vld [vmem:[%s10339_s5 + $0x98] sm:$0xff] }
  0x79   : > { %1191 = vrot.lane.b32.xlu1 %v7126_v4, %s10355_s16  ;;  %v5698_v4 = vld [vmem:[%s7115_s12 + $0x14c] sm:$0xff] }
  0x7a   : > { %1381 = vrot.lane.b32.xlu0 %v7150_v10, %s10347_s21 }
  0x7d   : > { %1255 = vrot.lane.b32.xlu1 %v7212_v23, %s10351_s20 }
  0x7e   : > { %1445 = vrot.lane.b32.xlu0 %v7241_v28, %s10357_s13 }
  0x81   : > { %1383 = vrot.lane.b32.xlu1 %v7147_v9, %s10347_s21 }
  0x82   : > { %1319 = vrot.lane.b32.xlu0 %v5694_v58, %s10353_s17 }
  0x85   : > { %1447 = vrot.lane.b32.xlu1 %v7238_v27, %s10357_s13 }
  0x86   : > { %1193 = vrot.lane.b32.xlu0 %v7140_v8, %s10355_s16 }
  0x89   : > { %1321 = vrot.lane.b32.xlu1 %v5695_v59, %s10353_s17 }
  0x8a   : > { %1257 = vrot.lane.b32.xlu0 %v7228_v26, %s10351_s20  ;;  %v7488_v26 = vld [vmem:[%s7115_s12 + $0x16c] sm:$0xff] }
  0x8d   : > { %1195 = vrot.lane.b32.xlu1 %v7137_v7, %s10355_s16 }
  0x8e   : > { %1385 = vrot.lane.b32.xlu0 %v7163_v14, %s10347_s21 }
  0x91   : > { %1259 = vrot.lane.b32.xlu1 %v7225_v25, %s10351_s20 }
  0x92   : > { %1449 = vrot.lane.b32.xlu0 %v7254_v30, %s10357_s13 }
  0x95   : > { %1387 = vrot.lane.b32.xlu1 %v7160_v13, %s10347_s21 }
  0x96   : > { %1323 = vrot.lane.b32.xlu0 %v5696_v60, %s10353_s17 }
  0x99   : > { %1451 = vrot.lane.b32.xlu1 %v7251_v29, %s10357_s13 }
  0x9a   : > { %1197 = vrot.lane.b32.xlu0 %v7150_v10, %s10355_s16 }
  0x9b   : > { %v7412_v62 = vpop.permute.xlu1 %1001 }
  0x9c   : > { %v7414_v63 = vpop.permute.xlu0 %997 }
  0x9d   : > { %1325 = vrot.lane.b32.xlu1 %v5697_v61, %s10353_s17 }
  0x9e   : > { %1261 = vrot.lane.b32.xlu0 %v7241_v28, %s10351_s20 }
  0x9f   : > { %v7419_v0 = vpop.permute.xlu1 %1003 }
  0xa0   : > { %v7421_v1 = vpop.permute.xlu0 %999 }
  0xa1   : > { %1389 = vrot.lane.b32.xlu1 %v7175_v16, %s10347_s21 }
  0xa2   : > { %1135 = vrot.lane.b32.xlu0 %v5694_v58, %s10349_s23  ;;  %v585_v58 = vld [vmem:[%s10339_s5 + $0x58] sm:$0xff] }
  0xa3   : > { %v7426_v2 = vpop.permute.xlu1 %1007  ;;  %v6356_v35 = vpack.c.bf16 %v585_v58, %v583_v54  ;;  %v6364_v54 = vpack.c.bf16 %v593_v52, %v591_v50  ;;  %v590_v58 = vld [vmem:[%s10339_s5 + $0x80] sm:$0xff]  ;;  %v6370_v50 = vpack.c.bf16 %v596_v44, %v594_v43 }
  0xa4   : > { %v7428_v3 = vpop.permute.xlu0 %1005  ;;  %v7639_v52 = vld [vmem:[%s7115_s12 + $0x1a4] sm:$0xff] }
  0xa5   : > { %1453 = vrot.lane.b32.xlu1 %v7267_v32, %s10357_s13  ;;  %6357 = vmatprep.subr.bf16.mxu1 %v6356_v35  ;;  %v5595_v44 = vld [vmem:[%s7115_s12 + $0x84] sm:$0xff] }
  0xa6   : > { %1199 = vrot.lane.b32.xlu0 %v7147_v9, %s10355_s16 }
  0xa7   : > { %v7435_v5 = vpop.permute.xlu1 %1011 }
  0xa8   : > { %v7437_v7 = vpop.permute.xlu0 %1009 }
  0xa9   : > { %1327 = vrot.lane.b32.xlu1 %v5698_v4, %s10353_s17 }
  0xaa   : > { %1263 = vrot.lane.b32.xlu0 %v7238_v27, %s10351_s20 }
  0xab   : > { %v7442_v8 = vpop.permute.xlu1 %1015 }
  0xac   : > { %v7444_v10 = vpop.permute.xlu0 %1013 }
  0xad   : > { %1391 = vrot.lane.b32.xlu1 %v7172_v15, %s10347_s21 }
  0xae   : > { %1137 = vrot.lane.b32.xlu0 %v5695_v59, %s10349_s23  ;;  %v582_v59 = vld [vmem:[%s10339_s5 + $0x40] sm:$0xff] }
  0xaf   : > { %v7449_v9 = vpop.permute.xlu1 %1019 }
  0xb0   : > { %v7451_v11 = vpop.permute.xlu0 %1017 }
  0xb1   : > { %1455 = vrot.lane.b32.xlu1 %v7264_v31, %s10357_s13 }
  0xb2   : > { %1201 = vrot.lane.b32.xlu0 %v7163_v14, %s10355_s16 }
  0xb3   : > { %v7460_v19 = vpop.permute.xlu1 %1023 }
  0xb4   : > { %v7462_v20 = vpop.permute.xlu0 %1021 }
  0xb5   : > { %1329 = vrot.lane.b32.xlu1 %v7458_v12, %s10353_s17 }
  0xb6   : > { %1265 = vrot.lane.b32.xlu0 %v7254_v30, %s10351_s20 }
  0xb7   : > { %v7468_v21 = vpop.permute.xlu1 %1027 }
  0xb8   : > { %10377 = vst [vmem:[#allocation12_spill] sm:$0xff] %v7468_v21  ;;  %v7470_v22 = vpop.permute.xlu0 %1025 }
  0xb9   : > { %1393 = vrot.lane.b32.xlu1 %v7188_v18, %s10347_s21 }
  0xba   : > { %1139 = vrot.lane.b32.xlu0 %v5696_v60, %s10349_s23  ;;  %v584_v60 = vld [vmem:[%s10339_s5 + $0x50] sm:$0xff] }
  0xbb   : > { %v7475_v14 = vpop.permute.xlu1 %1063  ;;  %v6358_v36 = vpack.c.bf16 %v584_v60, %v582_v59  ;;  %v592_v59 = vld [vmem:[%s10339_s5 + $0x90] sm:$0xff] }
  0xbc   : > { %v7477_v23 = vpop.permute.xlu0 %1061  ;;  %v6366_v35 = vpack.c.bf16 %v592_v59, %v590_v58  ;;  %v601_v58 = vld [vmem:[%s10339_s5 + $0xd8] sm:$0xff]  ;;  %v598_v59 = vld [vmem:[%s10339_s5 + $0xc0] sm:$0xff] }
  0xbd   : > { %1457 = vrot.lane.b32.xlu1 %v7280_v34, %s10357_s13  ;;  %6359 = vmatpush1.bf16.msra.mxu1 %v6358_v36  ;;  %v7616_v36 = vld [vmem:[%s7115_s12 + $0x190] sm:$0xff] }
  0xbe   : > { %1203 = vrot.lane.b32.xlu0 %v7160_v13, %s10355_s16  ;;  %6361 = vmatprep.subr.bf16.mxu1 %v6360_v46 }
  0xbf   : > { %v7483_v24 = vpop.permute.xlu1 %1067 }
  0xc0   : > { %v7485_v25 = vpop.permute.xlu0 %1065 }
  0xc1   : > { %1331 = vrot.lane.b32.xlu1 %v7488_v26, %s10353_s17  ;;  %s10383_s17 = smov 16   ;;  %6363 = vmatpush1.bf16.msra.mxu1 %v6362_v47  ;;  %v6368_v47 = vpack.c.bf16 %v597_v42, %v595_v38 }
  0xc2   : > { %1267 = vrot.lane.b32.xlu0 %v7251_v29, %s10351_s20  ;;  %v7510_v29 = vld [vmem:[%s7115_s12 + $0x184] sm:$0xff]  ;;  %6365 = vmatprep.subr.bf16.mxu1 %v6364_v54  ;;  %s283_s20 = sand.u32 1, %s6958_s25  }
  0xc3   : > { %v7494_v27 = vpop.permute.xlu1 %1071  ;;  %v599_v54 = vld [vmem:[%s10339_s5 + $0xc8] sm:$0xff] }
  0xc4   : > { %v7496_v28 = vpop.permute.xlu0 %1069  ;;  %v6372_v42 = vpack.c.bf16 %v601_v58, %v599_v54  ;;  %v602_v54 = vld [vmem:[%s10339_s5 + $0xe0] sm:$0xff]  ;;  %v604_v58 = vld [vmem:[%s10339_s5 + $0xf0] sm:$0xff] }
  0xc5   : > { %1395 = vrot.lane.b32.xlu1 %v7185_v17, %s10347_s21  ;;  %s10380_s21 = smov 28   ;;  %6367 = vmatpush1.bf16.msra.mxu1 %v6366_v35  ;;  %v600_v35 = vld [vmem:[%s10339_s5 + $0xd0] sm:$0xff]  ;;  %v6378_v6 = vpack.c.bf16 %v604_v58, %v602_v54 }
  0xc6   : > { %1141 = vrot.lane.b32.xlu0 %v5697_v61, %s10349_s23  ;;  %s10381_s23 = smov 12   ;;  %6369 = vmatprep.subr.bf16.mxu1 %v6368_v47  ;;  %v6374_v43 = vpack.c.bf16 %v600_v35, %v598_v59  ;;  %v603_v47 = vld [vmem:[%s10339_s5 + $0xe8] sm:$0xff] }
  0xc7   : > { %v7501_v13 = vpop.permute.xlu1 %1075  ;;  %v5596_v54 = vld [vmem:[%s7115_s12 + $0x8c] sm:$0xff] }
  0xc8   : > { %v7503_v30 = vpop.permute.xlu0 %1073  ;;  %v7704_v58 = vld [vmem:[%s7115_s12 + $0x1ac] sm:$0xff] }
  0xc9   : > { %1459 = vrot.lane.b32.xlu1 %v7277_v33, %s10357_s13  ;;  %6371 = vmatpush1.bf16.msra.mxu1 %v6370_v50  ;;  %v605_v50 = vld [vmem:[%s10339_s5 + $0xf8] sm:$0xff]  ;;  %s6993_s13 = smov [#allocation3]  }
  0xca   : > { %1205 = vrot.lane.b32.xlu0 %v7175_v16, %s10355_s16  ;;  %6373 = vmatprep.subr.bf16.mxu1 %v6372_v42  ;;  %v6376_v42 = vpack.c.bf16 %v605_v50, %v603_v47  ;;  %s10196_s16 = sshll.u32 %s283_s20, 8  ;;  %s6892_s30 = sshll.u32 %s6993_s13, 4  ;;  %s6893_s30 = int_to_ptr.vmem [resolvable:$false] %s6892_s30 }
  0xcb   : > { %v7524_v39 = vpop.permute.xlu1 %1079  ;;  %s6894_s19 = scalar_lea.vmem %s6893_s30, 8192 }
  0xcc   : > { %v7526_v16 = vpop.permute.xlu0 %1077 }
  0xcd   : > { %1333 = vrot.lane.b32.xlu1 %v7510_v29, %s10378_s22  ;;  %6375 = vmatpush1.bf16.msra.mxu1 %v6374_v43  ;;  %v607_v43 = vld [vmem:[%s10339_s5 + $0x108] sm:$0xff] }
  0xce   : > { %1269 = vrot.lane.b32.xlu0 %v7267_v32, %s10379_s18  ;;  %6377 = vmatprep.subr.bf16.mxu1 %v6376_v42  ;;  %v610_v42 = vld [vmem:[%s10339_s5 + $0x120] sm:$0xff] }
  0xcf   : > { %v7544_v48 = vpop.permute.xlu1 %1083 }
  0xd0   : > { %v7546_v32 = vpop.permute.xlu0 %1081 }
  0xd1   : > { %1397 = vrot.lane.b32.xlu1 %v7337_v51, %s10380_s21  ;;  %6379 = vmatpush1.bf16.msra.mxu1 %v6378_v6  ;;  %v613_v6 = vld [vmem:[%s10339_s5 + $0x138] sm:$0xff] }
  0xd2   : > { %1143 = vrot.lane.b32.xlu0 %v5698_v4, %s10381_s23 }
  0xd3   : > { %v7566_v61 = vpop.permute.xlu1 %1087 }
  0xd4   : > { %v7568_v4 = vpop.permute.xlu0 %1085 }
  0xd5   : > { %1461 = vrot.lane.b32.xlu1 %v7552_v53, %s10382_s0 }
  0xd6   : > { %1207 = vrot.lane.b32.xlu0 %v7172_v15, %s10383_s17 }
  0xd7   : > { %v7589_v15 = vpop.permute.xlu1 %1091 }
  0xd8   : > { %10384 = vst [vmem:[#allocation13_spill] sm:$0xff] %v7589_v15  ;;  %v7591_v45 = vpop.permute.xlu0 %1089 }
  0xd9   : > { %10385 = vst [vmem:[#allocation14_spill] sm:$0xff] %v7591_v45  ;;  %1335 = vrot.lane.b32.xlu1 %v7575_v37, %s10378_s22 }
  0xda   : > { %1271 = vrot.lane.b32.xlu0 %v7264_v31, %s10379_s18 }
  0xdb   : > { %v7609_v60 = vpop.permute.xlu1 %1127 }
  0xdc   : > { %v1126_v31 = vpop.permute.xlu0 %1125 }
  0xdd   : > { %1399 = vrot.lane.b32.xlu1 %v7355_v55, %s10380_s21 }
  0xde   : > { %1145 = vrot.lane.b32.xlu0 %v7458_v12, %s10381_s23 }
  0xdf   : > { %v7630_v46 = vpop.permute.xlu1 %1131 }
  0xe0   : > { %v7632_v12 = vpop.permute.xlu0 %1129 }
  0xe1   : > { %1463 = vrot.lane.b32.xlu1 %v7616_v36, %s10382_s0 }
  0xe2   : > { %1209 = vrot.lane.b32.xlu0 %v7188_v18, %s10383_s17 }
  0xe3   : > { %v1190_v18 = vpop.permute.xlu1 %1189 }
  0xe4   : > { %v7653_v38 = vpop.permute.xlu0 %1133 }
  0xe5   : > { %1337 = vrot.lane.b32.xlu1 %v7639_v52, %s10378_s22 }
  0xe6   : > { %1273 = vrot.lane.b32.xlu0 %v7280_v34, %s10379_s18  ;;  %v1493_v34 = vsel %vm327_vm1, %v5595_v44, %v7414_v63  ;;  %v7682_v63 = vld [vmem:[%s7115_s12 + $0x1a8] sm:$0xff] }
  0xe7   : > { %v1318_v59 = vpop.permute.xlu1 %1317  ;;  %v1510_v15 = vsel %vm1509_vm2, %v1493_v34, %v7477_v23  ;;  %v609_v23 = vld [vmem:[%s10339_s5 + $0x118] sm:$0xff]  ;;  %v611_v34 = vld [vmem:[%s10339_s5 + $0x128] sm:$0xff] }
  0xe8   : > { %v1254_v35 = vpop.permute.xlu0 %1253  ;;  %v1527_v21 = vsel %vm1526_vm3, %v1510_v15, %v1126_v31  ;;  %v606_v15 = vld [vmem:[%s10339_s5 + $0x100] sm:$0xff] }
  0xe9   : > { %1401 = vrot.lane.b32.xlu1 %v7361_v56, %s10380_s21  ;;  %v1544_v44 = vsel %vm1543_vm4, %v1527_v21, %v1190_v18  ;;  %v6380_v21 = vpack.c.bf16 %v609_v23, %v607_v43  ;;  %v1494_v43 = vsel %vm327_vm1, %v5596_v54, %v7421_v1  ;;  %v615_v1 = vld [vmem:[%s10339_s5 + $0x148] sm:$0xff] }
  0xea   : > { %1147 = vrot.lane.b32.xlu0 %v7488_v26, %s10381_s23  ;;  %v608_v26 = vld [vmem:[%s10339_s5 + $0x110] sm:$0xff]  ;;  %v1561_v31 = vsel %vm1560_vm5, %v1544_v44, %v1254_v35 }
  0xeb   : > { %v1192_v47 = vpop.permute.xlu1 %1191  ;;  %v6382_v18 = vpack.c.bf16 %v608_v26, %v606_v15  ;;  %v1578_v35 = vsel %vm1577_vm6, %v1561_v31, %v1318_v59  ;;  %6381 = vmatprep.subr.bf16.mxu1 %v6380_v21  ;;  %v6384_v15 = vpack.c.bf16 %v613_v6, %v611_v34  ;;  %v1511_v31 = vsel %vm1509_vm2, %v1494_v43, %v7475_v14  ;;  %v617_v14 = vld [vmem:[%s10339_s5 + $0x158] sm:$0xff] }
  0xec   : > { %v1382_v50 = vpop.permute.xlu0 %1381  ;;  %v1528_v45 = vsel %vm1526_vm3, %v1511_v31, %v7609_v60  ;;  %v614_v60 = vld [vmem:[%s10339_s5 + $0x140] sm:$0xff]  ;;  %v6388_v34 = vpack.c.bf16 %v617_v14, %v615_v1  ;;  %v621_v43 = vld [vmem:[%s10339_s5 + $0x178] sm:$0xff] }
  0xed   : > { %1465 = vrot.lane.b32.xlu1 %v7682_v63, %s10382_s0  ;;  %v1595_v44 = vsel %vm1594_vm7, %v1578_v35, %v1382_v50  ;;  %6383 = vmatpush1.bf16.msra.mxu1 %v6382_v18  ;;  %v1545_v50 = vsel %vm1543_vm4, %v1528_v45, %v1192_v47  ;;  %v10386_v47 = vmov 0.0   ;;  %v625_v14 = vld [vmem:[%s10339_s5 + $0x198] sm:$0xff] }
  0xee   : > { %1211 = vrot.lane.b32.xlu0 %v7185_v17, %s10383_s17  ;;  %v612_v17 = vld [vmem:[%s10339_s5 + $0x130] sm:$0xff]  ;;  %6385 = vmatprep.subr.bf16.mxu1 %v6384_v15 }
  0xef   : > { %v1256_v59 = vpop.permute.xlu1 %1255  ;;  %v6386_v26 = vpack.c.bf16 %v612_v17, %v610_v42  ;;  %v7753_v42 = vld [vmem:[%s7115_s12 + $0x1b0] sm:$0xff]  ;;  %v619_v17 = vld [vmem:[%s10339_s5 + $0x168] sm:$0xff] }
  0xf0   : > { %v1446_v23 = vpop.permute.xlu0 %1445  ;;  %v1562_v18 = vsel %vm1560_vm5, %v1545_v50, %v1256_v59  ;;  %v623_v50 = vld [vmem:[%s10339_s5 + $0x188] sm:$0xff] }
  0xf1   : > { %v1612_v21 = vsel %vm1611_vm8, %v1595_v44, %v1446_v23  ;;  %1339 = vrot.lane.b32.xlu1 %v7704_v58, %s10378_s22  ;;  %6387 = vmatpush1.bf16.msra.mxu1 %v6386_v26  ;;  %v618_v44 = vld [vmem:[%s10339_s5 + $0x160] sm:$0xff]  ;;  %v6392_v26 = vpack.c.bf16 %v621_v43, %v619_v17  ;;  %v627_v43 = vld [vmem:[%s10339_s5 + $0x1a8] sm:$0xff] }
  0xf2   : > { %1275 = vrot.lane.b32.xlu0 %v7277_v33, %s10379_s18  ;;  %5744 = vmatmul.mubr.msk.f32.vlgmr.msra.gmra.mrb[32].mxu0 %vm1651_vm9, %v1612_v21  ;;  %v616_v33 = vld [vmem:[%s10339_s5 + $0x150] sm:$0xff]  ;;  %v5597_v21 = vld [vmem:[%s7115_s12 + $0xa4] sm:$0xff] }
  0xf3   : > { %v1384_v54 = vpop.permute.xlu1 %1383  ;;  %1776 = vmatprep.mubr.f32.mxu0 %v10386_v47  ;;  %v6390_v35 = vpack.c.bf16 %v616_v33, %v614_v60  ;;  %6389 = vmatprep.subr.bf16.mxu1 %v6388_v34  ;;  %v5705_v60 = vld [vmem:[%s7115_s12 + $0x1c4] sm:$0xff]  ;;  %v6396_v33 = vpack.c.bf16 %v625_v14, %v623_v50  ;;  %v633_v14 = vld [vmem:[%s10339_s5 + $0x1d8] sm:$0xff] }
  0xf4   : > { %v1320_v45 = vpop.permute.xlu0 %1319 }
  0xf5   : > { %v1579_v6 = vsel %vm1577_vm6, %v1562_v18, %v1320_v45  ;;  %1403 = vrot.lane.b32.xlu1 %v7370_v57, %s10380_s21  ;;  %6391 = vmatpush1.bf16.msra.mxu1 %v6390_v35  ;;  %v622_v18 = vld [vmem:[%s10339_s5 + $0x180] sm:$0xff] }
  0xf6   : > { %1149 = vrot.lane.b32.xlu0 %v7510_v29, %s10381_s23  ;;  %v620_v29 = vld [vmem:[%s10339_s5 + $0x170] sm:$0xff]  ;;  %v1596_v23 = vsel %vm1594_vm7, %v1579_v6, %v1384_v54  ;;  %6393 = vmatprep.subr.bf16.mxu1 %v6392_v26  ;;  %v1495_v54 = vsel %vm327_vm1, %v5597_v21, %v7412_v62  ;;  %v5721_v62 = vld [vmem:[%s7115_s12 + $0x1c6] sm:$0xff] }
  0xf7   : > { %v1448_v59 = vpop.permute.xlu1 %1447  ;;  %v6394_v31 = vpack.c.bf16 %v620_v29, %v618_v44  ;;  %v1512_v6 = vsel %vm1509_vm2, %v1495_v54, %v7485_v25  ;;  %v629_v25 = vld [vmem:[%s10339_s5 + $0x1b8] sm:$0xff]  ;;  %v5737_v21 = vld [vmem:[%s7115_s12 + $0x1c8] sm:$0xff] }
  0xf8   : > { %v1194_v15 = vpop.permute.xlu0 %1193  ;;  %v1613_v1 = vsel %vm1611_vm8, %v1596_v23, %v1448_v59  ;;  %v1529_v17 = vsel %vm1526_vm3, %v1512_v6, %v7632_v12  ;;  %v626_v12 = vld [vmem:[%s10339_s5 + $0x1a0] sm:$0xff]  ;;  %v6400_v26 = vpack.c.bf16 %v629_v25, %v627_v43  ;;  %v635_v43 = vld [vmem:[%s10339_s5 + $0x1e8] sm:$0xff]  ;;  %v636_v25 = vld [vmem:[%s10339_s5 + $0x1f0] sm:$0xff] }
  0xf9   : > { %1467 = vrot.lane.b32.xlu1 %v7753_v42, %s10382_s0  ;;  %5745 = vmatmul.mubr.msk.f32.gmra.mrb[34].mxu0 %vm1651_vm9, %v1613_v1  ;;  %v1546_v44 = vsel %vm1543_vm4, %v1529_v17, %v1194_v15  ;;  %v5598_v15 = vld [vmem:[%s7115_s12 + $0xac] sm:$0xff] }
  0xfa   : > { %1213 = vrot.lane.b32.xlu0 %v7337_v51, %s10383_s17  ;;  %v624_v51 = vld [vmem:[%s10339_s5 + $0x190] sm:$0xff]  ;;  %1782 = vmatprep.mubr.f32.mxu0 %v10386_v47  ;;  %v631_v1 = vld [vmem:[%s10339_s5 + $0x1c8] sm:$0xff] }
  0xfb   : > { %v1322_v45 = vpop.permute.xlu1 %1321  ;;  %6395 = vmatpush1.bf16.msra.mxu1 %v6394_v31  ;;  %v6398_v35 = vpack.c.bf16 %v624_v51, %v622_v18  ;;  %v1496_v18 = vsel %vm327_vm1, %v5598_v15, %v7419_v0  ;;  %v5706_v0 = vld [vmem:[%s7115_s12 + $0x1cc] sm:$0xff] }
  0xfc   : > { %v1258_v34 = vpop.permute.xlu0 %1257  ;;  %6397 = vmatprep.subr.bf16.mxu1 %v6396_v33  ;;  %v630_v33 = vld [vmem:[%s10339_s5 + $0x1c0] sm:$0xff]  ;;  %v1513_v6 = vsel %vm1509_vm2, %v1496_v18, %v7483_v24  ;;  %v5722_v15 = vld [vmem:[%s7115_s12 + $0x1ce] sm:$0xff] }
  0xfd   : > { %1341 = vrot.lane.b32.xlu1 %v5705_v60, %s10378_s22  ;;  %v1563_v29 = vsel %vm1560_vm5, %v1546_v44, %v1258_v34  ;;  %v315_v60 = vlaneseq  ;;  %v6404_v34 = vpack.c.bf16 %v633_v14, %v631_v1  ;;  %v5763_v1 = vld [vmem:[%s10339_s5 + $0x218] sm:$0xff] }
  0xfe   : > { %1277 = vrot.lane.b32.xlu0 %v7552_v53, %s10379_s18  ;;  %v628_v53 = vld [vmem:[%s10339_s5 + $0x1b0] sm:$0xff]  ;;  %v1580_v50 = vsel %vm1577_vm6, %v1563_v29, %v1322_v45 }
  0xff   : > { %v1196_v59 = vpop.permute.xlu1 %1195  ;;  %6399 = vmatpush1.bf16.msra.mxu1 %v6398_v35  ;;  %v6402_v31 = vpack.c.bf16 %v628_v53, %v626_v12  ;;  %v316_v24 = vshrl.u32 %v315_v60, 7 }
 0x100   : > { %v1386_v23 = vpop.permute.xlu0 %1385  ;;  %6401 = vmatprep.subr.bf16.mxu1 %v6400_v26 }
 0x101   : > { %1405 = vrot.lane.b32.xlu1 %v5721_v62, %s10380_s21  ;;  %v1597_v51 = vsel %vm1594_vm7, %v1580_v50, %v1386_v23  ;;  %v1530_v62 = vsel %vm1526_vm3, %v1513_v6, %v7630_v46  ;;  %v637_v46 = vld [vmem:[%s10339_s5 + $0x1f8] sm:$0xff] }
 0x102   : > { %1151 = vrot.lane.b32.xlu0 %v7575_v37, %s10381_s23  ;;  %v632_v37 = vld [vmem:[%s10339_s5 + $0x1d0] sm:$0xff]  ;;  %v1547_v44 = vsel %vm1543_vm4, %v1530_v62, %v1196_v59  ;;  %v6408_v59 = vpack.c.bf16 %v637_v46, %v635_v43 }
 0x103   : > { %v1260_v54 = vpop.permute.xlu1 %1259  ;;  %6403 = vmatpush1.bf16.msra.mxu1 %v6402_v31  ;;  %v6406_v35 = vpack.c.bf16 %v632_v37, %v630_v33  ;;  %v5761_v31 = vld [vmem:[%s10339_s5 + $0x208] sm:$0xff]  ;;  %v7876_v33 = vsub.s32 1, %v316_v24 }
 0x104   : > { %v1450_v45 = vpop.permute.xlu0 %1449  ;;  %6405 = vmatprep.subr.bf16.mxu1 %v6404_v34  ;;  %v1564_v12 = vsel %vm1560_vm5, %v1547_v44, %v1260_v54  ;;  %v6420_v37 = vpack.c.bf16 %v5763_v1, %v5761_v31 }
 0x105   : > { %v1614_v17 = vsel %vm1611_vm8, %v1597_v51, %v1450_v45  ;;  %1469 = vrot.lane.b32.xlu1 %v5737_v21, %s10382_s0  ;;  %v7867_v21 = vsub.s32 0, %v316_v24  ;;  %v5738_v51 = vld [vmem:[%s7115_s12 + $0x1d0] sm:$0xff]  ;;  %v1497_v45 = vsel %vm327_vm1, %v7305_v41, %v7428_v3  ;;  %v447_v62 = vpop.f32.mrb[0].mxu0  ;;  %v5707_v3 = vld [vmem:[%s7115_s12 + $0x1e4] sm:$0xff] }
 0x106   : > { %1215 = vrot.lane.b32.xlu0 %v7355_v55, %s10383_s17  ;;  %5746 = vmatmul.mubr.msk.f32.gmra.mrb[36].mxu0 %vm1651_vm9, %v1614_v17  ;;  %v634_v55 = vld [vmem:[%s10339_s5 + $0x1e0] sm:$0xff]  ;;  %v449_v43 = vpop.f32.mrb[1].mxu0 }
 0x107   : > { %v1388_v53 = vpop.permute.xlu1 %1387  ;;  %1788 = vmatprep.mubr.f32.mxu0 %v10386_v47  ;;  %6407 = vmatpush1.bf16.msra.mxu1 %v6406_v35  ;;  %v6410_v23 = vpack.c.bf16 %v636_v25, %v634_v55 }
 0x108   : > { %v1324_v29 = vpop.permute.xlu0 %1323  ;;  %6409 = vmatprep.subr.bf16.mxu1 %v6408_v59 }
 0x109   : > { %v1581_v26 = vsel %vm1577_vm6, %v1564_v12, %v1324_v29  ;;  %1343 = vrot.lane.b32.xlu1 %v5706_v0, %s10378_s22  ;;  %v453_v25 = vpop.f32.mrb[2].mxu0  ;;  %v5767_v29 = vld [vmem:[%s10339_s5 + $0x238] sm:$0xff] }
 0x10a   : > { %1279 = vrot.lane.b32.xlu0 %v7616_v36, %s10379_s18  ;;  %v1598_v14 = vsel %vm1594_vm7, %v1581_v26, %v1388_v53  ;;  %v313_v36 = vld [vmem:[%s10338_s4] ss:$8 sm:$0x3]  ;;  %v455_v31 = vpop.f32.mrb[3].mxu0 }
 0x10b   : > { %v1452_v50 = vpop.permute.xlu1 %1451  ;;  %6411 = vmatpush1.bf16.msra.mxu1 %v6410_v23  ;;  %v7885_v54 = vrot.slane %v313_v36, %v7867_v21  ;;  %v7892_v6 = vrot.slane %v313_v36, %v7876_v33  ;;  %v5765_v53 = vld [vmem:[%s10339_s5 + $0x228] sm:$0xff]  ;;  %v5766_v36 = vld [vmem:[%s10339_s5 + $0x230] sm:$0xff] }
 0x10c   : > { %v1198_v60 = vpop.permute.xlu0 %1197  ;;  %v1615_v18 = vsel %vm1611_vm8, %v1598_v14, %v1452_v50  ;;  %6421 = vmatprep.subr.bf16.mxu1 %v6420_v37  ;;  %v5723_v23 = vld [vmem:[%s7115_s12 + $0x1e6] sm:$0xff] }
 0x10d   : > { %1407 = vrot.lane.b32.xlu1 %v5722_v15, %s10380_s21  ;;  %5747 = vmatmul.mubr.msk.f32.gmra.mrb[38].mxu0 %vm1651_vm9, %v1615_v18  ;;  %v448_v0 = vadd.f32 %v447_v62, %v7885_v54  ;;  %v450_v46 = vadd.f32 %v449_v43, %v7892_v6  ;;  %v454_v26 = vadd.f32 %v453_v25, %v7885_v54 }
 0x10e   : > { %1153 = vrot.lane.b32.xlu0 %v7639_v52, %s10381_s23  ;;  %1794 = vmatprep.mubr.f32.mxu0 %v10386_v47  ;;  %v1514_v52 = vsel %vm1509_vm2, %v1497_v45, %v7496_v28  ;;  %v456_v14 = vadd.f32 %v455_v31, %v7892_v6  ;;  %v5769_v45 = vld [vmem:[%s10339_s5 + $0x248] sm:$0xff] }
 0x10f   : > { %v1326_v34 = vpop.permute.xlu1 %1325  ;;  %v1531_v17 = vsel %vm1526_vm3, %v1514_v52, %v7653_v38  ;;  %v5760_v38 = vld [vmem:[%s10339_s5 + $0x200] sm:$0xff]  ;;  %v542_v55 = vmax.f32 %v448_v0, 0.0  ;;  %v543_v12 = vmax.f32 %v450_v46, 0.0  ;;  %v544_v18 = vmax.f32 %v454_v26, 0.0  ;;  %v459_v52 = vpop.f32.mrb[4].mxu0 }
 0x110   : > { %v1262_v35 = vpop.permute.xlu0 %1261  ;;  %v1548_v41 = vsel %vm1543_vm4, %v1531_v17, %v1198_v60  ;;  %v5764_v60 = vld [vmem:[%s10339_s5 + $0x220] sm:$0xff]  ;;  %v5739_v17 = vld [vmem:[%s7115_s12 + $0x1e8] sm:$0xff]  ;;  %v460_v62 = vadd.f32 %v459_v52, %v7885_v54  ;;  %v1498_v0 = vsel %vm327_vm1, %v7302_v40, %v7426_v2 }
 0x111   : > { %1471 = vrot.lane.b32.xlu1 %v5738_v51, %s10382_s0  ;;  %v1565_v44 = vsel %vm1560_vm5, %v1548_v41, %v1262_v35  ;;  %702 = vmatprep.mubr.f32.mxu1 %v543_v12  ;;  %v6424_v51 = vpack.c.bf16 %v5767_v29, %v5765_v53  ;;  %v545_v35 = vmax.f32 %v456_v14, 0.0  ;;  %v461_v41 = vpop.f32.mrb[5].mxu0  ;;  %v5768_v46 = vld [vmem:[%s10339_s5 + $0x240] sm:$0xff]  ;;  %v1515_v40 = vsel %vm1509_vm2, %v1498_v0, %v7494_v27 }
 0x112   : > { %1217 = vrot.lane.b32.xlu0 %v7361_v56, %s10383_s17  ;;  %v5762_v56 = vld [vmem:[%s10339_s5 + $0x210] sm:$0xff]  ;;  %v1582_v59 = vsel %vm1577_vm6, %v1565_v44, %v1326_v34  ;;  %703 = vmatmul.mubr.f32.vlgmr.msra.gmra.mrb[0].mxu1 %v542_v55  ;;  %v5771_v34 = vld [vmem:[%s10339_s5 + $0x258] sm:$0xff]  ;;  %v546_v2 = vmax.f32 %v460_v62, 0.0  ;;  %v465_v27 = vpop.f32.mrb[6].mxu0  ;;  %v5842_v29 = vld [vmem:[%s7115_s12 + $0x46] sm:$0xff] }
 0x113   : > { %v1390_v24 = vpop.permute.xlu1 %1389  ;;  %v6422_v15 = vpack.c.bf16 %v5762_v56, %v5760_v38  ;;  %708 = vmatprep.mubr.f32.mxu1 %v545_v35  ;;  %v5770_v38 = vld [vmem:[%s10339_s5 + $0x250] sm:$0xff]  ;;  %v5773_v56 = vld [vmem:[%s10339_s5 + $0x268] sm:$0xff]  ;;  %v5775_v55 = vld [vmem:[%s10339_s5 + $0x278] sm:$0xff] }
 0x114   : > { %v1136_v28 = vpop.permute.xlu0 %1135  ;;  %v1599_v1 = vsel %vm1594_vm7, %v1582_v59, %v1390_v24  ;;  %v6428_v24 = vpack.c.bf16 %v5771_v34, %v5769_v45  ;;  %v466_v59 = vadd.f32 %v465_v27, %v7885_v54  ;;  %v6430_v26 = vpack.c.bf16 %v5770_v38, %v5768_v46  ;;  %v5827_v45 = vld [vmem:[%s7115_s12 + $0x4a] sm:$0xff]  ;;  %v5776_v0 = vld [vmem:[%s10339_s5 + $0x280] sm:$0xff] }
 0x115   : > { %1345 = vrot.lane.b32.xlu1 %v5707_v3, %s10378_s22  ;;  %6423 = vmatpush1.bf16.msra.mxu1 %v6422_v15  ;;  %v6426_v3 = vpack.c.bf16 %v5766_v36, %v5764_v60  ;;  %v1532_v25 = vsel %vm1526_vm3, %v1515_v40, %v1136_v28  ;;  %v5708_v34 = vld [vmem:[%s7115_s12 + $0x1ec] sm:$0xff]  ;;  %v1499_v27 = vsel %vm327_vm1, %v7328_v49, %v7437_v7 }
 0x116   : > { %1281 = vrot.lane.b32.xlu0 %v7682_v63, %s10379_s18  ;;  %709 = vmatmul.mubr.f32.gmra.mrb[2].mxu1 %v544_v18  ;;  %v548_v14 = vmax.f32 %v466_v59, 0.0  ;;  %v5779_v18 = vld [vmem:[%s10339_s5 + $0x298] sm:$0xff]  ;;  %v5781_v40 = vld [vmem:[%s10339_s5 + $0x2a8] sm:$0xff] }
 0x117   : > { %v1454_v63 = vpop.permute.xlu1 %1453  ;;  %6425 = vmatprep.subr.bf16.mxu1 %v6424_v51  ;;  %v5951_v49 = vld [vmem:[%s10336_s2 + $0x68] sm:$0xff] }
 0x118   : > { %v1200_v50 = vpop.permute.xlu0 %1199  ;;  %v1616_v37 = vsel %vm1611_vm8, %v1599_v1, %v1454_v63  ;;  %v5772_v63 = vld [vmem:[%s10339_s5 + $0x260] sm:$0xff] }
 0x119   : > { %1409 = vrot.lane.b32.xlu1 %v5723_v23, %s10380_s21  ;;  %5748 = vmatmul.mubr.msk.f32.gmra.mrb[40].mxu0 %vm1651_vm9, %v1616_v37  ;;  %v1549_v53 = vsel %vm1543_vm4, %v1532_v25, %v1200_v50  ;;  %v467_v23 = vpop.f32.mrb[7].mxu0  ;;  %v5774_v50 = vld [vmem:[%s10339_s5 + $0x270] sm:$0xff]  ;;  %v5777_v37 = vld [vmem:[%s10339_s5 + $0x288] sm:$0xff]  ;;  %v8016_v25 = vld [vmem:[%s10339_s5 + $0x2a0] sm:$0xff] }
 0x11a   : > { %1155 = vrot.lane.b32.xlu0 %v7704_v58, %s10381_s23  ;;  %1800 = vmatprep.mubr.f32.mxu0 %v10386_v47  ;;  %v462_v58 = vadd.f32 %v461_v41, %v7892_v6  ;;  %v468_v28 = vadd.f32 %v467_v23, %v7892_v6  ;;  %v471_v36 = vpop.f32.mrb[8].mxu0  ;;  %v6434_v52 = vpack.c.bf16 %v5774_v50, %v5772_v63  ;;  %v8031_v23 = vld [vmem:[%s10339_s5 + $0x2c8] sm:$0xff]  ;;  %v5948_v50 = vld [vmem:[%s10336_s2 + $0x50] sm:$0xff] }
 0x11b   : > { %v1328_v43 = vpop.permute.xlu1 %1327  ;;  %6427 = vmatpush1.bf16.msra.mxu1 %v6426_v3  ;;  %v472_v35 = vadd.f32 %v471_v36, %v7885_v54  ;;  %v6436_v38 = vpack.c.bf16 %v5779_v18, %v5777_v37 }
 0x11c   : > { %v1264_v44 = vpop.permute.xlu0 %1263  ;;  %v547_v12 = vmax.f32 %v462_v58, 0.0  ;;  %6429 = vmatprep.subr.bf16.mxu1 %v6428_v24  ;;  %v549_v60 = vmax.f32 %v468_v28, 0.0  ;;  %v5866_v58 = vld [vmem:[%s7115_s12 + $0xc2] sm:$0xff]  ;;  %v5724_v24 = vld [vmem:[%s7115_s12 + $0x1ee] sm:$0xff] }
 0x11d   : > { %1473 = vrot.lane.b32.xlu1 %v5739_v17, %s10382_s0  ;;  %v1566_v31 = vsel %vm1560_vm5, %v1549_v53, %v1264_v44  ;;  %v550_v46 = vmax.f32 %v472_v35, 0.0 }
 0x11e   : > { %1219 = vrot.lane.b32.xlu0 %v7370_v57, %s10383_s17  ;;  %714 = vmatprep.mubr.f32.mxu1 %v547_v12  ;;  %v6432_v57 = vpack.c.bf16 %v5775_v55, %v5773_v56  ;;  %v1583_v51 = vsel %vm1577_vm6, %v1566_v31, %v1328_v43  ;;  %v5778_v43 = vld [vmem:[%s10339_s5 + $0x290] sm:$0xff] }
 0x11f   : > { %v1392_v15 = vpop.permute.xlu1 %1391  ;;  %715 = vmatmul.mubr.f32.gmra.mrb[4].mxu1 %v546_v2  ;;  %v5783_v2 = vld [vmem:[%s10339_s5 + $0x2b8] sm:$0xff]  ;;  %v8021_v12 = vld [vmem:[%s10339_s5 + $0x2b0] sm:$0xff]  ;;  %v6438_v59 = vpack.c.bf16 %v5778_v43, %v5776_v0 }
 0x120   : > { %v7972_v1 = vpop.permute.xlu0 %1137  ;;  %6431 = vmatpush1.bf16.msra.mxu1 %v6430_v26  ;;  %v1600_v17 = vsel %vm1594_vm7, %v1583_v51, %v1392_v15  ;;  %720 = vmatprep.mubr.f32.mxu1 %v549_v60  ;;  %v5949_v26 = vld [vmem:[%s10336_s2 + $0x58] sm:$0xff]  ;;  %v6440_v28 = vpack.c.bf16 %v5783_v2, %v5781_v40  ;;  %v1516_v60 = vsel %vm1509_vm2, %v1499_v27, %v7503_v30  ;;  %v8057_v51 = vld [vmem:[%s7115_s12 + $0xc6] sm:$0xff] }
 0x121   : > { %2363 = vrot.lane.b32.xlu1 %v5842_v29, %s10387_s29  ;;  %6433 = vmatprep.subr.bf16.mxu1 %v6432_v57  ;;  %v5787_v57 = vld [vmem:[%s10339_s5 + $0x2d8] sm:$0xff]  ;;  %v6484_v63 = vpack.c.bf16 %v5951_v49, %v5949_v26  ;;  %v1533_v18 = vsel %vm1526_vm3, %v1516_v60, %v7972_v1  ;;  %v6442_v35 = vpack.c.bf16 %v8021_v12, %v8016_v25  ;;  %v5954_v2 = vld [vmem:[%s10336_s2 + $0x80] sm:$0xff]  ;;  %v5789_v25 = vld [vmem:[%s10339_s5 + $0x2e8] sm:$0xff] }
 0x122   : > { %1283 = vrot.lane.b32.xlu0 %v7753_v42, %s10379_s18  ;;  %v473_v42 = vpop.f32.mrb[9].mxu0  ;;  %v6444_v1 = vpack.c.bf16 %v5787_v57, %v8031_v23  ;;  %v5791_v12 = vld [vmem:[%s10339_s5 + $0x2f8] sm:$0xff] }
 0x123   : > { %v1456_v62 = vpop.permute.xlu1 %1455  ;;  %v474_v3 = vadd.f32 %v473_v42, %v7892_v6  ;;  %721 = vmatmul.mubr.f32.gmra.mrb[6].mxu1 %v548_v14  ;;  %v477_v55 = vpop.f32.mrb[10].mxu0  ;;  %v5950_v14 = vld [vmem:[%s10336_s2 + $0x60] sm:$0xff]  ;;  %v5740_v42 = vld [vmem:[%s7115_s12 + $0x1f0] sm:$0xff]  ;;  %6485 = vmatprep.subr.bf16.mxu0 %v6484_v63  ;;  %v6448_v60 = vpack.c.bf16 %v5791_v12, %v5789_v25 }
 0x124   : > { %v1202_v41 = vpop.permute.xlu0 %1201  ;;  %v1617_v44 = vsel %vm1611_vm8, %v1600_v17, %v1456_v62  ;;  %v478_v53 = vadd.f32 %v477_v55, %v7885_v54  ;;  %6435 = vmatpush1.bf16.msra.mxu1 %v6434_v52  ;;  %v479_v29 = vpop.f32.mrb[11].mxu0  ;;  %v6486_v37 = vpack.c.bf16 %v5950_v14, %v5948_v50  ;;  %v5953_v62 = vld [vmem:[%s10336_s2 + $0x78] sm:$0xff]  ;;  %v5790_v63 = vld [vmem:[%s10339_s5 + $0x2f0] sm:$0xff]  ;;  %v5924_v12 = vld [vmem:[%s7115_s12 + $0x146] sm:$0xff] }
 0x125   : > { %2427 = vrot.lane.b32.xlu1 %v5827_v45, %s10388_s9  ;;  %v551_v56 = vmax.f32 %v474_v3, 0.0  ;;  %5749 = vmatmul.mubr.msk.f32.gmra.mrb[42].mxu0 %vm1651_vm9, %v1617_v44  ;;  %v480_v15 = vadd.f32 %v479_v29, %v7892_v6  ;;  %v1550_v30 = vsel %vm1543_vm4, %v1533_v18, %v1202_v41  ;;  %v5955_v3 = vld [vmem:[%s10336_s2 + $0x88] sm:$0xff] }
 0x126   : > { %1347 = vrot.lane.b32.xlu0 %v5708_v34, %s10378_s22  ;;  %1806 = vmatprep.mubr.f32.mxu0 %v10386_v47  ;;  %v552_v36 = vmax.f32 %v478_v53, 0.0  ;;  %v483_v34 = vpop.f32.mrb[12].mxu0  ;;  %v8098_v29 = vld [vmem:[%s7115_s12 + $0xca] sm:$0xff] }
 0x127   : > { %v1330_v7 = vpop.permute.xlu1 %1329  ;;  %726 = vmatprep.mubr.f32.mxu1 %v551_v56  ;;  %6437 = vmatprep.subr.bf16.mxu1 %v6436_v38  ;;  %v553_v45 = vmax.f32 %v480_v15, 0.0  ;;  %v484_v52 = vadd.f32 %v483_v34, %v7885_v54  ;;  %v485_v17 = vpop.f32.mrb[13].mxu0  ;;  %v5952_v38 = vld [vmem:[%s10336_s2 + $0x70] sm:$0xff]  ;;  %v5908_v34 = vld [vmem:[%s7115_s12 + $0x142] sm:$0xff] }
 0x128   : > { %v1266_v31 = vpop.permute.xlu0 %1265  ;;  %727 = vmatmul.mubr.f32.gmra.mrb[8].mxu1 %v550_v46  ;;  %v486_v44 = vadd.f32 %v485_v17, %v7892_v6  ;;  %v6488_v46 = vpack.c.bf16 %v5955_v3, %v5953_v62  ;;  %6487 = vmatpush1.bf16.msra.mxu0 %v6486_v37  ;;  %v489_v55 = vpop.f32.mrb[14].mxu0  ;;  %v6490_v27 = vpack.c.bf16 %v5954_v2, %v5952_v38  ;;  %v5795_v37 = vld [vmem:[%s10339_s5 + $0x318] sm:$0xff]  ;;  %v6872_v17 = vld [vmem:[%s7115_s12 + $0xec] sm:$0xff] }
 0x129   : > { %2491 = vrot.lane.b32.xlu1 %v5866_v58, %s10381_s23  ;;  %6439 = vmatpush1.bf16.msra.mxu1 %v6438_v59  ;;  %v1567_v0 = vsel %vm1560_vm5, %v1550_v30, %v1266_v31  ;;  %v5784_v58 = vld [vmem:[%s10339_s5 + $0x2c0] sm:$0xff]  ;;  %v554_v40 = vmax.f32 %v484_v52, 0.0  ;;  %v5843_v59 = vld [vmem:[%s7115_s12 + $0x4e] sm:$0xff]  ;;  %v490_v23 = vadd.f32 %v489_v55, %v7885_v54  ;;  %v491_v26 = vpop.f32.mrb[15].mxu0 }
 0x12a   : > { %1411 = vrot.lane.b32.xlu0 %v5724_v24, %s10380_s21  ;;  %732 = vmatprep.mubr.f32.mxu1 %v553_v45  ;;  %v5786_v24 = vld [vmem:[%s10339_s5 + $0x2d0] sm:$0xff]  ;;  %v555_v56 = vmax.f32 %v486_v44, 0.0  ;;  %v1584_v53 = vsel %vm1577_vm6, %v1567_v0, %v1330_v7  ;;  %v492_v57 = vadd.f32 %v491_v26, %v7892_v6  ;;  %v5788_v7 = vld [vmem:[%s10339_s5 + $0x2e0] sm:$0xff]  ;;  %v495_v45 = vpop.f32.mrb[16].mxu0  ;;  %v5797_v38 = vld [vmem:[%s10339_s5 + $0x328] sm:$0xff] }
 0x12b   : > { %v1394_v43 = vpop.permute.xlu1 %1393  ;;  %6441 = vmatprep.subr.bf16.mxu1 %v6440_v28  ;;  %v6446_v49 = vpack.c.bf16 %v5786_v24, %v5784_v58  ;;  %6489 = vmatprep.subr.bf16.mxu0 %v6488_v46  ;;  %v556_v14 = vmax.f32 %v490_v23, 0.0  ;;  %v496_v30 = vadd.f32 %v495_v45, %v7885_v54  ;;  %v6450_v52 = vpack.c.bf16 %v5790_v63, %v5788_v7  ;;  %v5792_v44 = vld [vmem:[%s10339_s5 + $0x300] sm:$0xff]  ;;  %v5794_v58 = vld [vmem:[%s10339_s5 + $0x310] sm:$0xff] }
 0x12c   : > { %v8072_v41 = vpop.permute.xlu0 %1139  ;;  %733 = vmatmul.mubr.f32.gmra.mrb[10].mxu1 %v552_v36  ;;  %v1601_v31 = vsel %vm1594_vm7, %v1584_v53, %v1394_v43  ;;  %v5793_v36 = vld [vmem:[%s10339_s5 + $0x308] sm:$0xff]  ;;  %6491 = vmatpush1.bf16.msra.mxu0 %v6490_v27  ;;  %v557_v18 = vmax.f32 %v492_v57, 0.0  ;;  %v5956_v55 = vld [vmem:[%s10336_s2 + $0x90] sm:$0xf] }
 0x12d   : > { %2555 = vrot.lane.b32.xlu1 %v8057_v51, %s10383_s17  ;;  %6443 = vmatpush1.bf16.msra.mxu1 %v6442_v35  ;;  %v5858_v35 = vld [vmem:[%s7115_s12 + $0x52] sm:$0xff]  ;;  %v6452_v43 = vpack.c.bf16 %v5795_v37, %v5793_v36  ;;  %v558_v46 = vmax.f32 %v496_v30, 0.0  ;;  %v8179_v36 = vld [vmem:[%s7115_s12 + $0x14a] sm:$0xff] }
 0x12e   : > { %1475 = vrot.lane.b32.xlu0 %v5740_v42, %s10382_s0  ;;  %738 = vmatprep.mubr.f32.mxu1 %v555_v56  ;;  %v497_v42 = vpop.f32.mrb[17].mxu0  ;;  %v5883_v37 = vld [vmem:[%s7115_s12 + $0xce] sm:$0xff] }
 0x12f   : > { %v1458_v15 = vpop.permute.xlu1 %1457  ;;  %6445 = vmatprep.subr.bf16.mxu1 %v6444_v1  ;;  %v1500_v1 = vsel %vm327_vm1, %v6872_v17, %v7435_v5  ;;  %v498_v0 = vadd.f32 %v497_v42, %v7892_v6  ;;  %v5957_v5 = vld [vmem:[%s10336_s2 + $0x98] sm:$0xf]  ;;  %v5800_v17 = vld [vmem:[%s10339_s5 + $0x340] sm:$0xff] }
 0x130   : > { %v1204_v28 = vpop.permute.xlu0 %1203  ;;  %v1618_v50 = vsel %vm1611_vm8, %v1601_v31, %v1458_v15  ;;  %739 = vmatmul.mubr.f32.gmra.mrb[12].mxu1 %v554_v40  ;;  %v1517_v24 = vsel %vm1509_vm2, %v1500_v1, %v7501_v13  ;;  %v5799_v40 = vld [vmem:[%s10339_s5 + $0x338] sm:$0xff]  ;;  %v501_v13 = vpop.f32.mrb[18].mxu0  ;;  %5959 = vmatprep.subr.msk.mxu0 %vm376_vm0, %v5957_v5  ;;  %v5796_v15 = vld [vmem:[%s10339_s5 + $0x320] sm:$0xff]  ;;  %v5802_v1 = vld [vmem:[%s10339_s5 + $0x350] sm:$0xff] }
 0x131   : > { %2611 = vrot.lane.b32.xlu1 %v8098_v29, %s10379_s18  ;;  %5750 = vmatmul.mubr.msk.f32.gmra.mrb[44].mxu0 %vm1651_vm9, %v1618_v50  ;;  %v1534_v2 = vsel %vm1526_vm3, %v1517_v24, %v8072_v41  ;;  %v559_v56 = vmax.f32 %v498_v0, 0.0  ;;  %v502_v27 = vadd.f32 %v501_v13, %v7885_v54  ;;  %v503_v53 = vpop.f32.mrb[19].mxu0  ;;  %v6456_v31 = vpack.c.bf16 %v5799_v40, %v5797_v38  ;;  %v5801_v50 = vld [vmem:[%s10339_s5 + $0x348] sm:$0xff]  ;;  %v5898_v24 = vld [vmem:[%s7115_s12 + $0xd2] sm:$0xff] }
 0x132   : > { %2365 = vrot.lane.b32.xlu0 %v5843_v59, %s10387_s29  ;;  %6447 = vmatpush1.bf16.msra.mxu1 %v6446_v49  ;;  %v1551_v25 = vsel %vm1543_vm4, %v1534_v2, %v1204_v28  ;;  %v6454_v59 = vpack.c.bf16 %v5794_v58, %v5792_v44  ;;  %v504_v49 = vadd.f32 %v503_v53, %v7892_v6  ;;  %v5798_v28 = vld [vmem:[%s10339_s5 + $0x330] sm:$0xff]  ;;  %v507_v63 = vpop.f32.mrb[20].mxu0  ;;  %v5807_v44 = vld [vmem:[%s10339_s5 + $0x378] sm:$0xff]  ;;  %v5804_v53 = vld [vmem:[%s10339_s5 + $0x360] sm:$0xff] }
 0x133   : > { %v1332_v62 = vpop.permute.xlu1 %1331  ;;  %1812 = vmatprep.mubr.f32.mxu0 %v10386_v47  ;;  %744 = vmatprep.mubr.f32.mxu1 %v557_v18  ;;  %v560_v57 = vmax.f32 %v502_v27, 0.0  ;;  %v508_v18 = vadd.f32 %v507_v63, %v7885_v54  ;;  %v509_v45 = vpop.f32.mrb[21].mxu0  ;;  %v6462_v2 = vpack.c.bf16 %v5802_v1, %v5800_v17  ;;  %v5815_v17 = vld [vmem:[%s10339_s5 + $0x3b8] sm:$0xff] }
 0x134   : > { %v1268_v3 = vpop.permute.xlu0 %1267  ;;  %745 = vmatmul.mubr.f32.gmra.mrb[14].mxu1 %v556_v14  ;;  %6449 = vmatprep.subr.bf16.mxu1 %v6448_v60  ;;  %v561_v7 = vmax.f32 %v504_v49, 0.0  ;;  %v5803_v14 = vld [vmem:[%s10339_s5 + $0x358] sm:$0xff]  ;;  %v513_v5 = vpop.f32.mrb[22].mxu0 }
 0x135   : > { %2675 = vrot.lane.b32.xlu1 %v5908_v34, %s10378_s22  ;;  %v1568_v41 = vsel %vm1560_vm5, %v1551_v25, %v1268_v3  ;;  %750 = vmatprep.mubr.f32.mxu1 %v559_v56  ;;  %v6458_v34 = vpack.c.bf16 %v5798_v28, %v5796_v15  ;;  %v562_v3 = vmax.f32 %v508_v18, 0.0  ;;  %v6460_v0 = vpack.c.bf16 %v5803_v14, %v5801_v50  ;;  %v515_v40 = vpop.f32.mrb[23].mxu0  ;;  %v6873_v56 = vld [vmem:[%s7115_s12 + $0x104] sm:$0xff]  ;;  %v5811_v49 = vld [vmem:[%s10339_s5 + $0x398] sm:$0xff] }
 0x136   : > { %2429 = vrot.lane.b32.xlu0 %v5858_v35, %s10388_s9  ;;  %6451 = vmatpush1.bf16.msra.mxu1 %v6450_v52  ;;  %v1585_v60 = vsel %vm1577_vm6, %v1568_v41, %v1332_v62  ;;  %v510_v52 = vadd.f32 %v509_v45, %v7892_v6  ;;  %v514_v38 = vadd.f32 %v513_v5, %v7885_v54  ;;  %v5808_v45 = vld [vmem:[%s10339_s5 + $0x380] sm:$0xff] }
 0x137   : > { %v1396_v23 = vpop.permute.xlu1 %1395  ;;  %6453 = vmatprep.subr.bf16.mxu1 %v6452_v43  ;;  %5960 = vmatpush1.msk.msra.mxu0 %vm376_vm0, %v5956_v55  ;;  %v5805_v43 = vld [vmem:[%s10339_s5 + $0x368] sm:$0xff]  ;;  %v1501_v13 = vsel %vm327_vm1, %v6873_v56, %v7444_v10 }
 0x138   : > { %v8158_v26 = vpop.permute.xlu0 %1141  ;;  %751 = vmatmul.mubr.f32.gmra.mrb[16].mxu1 %v558_v46  ;;  %v1602_v35 = vsel %vm1594_vm7, %v1585_v60, %v1396_v23  ;;  %v563_v58 = vmax.f32 %v510_v52, 0.0  ;;  %v5844_v46 = vld [vmem:[%s7115_s12 + $0x66] sm:$0xff]  ;;  %v6464_v27 = vpack.c.bf16 %v5807_v44, %v5805_v43  ;;  %v1518_v10 = vsel %vm1509_vm2, %v1501_v13, %v7526_v16  ;;  %v519_v16 = vpop.f32.mrb[24].mxu0 }
 0x139   : > { %2739 = vrot.lane.b32.xlu1 %v5924_v12, %s10380_s21  ;;  %756 = vmatprep.mubr.f32.mxu1 %v561_v7  ;;  %v516_v12 = vadd.f32 %v515_v40, %v7892_v6  ;;  %v564_v41 = vmax.f32 %v514_v38, 0.0  ;;  %v5809_v23 = vld [vmem:[%s10339_s5 + $0x388] sm:$0xff]  ;;  %v520_v7 = vadd.f32 %v519_v16, %v7885_v54  ;;  %v521_v63 = vpop.f32.mrb[25].mxu0  ;;  %v5814_v38 = vld [vmem:[%s10339_s5 + $0x3b0] sm:$0xff] }
 0x13a   : > { %2493 = vrot.lane.b32.xlu0 %v8098_v29, %s10381_s23  ;;  %6455 = vmatpush1.bf16.msra.mxu1 %v6454_v59  ;;  %v5806_v59 = vld [vmem:[%s10339_s5 + $0x370] sm:$0xff]  ;;  %v6468_v18 = vpack.c.bf16 %v5811_v49, %v5809_v23  ;;  %v5813_v52 = vld [vmem:[%s10339_s5 + $0x3a8] sm:$0xff] }
 0x13b   : > { %v1460_v30 = vpop.permute.xlu1 %1459  ;;  %6457 = vmatprep.subr.bf16.mxu1 %v6456_v31  ;;  %v1535_v31 = vsel %vm1526_vm3, %v1518_v10, %v8158_v26  ;;  %v565_v15 = vmax.f32 %v516_v12, 0.0  ;;  %v6466_v50 = vpack.c.bf16 %v5806_v59, %v5804_v53  ;;  %v522_v26 = vadd.f32 %v521_v63, %v7892_v6  ;;  %v5817_v13 = vld [vmem:[%s10339_s5 + $0x3c8] sm:$0xff]  ;;  %v5818_v63 = vld [vmem:[%s10339_s5 + $0x3d0] sm:$0xff] }
 0x13c   : > { %v1206_v42 = vpop.permute.xlu0 %1205  ;;  %v1619_v62 = vsel %vm1611_vm8, %v1602_v35, %v1460_v30  ;;  %757 = vmatmul.mubr.f32.gmra.mrb[18].mxu1 %v560_v57  ;;  %v8230_v57 = vld [vmem:[%s7115_s12 + $0x6a] sm:$0xff]  ;;  %v566_v35 = vmax.f32 %v520_v7, 0.0  ;;  %v6472_v56 = vpack.c.bf16 %v5815_v17, %v5813_v52  ;;  %v5816_v7 = vld [vmem:[%s10339_s5 + $0x3c0] sm:$0xff] }
 0x13d   : > { %2795 = vrot.lane.b32.xlu1 %v8179_v36, %s10382_s0  ;;  %5751 = vmatmul.mubr.msk.f32.gmra.mrb[46].mxu0 %vm1651_vm9, %v1619_v62  ;;  %v1552_v28 = vsel %vm1543_vm4, %v1535_v31, %v1206_v42  ;;  %v567_v30 = vmax.f32 %v522_v26, 0.0  ;;  %v525_v42 = vpop.f32.mrb[26].mxu0  ;;  %v5925_v62 = vld [vmem:[%s7115_s12 + $0x14e] sm:$0xff]  ;;  %v5884_v53 = vld [vmem:[%s7115_s12 + $0xe6] sm:$0xff]  ;;  %v6478_v52 = vpack.c.bf16 %v5818_v63, %v5816_v7 }
 0x13e   : > { %2557 = vrot.lane.b32.xlu0 %v5883_v37, %s10383_s17  ;;  %6459 = vmatpush1.bf16.msra.mxu1 %v6458_v34  ;;  %v5810_v34 = vld [vmem:[%s10339_s5 + $0x390] sm:$0xff] }
 0x13f   : > { %v1334_v55 = vpop.permute.xlu1 %1333  ;;  %1818 = vmatprep.mubr.f32.mxu0 %v10386_v47  ;;  %762 = vmatprep.mubr.f32.mxu1 %v563_v58  ;;  %v6470_v43 = vpack.c.bf16 %v5810_v34, %v5808_v45  ;;  %v6874_v23 = vld [vmem:[%s7115_s12 + $0x10c] sm:$0xff] }
 0x140   : > { %v1270_v25 = vpop.permute.xlu0 %1269  ;;  %763 = vmatmul.mubr.f32.gmra.mrb[20].mxu1 %v562_v3  ;;  %6461 = vmatprep.subr.bf16.mxu1 %v6460_v0  ;;  %v5868_v3 = vld [vmem:[%s7115_s12 + $0xe2] sm:$0xff]  ;;  %v526_v0 = vadd.f32 %v525_v42, %v7885_v54  ;;  %v1502_v49 = vsel %vm327_vm1, %v6874_v23, %v7442_v8  ;;  %v5869_v34 = vld [vmem:[%s7115_s12 + $0xea] sm:$0xff] }
 0x141   : > { %2613 = vrot.lane.b32.xlu1 %v5898_v24, %s10379_s18  ;;  %v1569_v14 = vsel %vm1560_vm5, %v1552_v28, %v1270_v25  ;;  %768 = vmatprep.mubr.f32.mxu1 %v565_v15  ;;  %v1519_v8 = vsel %vm1509_vm2, %v1502_v49, %v7524_v39  ;;  %v5899_v49 = vld [vmem:[%s7115_s12 + $0xf2] sm:$0xff]  ;;  %v8348_v63 = vld [vmem:[%s7115_s12 + $0x8a] sm:$0xff] }
 0x142   : > { %2367 = vrot.lane.b32.xlu0 %v5844_v46, %s10387_s29  ;;  %6463 = vmatpush1.bf16.msra.mxu1 %v6462_v2  ;;  %v1586_v1 = vsel %vm1577_vm6, %v1569_v14, %v1334_v55  ;;  %v5812_v46 = vld [vmem:[%s10339_s5 + $0x3a0] sm:$0xff]  ;;  %v568_v2 = vmax.f32 %v526_v0, 0.0  ;;  %v5819_v55 = vld [vmem:[%s10339_s5 + $0x3d8] sm:$0xff]  ;;  %v5821_v14 = vld [vmem:[%s10339_s5 + $0x3e8] sm:$0xff] }
 0x143   : > { %v1398_v60 = vpop.permute.xlu1 %1397  ;;  %6465 = vmatprep.subr.bf16.mxu1 %v6464_v27  ;;  %v5940_v27 = vld [vmem:[%s7115_s12 + $0x152] sm:$0xff]  ;;  %v6476_v28 = vpack.c.bf16 %v5819_v55, %v5817_v13  ;;  %v5820_v0 = vld [vmem:[%s10339_s5 + $0x3e0] sm:$0xff] }
 0x144   : > { %v8234_v37 = vpop.permute.xlu0 %1143  ;;  %769 = vmatmul.mubr.f32.gmra.mrb[22].mxu1 %v564_v41  ;;  %v1603_v44 = vsel %vm1594_vm7, %v1586_v1, %v1398_v60  ;;  %v6474_v41 = vpack.c.bf16 %v5814_v38, %v5812_v46  ;;  %v5823_v60 = vld [vmem:[%s10339_s5 + $0x3f8] sm:$0xff] }
 0x145   : > { %2677 = vrot.lane.b32.xlu1 %v8179_v36, %s10378_s22  ;;  %v527_v36 = vpop.f32.mrb[27].mxu0  ;;  %774 = vmatprep.mubr.f32.mxu1 %v567_v30  ;;  %v1536_v26 = vsel %vm1526_vm3, %v1519_v8, %v8234_v37  ;;  %v6876_v8 = vld [vmem:[%s7115_s12 + $0x12c] sm:$0xff] }
 0x146   : > { %2431 = vrot.lane.b32.xlu0 %v8230_v57, %s10388_s9  ;;  %6467 = vmatpush1.bf16.msra.mxu1 %v6466_v50  ;;  %v528_v24 = vadd.f32 %v527_v36, %v7892_v6  ;;  %v531_v12 = vpop.f32.mrb[28].mxu0 }
 0x147   : > { %v1462_v58 = vpop.permute.xlu1 %1461  ;;  %6469 = vmatprep.subr.bf16.mxu1 %v6468_v18  ;;  %v532_v59 = vadd.f32 %v531_v12, %v7885_v54  ;;  %v533_v10 = vpop.f32.mrb[29].mxu0 }
 0x148   : > { %v1208_v5 = vpop.permute.xlu0 %1207  ;;  %v1620_v40 = vsel %vm1611_vm8, %v1603_v44, %v1462_v58  ;;  %775 = vmatmul.mubr.f32.gmra.mrb[24].mxu1 %v566_v35  ;;  %v569_v25 = vmax.f32 %v528_v24, 0.0  ;;  %v534_v16 = vadd.f32 %v533_v10, %v7892_v6  ;;  %v537_v39 = vpop.f32.mrb[30].mxu0  ;;  %v5845_v35 = vld [vmem:[%s7115_s12 + $0x6e] sm:$0xff]  ;;  %v5910_v44 = vld [vmem:[%s7115_s12 + $0x162] sm:$0xff] }
 0x149   : > { %2741 = vrot.lane.b32.xlu1 %v5925_v62, %s10380_s21  ;;  %5752 = vmatmul.mubr.msk.f32.gmra.mrb[48].mxu0 %vm1651_vm9, %v1620_v40  ;;  %v570_v50 = vmax.f32 %v532_v59, 0.0  ;;  %v1553_v45 = vsel %vm1543_vm4, %v1536_v26, %v1208_v5  ;;  %v538_v30 = vadd.f32 %v537_v39, %v7885_v54  ;;  %v539_v42 = vpop.f32.mrb[31].mxu0  ;;  %v5822_v54 = vld [vmem:[%s10339_s5 + $0x3f0] sm:$0xff] }
 0x14a   : > { %2495 = vrot.lane.b32.xlu0 %v5868_v3, %s10381_s23  ;;  %6471 = vmatpush1.bf16.msra.mxu1 %v6470_v43  ;;  %v571_v18 = vmax.f32 %v534_v16, 0.0  ;;  %v540_v62 = vadd.f32 %v539_v42, %v7892_v6  ;;  %v6480_v3 = vpack.c.bf16 %v5823_v60, %v5821_v14  ;;  %v5859_v58 = vld [vmem:[%s7115_s12 + $0x72] sm:$0xff]  ;;  %v6482_v5 = vpack.c.bf16 %v5822_v54, %v5820_v0  ;;  %v5911_v59 = vld [vmem:[%s7115_s12 + $0x16a] sm:$0xff] }
 0x14b   : > { %v1336_v31 = vpop.permute.xlu1 %1335  ;;  %1824 = vmatprep.mubr.f32.mxu0 %v10386_v47  ;;  %780 = vmatprep.mubr.f32.mxu1 %v569_v25  ;;  %v572_v36 = vmax.f32 %v538_v30, 0.0  ;;  %v5885_v10 = vld [vmem:[%s7115_s12 + $0xee] sm:$0xff]  ;;  %v6877_v54 = vld [vmem:[%s7115_s12 + $0x144] sm:$0xff] }
 0x14c   : > { %v1272_v15 = vpop.permute.xlu0 %1271  ;;  %781 = vmatmul.mubr.f32.gmra.mrb[26].mxu1 %v568_v2  ;;  %6473 = vmatprep.subr.bf16.mxu1 %v6472_v56  ;;  %v573_v43 = vmax.f32 %v540_v62, 0.0  ;;  %v5926_v2 = vld [vmem:[%s7115_s12 + $0x166] sm:$0xff]  ;;  %v5941_v42 = vld [vmem:[%s7115_s12 + $0x172] sm:$0xff] }
 0x14d   : > { %2797 = vrot.lane.b32.xlu1 %v5940_v27, %s10382_s0  ;;  %v1570_v17 = vsel %vm1560_vm5, %v1553_v45, %v1272_v15  ;;  %786 = vmatprep.mubr.f32.mxu1 %v571_v18  ;;  %v6875_v56 = vld [vmem:[%s7115_s12 + $0x124] sm:$0xff]  ;;  %v5927_v45 = vld [vmem:[%s7115_s12 + $0x16e] sm:$0xff] }
 0x14e   : > { %2559 = vrot.lane.b32.xlu0 %v5884_v53, %s10383_s17  ;;  %6475 = vmatpush1.bf16.msra.mxu1 %v6474_v41  ;;  %v1587_v6 = vsel %vm1577_vm6, %v1570_v17, %v1336_v31  ;;  %v1503_v13 = vsel %vm327_vm1, %v6875_v56, %v7451_v11  ;;  %v5846_v31 = vld [vmem:[%s7115_s12 + $0x86] sm:$0xff]  ;;  %v5847_v0 = vld [vmem:[%s7115_s12 + $0x8e] sm:$0xff] }
 0x14f   : > { %v1400_v37 = vpop.permute.xlu1 %1399  ;;  %6477 = vmatprep.subr.bf16.mxu1 %v6476_v28  ;;  %v1520_v12 = vsel %vm1509_vm2, %v1503_v13, %v7546_v32 }
 0x150   : > { %v1146_v1 = vpop.permute.xlu0 %1145  ;;  %787 = vmatmul.mubr.f32.gmra.mrb[28].mxu1 %v570_v50  ;;  %v1604_v24 = vsel %vm1594_vm7, %v1587_v6, %v1400_v37  ;;  %v1504_v50 = vsel %vm327_vm1, %v6876_v8, %v7449_v9  ;;  %v5870_v9 = vld [vmem:[%s7115_s12 + $0x102] sm:$0xff] }
 0x151   : > { %2615 = vrot.lane.b32.xlu1 %v5869_v34, %s10379_s18  ;;  %792 = vmatprep.mubr.f32.mxu1 %v573_v43  ;;  %v1537_v27 = vsel %vm1526_vm3, %v1520_v12, %v1146_v1  ;;  %v1521_v26 = vsel %vm1509_vm2, %v1504_v50, %v7544_v48  ;;  %v5913_v12 = vld [vmem:[%s7115_s12 + $0x18a] sm:$0xff] }
 0x152   : > { %2369 = vrot.lane.b32.xlu0 %v5845_v35, %s10387_s29  ;;  %6479 = vmatpush1.bf16.msra.mxu1 %v6478_v52  ;;  %v5886_v52 = vld [vmem:[%s7115_s12 + $0x106] sm:$0xff] }
 0x153   : > { %v1464_v46 = vpop.permute.xlu1 %1463  ;;  %6481 = vmatprep.subr.bf16.mxu1 %v6480_v3  ;;  %v5871_v3 = vld [vmem:[%s7115_s12 + $0x10a] sm:$0xff] }
 0x154   : > { %v1210_v38 = vpop.permute.xlu0 %1209  ;;  %v1621_v40 = vsel %vm1611_vm8, %v1604_v24, %v1464_v46  ;;  %793 = vmatmul.mubr.f32.gmra.mrb[30].mxu1 %v572_v36  ;;  %v1505_v36 = vsel %vm327_vm1, %v6877_v54, %v7462_v20  ;;  %v5912_v24 = vld [vmem:[%s7115_s12 + $0x182] sm:$0xff]  ;;  %v5860_v46 = vld [vmem:[%s7115_s12 + $0x92] sm:$0xff] }
 0x155   : > { %2679 = vrot.lane.b32.xlu1 %v5910_v44, %s10378_s22  ;;  %5753 = vmatmul.mubr.msk.f32.gmra.mrb[50].mxu0 %vm1651_vm9, %v1621_v40  ;;  %v1554_v53 = vsel %vm1543_vm4, %v1537_v27, %v1210_v38  ;;  %v1522_v44 = vsel %vm1509_vm2, %v1505_v36, %v7568_v4  ;;  %v5887_v27 = vld [vmem:[%s7115_s12 + $0x10e] sm:$0xff] }
 0x156   : > { %2433 = vrot.lane.b32.xlu0 %v5859_v58, %s10388_s9  ;;  %6483 = vmatpush1.bf16.msra.mxu1 %v6482_v5 }
 0x157   : > { %v1338_v55 = vpop.permute.xlu1 %1337  ;;  %1830 = vmatprep.mubr.f32.mxu0 %v10386_v47 }
 0x158   : > { %v1274_v25 = vpop.permute.xlu0 %1273 }
 0x159   : > { %2743 = vrot.lane.b32.xlu1 %v5926_v2, %s10380_s21  ;;  %v1571_v11 = vsel %vm1560_vm5, %v1554_v53, %v1274_v25  ;;  %v6878_v25 = vld [vmem:[%s7115_s12 + $0x186] sm:$0xff] }
 0x15a   : > { %2497 = vrot.lane.b32.xlu0 %v5869_v34, %s10381_s23  ;;  %v1588_v32 = vsel %vm1577_vm6, %v1571_v11, %v1338_v55  ;;  %v6879_v53 = vld [vmem:[%s7115_s12 + $0x14c] sm:$0xff] }
 0x15b   : > { %v1402_v41 = vpop.permute.xlu1 %1401 }
 0x15c   : > { %v1148_v23 = vpop.permute.xlu0 %1147  ;;  %v1605_v15 = vsel %vm1594_vm7, %v1588_v32, %v1402_v41 }
 0x15d   : > { %2799 = vrot.lane.b32.xlu1 %v5911_v59, %s10382_s0  ;;  %v1538_v18 = vsel %vm1526_vm3, %v1521_v26, %v1148_v23  ;;  %v5872_v26 = vld [vmem:[%s7115_s12 + $0x122] sm:$0xff] }
 0x15e   : > { %2561 = vrot.lane.b32.xlu0 %v5885_v10, %s10383_s17 }
 0x15f   : > { %v1466_v16 = vpop.permute.xlu1 %1465 }
 0x160   : > { %v1212_v28 = vpop.permute.xlu0 %1211  ;;  %v1622_v7 = vsel %vm1611_vm8, %v1605_v15, %v1466_v16 }
 0x161   : > { %2617 = vrot.lane.b32.xlu1 %v5899_v49, %s10379_s18  ;;  %5754 = vmatmul.mubr.msk.f32.gmra.mrb[52].mxu0 %vm1651_vm9, %v1622_v7  ;;  %v1555_v39 = vsel %vm1543_vm4, %v1538_v18, %v1212_v28  ;;  %v5900_v49 = vld [vmem:[%s7115_s12 + $0x112] sm:$0xff]  ;;  %v8417_v28 = vld [vmem:[%s7115_s12 + $0xaa] sm:$0xff] }
 0x162   : > { %2371 = vrot.lane.b32.xlu0 %v5846_v31, %s10387_s29  ;;  %1836 = vmatprep.mubr.f32.mxu0 %v10386_v47  ;;  %v5848_v31 = vld [vmem:[%s7115_s12 + $0xa6] sm:$0xff] }
 0x163   : > { %v1340_v14 = vpop.permute.xlu1 %1339  ;;  %v6880_v18 = vld [vmem:[%s7115_s12 + $0x164] sm:$0xff] }
 0x164   : > { %v1276_v60 = vpop.permute.xlu0 %1275 }
 0x165   : > { %2681 = vrot.lane.b32.xlu1 %v5911_v59, %s10378_s22  ;;  %v1572_v34 = vsel %vm1560_vm5, %v1555_v39, %v1276_v60  ;;  %v1506_v59 = vsel %vm327_vm1, %v6879_v53, %v7460_v19  ;;  %v5929_v60 = vld [vmem:[%s7115_s12 + $0x18e] sm:$0xff]  ;;  %v1507_v39 = vsel %vm327_vm1, %v6880_v18, %v7470_v22 }
 0x166   : > { %2435 = vrot.lane.b32.xlu0 %v8348_v63, %s10388_s9  ;;  %v1589_v48 = vsel %vm1577_vm6, %v1572_v34, %v1340_v14  ;;  %v1523_v41 = vsel %vm1509_vm2, %v1506_v59, %v7566_v61  ;;  %v10389_v34 = vld [vmem:[#allocation14_spill] sm:$0xff] }
 0x167   : > { %v1404_v35 = vpop.permute.xlu1 %1403 }
 0x168   : > { %v1150_v30 = vpop.permute.xlu0 %1149  ;;  %v1606_v17 = vsel %vm1594_vm7, %v1589_v48, %v1404_v35  ;;  %v1524_v35 = vsel %vm1509_vm2, %v1507_v39, %v10389_v34  ;;  %v5875_v34 = vld [vmem:[%s7115_s12 + $0x14a] sm:$0xff] }
 0x169   : > { %2745 = vrot.lane.b32.xlu1 %v5927_v45, %s10380_s21  ;;  %v1539_v58 = vsel %vm1526_vm3, %v1522_v44, %v1150_v30  ;;  %v5861_v44 = vld [vmem:[%s7115_s12 + $0xb2] sm:$0xff] }
 0x16a   : > { %2499 = vrot.lane.b32.xlu0 %v5870_v9, %s10381_s23 }
 0x16b   : > { %v1468_v37 = vpop.permute.xlu1 %1467 }
 0x16c   : > { %v1214_v1 = vpop.permute.xlu0 %1213  ;;  %v1623_v62 = vsel %vm1611_vm8, %v1606_v17, %v1468_v37 }
 0x16d   : > { %2801 = vrot.lane.b32.xlu1 %v5941_v42, %s10382_s0  ;;  %5755 = vmatmul.mubr.msk.f32.gmra.mrb[54].mxu0 %vm1651_vm9, %v1623_v62  ;;  %v1556_v5 = vsel %vm1543_vm4, %v1539_v58, %v1214_v1  ;;  %v5942_v42 = vld [vmem:[%s7115_s12 + $0x192] sm:$0xff]  ;;  %v5873_v62 = vld [vmem:[%s7115_s12 + $0x12a] sm:$0xff] }
 0x16e   : > { %2563 = vrot.lane.b32.xlu0 %v5886_v52, %s10383_s17  ;;  %1842 = vmatprep.mubr.f32.mxu0 %v10386_v47  ;;  %v5888_v52 = vld [vmem:[%s7115_s12 + $0x126] sm:$0xff] }
 0x16f   : > { %v1342_v43 = vpop.permute.xlu1 %1341 }
 0x170   : > { %v1278_v6 = vpop.permute.xlu0 %1277 }
 0x171   : > { %2619 = vrot.lane.b32.xlu1 %v5871_v3, %s10379_s18  ;;  %v1573_v20 = vsel %vm1560_vm5, %v1556_v5, %v1278_v6  ;;  %v5914_v6 = vld [vmem:[%s7115_s12 + $0x1a2] sm:$0xff] }
 0x172   : > { %2373 = vrot.lane.b32.xlu0 %v5847_v0, %s10387_s29  ;;  %v1590_v4 = vsel %vm1577_vm6, %v1573_v20, %v1342_v43 }
 0x173   : > { %v1406_v38 = vpop.permute.xlu1 %1405 }
 0x174   : > { %v1152_v40 = vpop.permute.xlu0 %1151  ;;  %v1607_v2 = vsel %vm1594_vm7, %v1590_v4, %v1406_v38  ;;  %v6881_v38 = vld [vmem:[%s7115_s12 + $0x16c] sm:$0xff] }
 0x175   : > { %2683 = vrot.lane.b32.xlu1 %v5912_v24, %s10378_s22  ;;  %v1540_v23 = vsel %vm1526_vm3, %v1523_v41, %v1152_v40  ;;  %v8456_v24 = vld [vmem:[%s7115_s12 + $0x1a6] sm:$0xff] }
 0x176   : > { %2437 = vrot.lane.b32.xlu0 %v5860_v46, %s10388_s9  ;;  %v10390_v40 = vld [vmem:[#allocation12_spill] sm:$0xff] }
 0x177   : > { %v1470_v56 = vpop.permute.xlu1 %1469  ;;  %v1508_v4 = vsel %vm327_vm1, %v6881_v38, %v10390_v40 }
 0x178   : > { %v1216_v13 = vpop.permute.xlu0 %1215  ;;  %v1624_v55 = vsel %vm1611_vm8, %v1607_v2, %v1470_v56  ;;  %v10391_v2 = vld [vmem:[#allocation13_spill] sm:$0xff] }
 0x179   : > { %2747 = vrot.lane.b32.xlu1 %v6878_v25, %s10380_s21  ;;  %5756 = vmatmul.mubr.msk.f32.gmra.mrb[56].mxu0 %vm1651_vm9, %v1624_v55  ;;  %v1557_v32 = vsel %vm1543_vm4, %v1540_v23, %v1216_v13  ;;  %v1525_v56 = vsel %vm1509_vm2, %v1508_v4, %v10391_v2  ;;  %v8467_v13 = vld [vmem:[%s7115_s12 + $0x1aa] sm:$0xff]  ;;  %v5902_v4 = vld [vmem:[%s7115_s12 + $0x152] sm:$0xff] }
 0x17a   : > { %2501 = vrot.lane.b32.xlu0 %v5871_v3, %s10381_s23  ;;  %1848 = vmatprep.mubr.f32.mxu0 %v10386_v47  ;;  %v5849_v3 = vld [vmem:[%s7115_s12 + $0xae] sm:$0xff]  ;;  %v5852_v2 = vld [vmem:[%s7115_s12 + $0xe6] sm:$0xff] }
 0x17b   : > { %v1344_v10 = vpop.permute.xlu1 %1343  ;;  %v8470_v55 = vld [vmem:[%s7115_s12 + $0x12e] sm:$0xff] }
 0x17c   : > { %v1280_v11 = vpop.permute.xlu0 %1279 }
 0x17d   : > { %2803 = vrot.lane.b32.xlu1 %v5913_v12, %s10382_s0  ;;  %v1574_v19 = vsel %vm1560_vm5, %v1557_v32, %v1280_v11  ;;  %v8481_v11 = vld [vmem:[%s7115_s12 + $0x132] sm:$0xff] }
 0x17e   : > { %2565 = vrot.lane.b32.xlu0 %v5887_v27, %s10383_s17  ;;  %v1591_v61 = vsel %vm1577_vm6, %v1574_v19, %v1344_v10 }
 0x17f   : > { %v1408_v15 = vpop.permute.xlu1 %1407 }
 0x180   : > { %v1154_v16 = vpop.permute.xlu0 %1153  ;;  %v1608_v7 = vsel %vm1594_vm7, %v1591_v61, %v1408_v15  ;;  %v5826_v15 = vld [vmem:[%s7115_s12 + $0x42] sm:$0xff] }
 0x181   : > { %2621 = vrot.lane.b32.xlu1 %v5900_v49, %s10379_s18  ;;  %v1541_v30 = vsel %vm1526_vm3, %v1524_v35, %v1154_v16  ;;  %v8497_v16 = vld [vmem:[%s7115_s12 + $0x1ae] sm:$0xff]  ;;  %v5874_v61 = vld [vmem:[%s7115_s12 + $0x142] sm:$0xff] }
 0x182   : > { %2375 = vrot.lane.b32.xlu0 %v5848_v31, %s10387_s29  ;;  %v5851_v35 = vld [vmem:[%s7115_s12 + $0xce] sm:$0xff] }
 0x183   : > { %v1472_v8 = vpop.permute.xlu1 %1471 }
 0x184   : > { %v1218_v50 = vpop.permute.xlu0 %1217  ;;  %v1625_v14 = vsel %vm1611_vm8, %v1608_v7, %v1472_v8 }
 0x185   : > { %2685 = vrot.lane.b32.xlu1 %v5913_v12, %s10378_s22  ;;  %5757 = vmatmul.mubr.msk.f32.gmra.mrb[58].mxu0 %vm1651_vm9, %v1625_v14  ;;  %v1558_v48 = vsel %vm1543_vm4, %v1541_v30, %v1218_v50  ;;  %v8506_v14 = vld [vmem:[%s7115_s12 + $0x1b2] sm:$0xff] }
 0x186   : > { %2439 = vrot.lane.b32.xlu0 %v8417_v28, %s10388_s9  ;;  %1854 = vmatprep.mubr.f32.mxu0 %v10386_v47 }
 0x187   : > { %v1346_v45 = vpop.permute.xlu1 %1345 }
 0x188   : > { %v1282_v9 = vpop.permute.xlu0 %1281 }
 0x189   : > { %2749 = vrot.lane.b32.xlu1 %v5929_v60, %s10380_s21  ;;  %v1575_v22 = vsel %vm1560_vm5, %v1558_v48, %v1282_v9 }
 0x18a   : > { %2503 = vrot.lane.b32.xlu0 %v5872_v26, %s10381_s23  ;;  %v1592_v1 = vsel %vm1577_vm6, %v1575_v22, %v1346_v45  ;;  %v5916_v22 = vld [vmem:[%s7115_s12 + $0x1c2] sm:$0xff] }
 0x18b   : > { %v1410_v17 = vpop.permute.xlu1 %1409 }
 0x18c   : > { %v1156_v37 = vpop.permute.xlu0 %1155  ;;  %v1609_v0 = vsel %vm1594_vm7, %v1592_v1, %v1410_v17  ;;  %v5862_v17 = vld [vmem:[%s7115_s12 + $0xd2] sm:$0xff] }
 0x18d   : > { %2805 = vrot.lane.b32.xlu1 %v5942_v42, %s10382_s0  ;;  %v1542_v25 = vsel %vm1526_vm3, %v1525_v56, %v1156_v37 }
 0x18e   : > { %2567 = vrot.lane.b32.xlu0 %v5888_v52, %s10383_s17 }
 0x18f   : > { %v1474_v54 = vpop.permute.xlu1 %1473 }
 0x190   : > { %v1220_v36 = vpop.permute.xlu0 %1219  ;;  %v1626_v43 = vsel %vm1611_vm8, %v1609_v0, %v1474_v54  ;;  %v6882_v54 = vld [vmem:[%s7115_s12 + $0x4a] sm:$0xff] }
 0x191   : > { %2623 = vrot.lane.b32.xlu1 %v5873_v62, %s10379_s18  ;;  %5758 = vmatmul.mubr.msk.f32.gmra.mrb[60].mxu0 %vm1651_vm9, %v1626_v43  ;;  %v1559_v53 = vsel %vm1543_vm4, %v1542_v25, %v1220_v36 }
 0x192   : > { %2377 = vrot.lane.b32.xlu0 %v5849_v3, %s10387_s29  ;;  %1860 = vmatprep.mubr.f32.mxu0 %v10386_v47 }
 0x193   : > { %v2364_v58 = vpop.permute.xlu1 %2363 }
 0x194   : > { %v1284_v5 = vpop.permute.xlu0 %1283  ;;  %v2843_v8 = vsel %vm327_vm1, %v5826_v15, %v2364_v58 }
 0x195   : > { %2687 = vrot.lane.b32.xlu1 %v5914_v6, %s10378_s22  ;;  %v1576_v59 = vsel %vm1560_vm5, %v1559_v53, %v1284_v5  ;;  %v5917_v6 = vld [vmem:[%s7115_s12 + $0x1ca] sm:$0xff] }
 0x196   : > { %2441 = vrot.lane.b32.xlu0 %v5861_v44, %s10388_s9  ;;  %v5891_v44 = vld [vmem:[%s7115_s12 + $0x14e] sm:$0xff] }
 0x197   : > { %v2428_v46 = vpop.permute.xlu1 %2427 }
 0x198   : > { %v1348_v20 = vpop.permute.xlu0 %1347  ;;  %v2859_v50 = vsel %vm1509_vm2, %v2843_v8, %v2428_v46 }
 0x199   : > { %2751 = vrot.lane.b32.xlu1 %v8456_v24, %s10380_s21  ;;  %v1593_v10 = vsel %vm1577_vm6, %v1576_v59, %v1348_v20 }
 0x19a   : > { %2505 = vrot.lane.b32.xlu0 %v5873_v62, %s10381_s23  ;;  %v5932_v62 = vld [vmem:[%s7115_s12 + $0x1c6] sm:$0xff] }
 0x19b   : > { %v2492_v12 = vpop.permute.xlu1 %2491 }
 0x19c   : > { %v1412_v27 = vpop.permute.xlu0 %1411  ;;  %v2875_v60 = vsel %vm1526_vm3, %v2859_v50, %v2492_v12 }
 0x19d   : > { %2807 = vrot.lane.b32.xlu1 %v8467_v13, %s10382_s0  ;;  %v1610_v41 = vsel %vm1594_vm7, %v1593_v10, %v1412_v27  ;;  %v5741_v27 = vld [vmem:[%s10338_s4 + $0x1] ss:$8 sm:$0x3]  ;;  %v5837_v10 = vld [vmem:[%s7115_s12 + $0xea] sm:$0xff] }
 0x19e   : > { %2569 = vrot.lane.b32.xlu0 %v8470_v55, %s10383_s17  ;;  %v8553_v59 = vrot.slane %v5741_v27, %v7867_v21 }
 0x19f   : > { %v2556_v23 = vpop.permute.xlu1 %2555 }
 0x1a0   : > { %v1476_v32 = vpop.permute.xlu0 %1475  ;;  %v2891_v39 = vsel %vm1543_vm4, %v2875_v60, %v2556_v23 }
 0x1a1   : > { %v1627_v49 = vsel %vm1611_vm8, %v1610_v41, %v1476_v32  ;;  %2625 = vrot.lane.b32.xlu1 %v8481_v11, %s10379_s18  ;;  %v8559_v32 = vrot.slane %v5741_v27, %v7876_v33  ;;  %v5863_v27 = vld [vmem:[%s7115_s12 + $0xf2] sm:$0xff] }
 0x1a2   : > { %2379 = vrot.lane.b32.xlu0 %v8057_v51, %s10387_s29  ;;  %5759 = vmatmul.mubr.msk.f32.gmra.mrb[62].mxu0 %vm1651_vm9, %v1627_v49 }
 0x1a3   : > { %v2612_v31 = vpop.permute.xlu1 %2611  ;;  %3113 = vmatprep.mubr.f32.mxu0 %v10386_v47 }
 0x1a4   : > { %v2366_v19 = vpop.permute.xlu0 %2365  ;;  %v2907_v45 = vsel %vm1560_vm5, %v2891_v39, %v2612_v31  ;;  %v5828_v31 = vld [vmem:[%s7115_s12 + $0x62] sm:$0xff] }
 0x1a5   : > { %2689 = vrot.lane.b32.xlu1 %v8467_v13, %s10378_s22  ;;  %v2844_v36 = vsel %vm327_vm1, %v6882_v54, %v2366_v19  ;;  %v5978_v39 = vld [vmem:[%s10339_s5 + $0x408] sm:$0xff] }
 0x1a6   : > { %2443 = vrot.lane.b32.xlu0 %v8098_v29, %s10388_s9  ;;  %v5890_v29 = vld [vmem:[%s7115_s12 + $0x146] sm:$0xff] }
 0x1a7   : > { %v2676_v7 = vpop.permute.xlu1 %2675 }
 0x1a8   : > { %v2430_v51 = vpop.permute.xlu0 %2429  ;;  %v2923_v9 = vsel %vm1577_vm6, %v2907_v45, %v2676_v7  ;;  %v5876_v7 = vld [vmem:[%s7115_s12 + $0x162] sm:$0xff] }
 0x1a9   : > { %2753 = vrot.lane.b32.xlu1 %v8497_v16, %s10380_s21  ;;  %v2860_v43 = vsel %vm1509_vm2, %v2844_v36, %v2430_v51 }
 0x1aa   : > { %2507 = vrot.lane.b32.xlu0 %v5874_v61, %s10381_s23  ;;  %v5933_v61 = vld [vmem:[%s7115_s12 + $0x1ce] sm:$0xff] }
 0x1ab   : > { %v2740_v26 = vpop.permute.xlu1 %2739 }
 0x1ac   : > { %v2494_v18 = vpop.permute.xlu0 %2493  ;;  %v2939_v30 = vsel %vm1594_vm7, %v2923_v9, %v2740_v26 }
 0x1ad   : > { %2809 = vrot.lane.b32.xlu1 %v8506_v14, %s10382_s0  ;;  %v2876_v58 = vsel %vm1526_vm3, %v2860_v43, %v2494_v18  ;;  %v5892_v18 = vld [vmem:[%s7115_s12 + $0x166] sm:$0xff] }
 0x1ae   : > { %2571 = vrot.lane.b32.xlu0 %v5890_v29, %s10383_s17  ;;  %v5944_v29 = vld [vmem:[%s7115_s12 + $0x1d2] sm:$0xff]  ;;  %v5877_v43 = vld [vmem:[%s7115_s12 + $0x16a] sm:$0xff] }
 0x1af   : > { %v2796_v48 = vpop.permute.xlu1 %2795 }
 0x1b0   : > { %v2558_v42 = vpop.permute.xlu0 %2557  ;;  %v2955_v52 = vsel %vm1611_vm8, %v2939_v30, %v2796_v48  ;;  %v5979_v30 = vld [vmem:[%s10339_s5 + $0x410] sm:$0xff] }
 0x1b1   : > { %2627 = vrot.lane.b32.xlu1 %v5875_v34, %s10379_s18  ;;  %5961 = vmatmul.mubr.msk.f32.vlgmr.msra.gmra.mrb[64].mxu0 %vm1651_vm9, %v2955_v52  ;;  %v2892_v20 = vsel %vm1543_vm4, %v2876_v58, %v2558_v42 }
 0x1b2   : > { %2381 = vrot.lane.b32.xlu0 %v5851_v35, %s10387_s29  ;;  %3119 = vmatprep.mubr.f32.mxu0 %v10386_v47  ;;  %v5977_v35 = vld [vmem:[%s10339_s5 + $0x400] sm:$0xff] }
 0x1b3   : > { %v2614_v37 = vpop.permute.xlu1 %2613 }
 0x1b4   : > { %v2368_v1 = vpop.permute.xlu0 %2367  ;;  %v2908_v38 = vsel %vm1560_vm5, %v2892_v20, %v2614_v37 }
 0x1b5   : > { %2691 = vrot.lane.b32.xlu1 %v5916_v22, %s10378_s22  ;;  %v2845_v60 = vsel %vm327_vm1, %v5828_v31, %v2368_v1 }
 0x1b6   : > { %2445 = vrot.lane.b32.xlu0 %v5862_v17, %s10388_s9  ;;  %v6494_v17 = vpack.c.bf16 %v5979_v30, %v5977_v35  ;;  %v5919_v35 = vld [vmem:[%s7115_s12 + $0x1ea] sm:$0xff] }
 0x1b7   : > { %v2678_v3 = vpop.permute.xlu1 %2677 }
 0x1b8   : > { %v2432_v0 = vpop.permute.xlu0 %2431  ;;  %v2924_v40 = vsel %vm1577_vm6, %v2908_v38, %v2678_v3  ;;  %v5982_v3 = vld [vmem:[%s10339_s5 + $0x428] sm:$0xff] }
 0x1b9   : > { %2755 = vrot.lane.b32.xlu1 %v5932_v62, %s10380_s21  ;;  %v2861_v45 = vsel %vm1509_vm2, %v2845_v60, %v2432_v0 }
 0x1ba   : > { %2509 = vrot.lane.b32.xlu0 %v5875_v34, %s10381_s23  ;;  %v5980_v34 = vld [vmem:[%s10339_s5 + $0x418] sm:$0xff] }
 0x1bb   : > { %v2742_v5 = vpop.permute.xlu1 %2741  ;;  %v6492_v22 = vpack.c.bf16 %v5980_v34, %v5978_v39  ;;  %v5989_v39 = vld [vmem:[%s10339_s5 + $0x460] sm:$0xff] }
 0x1bc   : > { %v2496_v46 = vpop.permute.xlu0 %2495  ;;  %v2940_v56 = vsel %vm1594_vm7, %v2924_v40, %v2742_v5  ;;  %v5981_v40 = vld [vmem:[%s10339_s5 + $0x420] sm:$0xff] }
 0x1bd   : > { %2811 = vrot.lane.b32.xlu1 %v5917_v6, %s10382_s0  ;;  %v2877_v48 = vsel %vm1526_vm3, %v2861_v45, %v2496_v46  ;;  %6493 = vmatprep.subr.bf16.mxu1 %v6492_v22  ;;  %v5991_v45 = vld [vmem:[%s10339_s5 + $0x470] sm:$0xff] }
 0x1be   : > { %2573 = vrot.lane.b32.xlu0 %v5891_v44, %s10383_s17  ;;  %v5984_v44 = vld [vmem:[%s10339_s5 + $0x438] sm:$0xff]  ;;  %v5893_v22 = vld [vmem:[%s7115_s12 + $0x16e] sm:$0xff] }
 0x1bf   : > { %v2798_v25 = vpop.permute.xlu1 %2797  ;;  %v6496_v38 = vpack.c.bf16 %v5984_v44, %v5982_v3 }
 0x1c0   : > { %v2560_v12 = vpop.permute.xlu0 %2559  ;;  %v2956_v53 = vsel %vm1611_vm8, %v2940_v56, %v2798_v25  ;;  %v5918_v25 = vld [vmem:[%s7115_s12 + $0x1e2] sm:$0xff] }
 0x1c1   : > { %2629 = vrot.lane.b32.xlu1 %v5902_v4, %s10379_s18  ;;  %5962 = vmatmul.mubr.msk.f32.gmra.mrb[66].mxu0 %vm1651_vm9, %v2956_v53  ;;  %v2893_v37 = vsel %vm1543_vm4, %v2877_v48, %v2560_v12  ;;  %v5983_v4 = vld [vmem:[%s10339_s5 + $0x430] sm:$0xff] }
 0x1c2   : > { %2383 = vrot.lane.b32.xlu0 %v5852_v2, %s10387_s29  ;;  %3125 = vmatprep.mubr.f32.mxu0 %v10386_v47  ;;  %v6498_v53 = vpack.c.bf16 %v5983_v4, %v5981_v40 }
 0x1c3   : > { %v2616_v41 = vpop.permute.xlu1 %2615 }
 0x1c4   : > { %v8556_v23 = vpop.permute.xlu0 %2369  ;;  %v2909_v1 = vsel %vm1560_vm5, %v2893_v37, %v2616_v41  ;;  %v5988_v41 = vld [vmem:[%s10339_s5 + $0x458] sm:$0xff]  ;;  %v5994_v37 = vld [vmem:[%s10339_s5 + $0x488] sm:$0xff] }
 0x1c5   : > { %v1772_v49 = vpop.f32.mrb[32].mxu0  ;;  %2693 = vrot.lane.b32.xlu1 %v5917_v6, %s10378_s22  ;;  %v5853_v6 = vld [vmem:[%s7115_s12 + $0xee] sm:$0xff] }
 0x1c6   : > { %2447 = vrot.lane.b32.xlu0 %v5837_v10, %s10388_s9  ;;  %v1773_v19 = vadd.f32 %v1772_v49, %v8553_v59  ;;  %v1774_v15 = vpop.f32.mrb[33].mxu0  ;;  %v5986_v10 = vld [vmem:[%s10339_s5 + $0x448] sm:$0xff] }
 0x1c7   : > { %v1775_v51 = vadd.f32 %v1774_v15, %v8559_v32  ;;  %v2680_v8 = vpop.permute.xlu1 %2679  ;;  %v5985_v15 = vld [vmem:[%s10339_s5 + $0x440] sm:$0xff] }
 0x1c8   : > { %v8569_v50 = vpop.permute.xlu0 %2433  ;;  %v1867_v9 = vmax.f32 %v1773_v19, 0.0  ;;  %v2925_v0 = vsel %vm1577_vm6, %v2909_v1, %v2680_v8  ;;  %v6500_v19 = vpack.c.bf16 %v5988_v41, %v5986_v10  ;;  %v6002_v10 = vld [vmem:[%s10339_s5 + $0x4c8] sm:$0xff] }
 0x1c9   : > { %v1868_v26 = vmax.f32 %v1775_v51, 0.0  ;;  %2757 = vrot.lane.b32.xlu1 %v5933_v61, %s10380_s21  ;;  %v5987_v61 = vld [vmem:[%s10339_s5 + $0x450] sm:$0xff]  ;;  %v5934_v51 = vld [vmem:[%s7115_s12 + $0x1e6] sm:$0xff] }
 0x1ca   : > { %2511 = vrot.lane.b32.xlu0 %v5876_v7, %s10381_s23  ;;  %v5990_v7 = vld [vmem:[%s10339_s5 + $0x468] sm:$0xff]  ;;  %v6502_v8 = vpack.c.bf16 %v5987_v61, %v5985_v15  ;;  %v6004_v61 = vld [vmem:[%s10339_s5 + $0x4d8] sm:$0xff] }
 0x1cb   : > { %2060 = vmatprep.mubr.f32.mxu1 %v1868_v26  ;;  %v2744_v42 = vpop.permute.xlu1 %2743 }
 0x1cc   : > { %v8590_v52 = vpop.permute.xlu0 %2497  ;;  %2061 = vmatmul.mubr.f32.vlgmr.msra.gmra.mrb[0].mxu1 %v1867_v9  ;;  %v1778_v62 = vpop.f32.mrb[34].mxu0  ;;  %v2941_v58 = vsel %vm1594_vm7, %v2925_v0, %v2744_v42  ;;  %v2846_v9 = vsel %vm327_vm1, %v8230_v57, %v8556_v23  ;;  %v5996_v57 = vld [vmem:[%s10339_s5 + $0x498] sm:$0xff]  ;;  %v5993_v0 = vld [vmem:[%s10339_s5 + $0x480] sm:$0xff] }
 0x1cd   : > { %2813 = vrot.lane.b32.xlu1 %v5944_v29, %s10382_s0  ;;  %v1779_v54 = vadd.f32 %v1778_v62, %v8553_v59  ;;  %v1780_v36 = vpop.f32.mrb[35].mxu0  ;;  %6495 = vmatpush1.bf16.msra.mxu1 %v6494_v17  ;;  %v5992_v29 = vld [vmem:[%s10339_s5 + $0x478] sm:$0xff]  ;;  %v2862_v30 = vsel %vm1509_vm2, %v2846_v9, %v8569_v50  ;;  %v6506_v17 = vpack.c.bf16 %v5991_v45, %v5989_v39  ;;  %v5830_v39 = vld [vmem:[%s7115_s12 + $0x82] sm:$0xff]  ;;  %v5935_v9 = vld [vmem:[%s7115_s12 + $0x1ee] sm:$0xff] }
 0x1ce   : > { %2575 = vrot.lane.b32.xlu0 %v5892_v18, %s10383_s17  ;;  %v1781_v5 = vadd.f32 %v1780_v36, %v8559_v32  ;;  %6497 = vmatprep.subr.bf16.mxu1 %v6496_v38  ;;  %v6504_v18 = vpack.c.bf16 %v5992_v29, %v5990_v7  ;;  %v2878_v23 = vsel %vm1526_vm3, %v2862_v30, %v8590_v52  ;;  %v5878_v30 = vld [vmem:[%s7115_s12 + $0x182] sm:$0xff] }
 0x1cf   : > { %v2800_v46 = vpop.permute.xlu1 %2799  ;;  %v1869_v12 = vmax.f32 %v1779_v54, 0.0  ;;  %v6508_v3 = vpack.c.bf16 %v5996_v57, %v5994_v37  ;;  %v5995_v54 = vld [vmem:[%s10339_s5 + $0x490] sm:$0xff]  ;;  %v6516_v29 = vpack.c.bf16 %v6004_v61, %v6002_v10  ;;  %v6005_v57 = vld [vmem:[%s10339_s5 + $0x4e0] sm:$0xff] }
 0x1d0   : > { %v2562_v20 = vpop.permute.xlu0 %2561  ;;  %v2957_v2 = vsel %vm1611_vm8, %v2941_v58, %v2800_v46  ;;  %v1870_v56 = vmax.f32 %v1781_v5, 0.0  ;;  %v5903_v5 = vld [vmem:[%s7115_s12 + $0x172] sm:$0xff]  ;;  %v8689_v46 = vld [vmem:[%s7115_s12 + $0x106] sm:$0xff]  ;;  %v6510_v38 = vpack.c.bf16 %v5995_v54, %v5993_v0 }
 0x1d1   : > { %2631 = vrot.lane.b32.xlu1 %v5877_v43, %s10379_s18  ;;  %5963 = vmatmul.mubr.msk.f32.gmra.mrb[68].mxu0 %vm1651_vm9, %v2957_v2  ;;  %v2894_v36 = vsel %vm1543_vm4, %v2878_v23, %v2562_v20  ;;  %v6000_v20 = vld [vmem:[%s10339_s5 + $0x4b8] sm:$0xff]  ;;  %v6007_v23 = vld [vmem:[%s10339_s5 + $0x4f0] sm:$0xff]  ;;  %v8756_v0 = vld [vmem:[%s7115_s12 + $0x186] sm:$0xff] }
 0x1d2   : > { %2385 = vrot.lane.b32.xlu0 %v5853_v6, %s10387_s29  ;;  %2066 = vmatprep.mubr.f32.mxu1 %v1870_v56  ;;  %v5998_v6 = vld [vmem:[%s10339_s5 + $0x4a8] sm:$0xff]  ;;  %v6522_v54 = vpack.c.bf16 %v6007_v23, %v6005_v57  ;;  %v6015_v61 = vld [vmem:[%s10339_s5 + $0x530] sm:$0xff] }
 0x1d3   : > { %v2618_v49 = vpop.permute.xlu1 %2617  ;;  %3131 = vmatprep.mubr.f32.mxu0 %v10386_v47  ;;  %2067 = vmatmul.mubr.f32.gmra.mrb[2].mxu1 %v1869_v12  ;;  %v6512_v56 = vpack.c.bf16 %v6000_v20, %v5998_v6  ;;  %v5999_v12 = vld [vmem:[%s10339_s5 + $0x4b0] sm:$0xff]  ;;  %v6014_v20 = vld [vmem:[%s10339_s5 + $0x528] sm:$0xff] }
 0x1d4   : > { %v8626_v31 = vpop.permute.xlu0 %2371  ;;  %6499 = vmatpush1.bf16.msra.mxu1 %v6498_v53  ;;  %v2910_v52 = vsel %vm1560_vm5, %v2894_v36, %v2618_v49  ;;  %v6010_v36 = vld [vmem:[%s10339_s5 + $0x508] sm:$0xff] }
 0x1d5   : > { %2695 = vrot.lane.b32.xlu1 %v5918_v25, %s10378_s22  ;;  %6501 = vmatprep.subr.bf16.mxu1 %v6500_v19  ;;  %v5997_v25 = vld [vmem:[%s10339_s5 + $0x4a0] sm:$0xff]  ;;  %v8713_v19 = vld [vmem:[%s7115_s12 + $0x10a] sm:$0xff] }
 0x1d6   : > { %2449 = vrot.lane.b32.xlu0 %v5863_v27, %s10388_s9  ;;  %v6514_v15 = vpack.c.bf16 %v5999_v12, %v5997_v25  ;;  %v5879_v25 = vld [vmem:[%s7115_s12 + $0x18a] sm:$0xff] }
 0x1d7   : > { %v2682_v60 = vpop.permute.xlu1 %2681  ;;  %v8790_v12 = vld [vmem:[%s7115_s12 + $0x10e] sm:$0xff] }
 0x1d8   : > { %v8644_v26 = vpop.permute.xlu0 %2435  ;;  %6503 = vmatpush1.bf16.msra.mxu1 %v6502_v8  ;;  %v2926_v44 = vsel %vm1577_vm6, %v2910_v52, %v2682_v60  ;;  %v6001_v60 = vld [vmem:[%s10339_s5 + $0x4c0] sm:$0xff]  ;;  %v6022_v23 = vld [vmem:[%s10339_s5 + $0x568] sm:$0xff] }
 0x1d9   : > { %v1784_v34 = vpop.f32.mrb[36].mxu0  ;;  %2759 = vrot.lane.b32.xlu1 %v5934_v51, %s10380_s21  ;;  %6505 = vmatprep.subr.bf16.mxu1 %v6504_v18  ;;  %v6003_v18 = vld [vmem:[%s10339_s5 + $0x4d0] sm:$0xff] }
 0x1da   : > { %2513 = vrot.lane.b32.xlu0 %v5877_v43, %s10381_s23  ;;  %v1785_v48 = vadd.f32 %v1784_v34, %v8553_v59  ;;  %v1786_v42 = vpop.f32.mrb[37].mxu0 }
 0x1db   : > { %v1787_v50 = vadd.f32 %v1786_v42, %v8559_v32  ;;  %v2746_v1 = vpop.permute.xlu1 %2745  ;;  %v6006_v42 = vld [vmem:[%s10339_s5 + $0x4e8] sm:$0xff] }
 0x1dc   : > { %v8671_v62 = vpop.permute.xlu0 %2499  ;;  %v1871_v58 = vmax.f32 %v1785_v48, 0.0  ;;  %6507 = vmatpush1.bf16.msra.mxu1 %v6506_v17  ;;  %v2942_v40 = vsel %vm1594_vm7, %v2926_v44, %v2746_v1  ;;  %v6518_v48 = vpack.c.bf16 %v6003_v18, %v6001_v60  ;;  %v5945_v1 = vld [vmem:[%s7115_s12 + $0x1f2] sm:$0xff]  ;;  %v6009_v44 = vld [vmem:[%s10339_s5 + $0x500] sm:$0xff]  ;;  %v6018_v60 = vld [vmem:[%s10339_s5 + $0x548] sm:$0xff] }
 0x1dd   : > { %v1872_v43 = vmax.f32 %v1787_v50, 0.0  ;;  %2815 = vrot.lane.b32.xlu1 %v5919_v35, %s10382_s0  ;;  %6509 = vmatprep.subr.bf16.mxu1 %v6508_v3  ;;  %v2847_v50 = vsel %vm327_vm1, %v5830_v39, %v8626_v31  ;;  %v6012_v31 = vld [vmem:[%s10339_s5 + $0x518] sm:$0xff]  ;;  %v5920_v39 = vld [vmem:[%s7115_s12 + $0x202] sm:$0xff] }
 0x1de   : > { %2577 = vrot.lane.b32.xlu0 %v5893_v22, %s10383_s17  ;;  %v6008_v22 = vld [vmem:[%s10339_s5 + $0x4f8] sm:$0xff]  ;;  %v2863_v3 = vsel %vm1509_vm2, %v2847_v50, %v8644_v26  ;;  %v6524_v26 = vpack.c.bf16 %v6012_v31, %v6010_v36  ;;  %v6021_v36 = vld [vmem:[%s10339_s5 + $0x560] sm:$0xff]  ;;  %v6023_v31 = vld [vmem:[%s10339_s5 + $0x570] sm:$0xff] }
 0x1df   : > { %2072 = vmatprep.mubr.f32.mxu1 %v1872_v43  ;;  %v2802_v4 = vpop.permute.xlu1 %2801  ;;  %v6520_v37 = vpack.c.bf16 %v6008_v22, %v6006_v42  ;;  %v2879_v52 = vsel %vm1526_vm3, %v2863_v3, %v8671_v62  ;;  %v6017_v22 = vld [vmem:[%s10339_s5 + $0x540] sm:$0xff]  ;;  %v6024_v50 = vld [vmem:[%s10339_s5 + $0x578] sm:$0xff] }
 0x1e0   : > { %v8695_v2 = vpop.permute.xlu0 %2563  ;;  %v2958_v27 = vsel %vm1611_vm8, %v2942_v40, %v2802_v4  ;;  %2073 = vmatmul.mubr.f32.gmra.mrb[4].mxu1 %v1871_v58  ;;  %v1790_v53 = vpop.f32.mrb[38].mxu0  ;;  %v6011_v58 = vld [vmem:[%s10339_s5 + $0x510] sm:$0xff]  ;;  %v6016_v40 = vld [vmem:[%s10339_s5 + $0x538] sm:$0xff] }
 0x1e1   : > { %2633 = vrot.lane.b32.xlu1 %v5903_v5, %s10379_s18  ;;  %v1791_v41 = vadd.f32 %v1790_v53, %v8553_v59  ;;  %v1792_v49 = vpop.f32.mrb[39].mxu0  ;;  %5964 = vmatmul.mubr.msk.f32.gmra.mrb[70].mxu0 %vm1651_vm9, %v2958_v27  ;;  %v2895_v5 = vsel %vm1543_vm4, %v2879_v52, %v8695_v2  ;;  %v6526_v27 = vpack.c.bf16 %v6011_v58, %v6009_v44 }
 0x1e2   : > { %2387 = vrot.lane.b32.xlu0 %v8689_v46, %s10387_s29  ;;  %6511 = vmatpush1.bf16.msra.mxu1 %v6510_v38  ;;  %v1793_v7 = vadd.f32 %v1792_v49, %v8559_v32 }
 0x1e3   : > { %v2620_v51 = vpop.permute.xlu1 %2619  ;;  %3137 = vmatprep.mubr.f32.mxu0 %v10386_v47  ;;  %6513 = vmatprep.subr.bf16.mxu1 %v6512_v56  ;;  %v1873_v34 = vmax.f32 %v1791_v41, 0.0 }
 0x1e4   : > { %v8719_v8 = vpop.permute.xlu0 %2373  ;;  %v1874_v45 = vmax.f32 %v1793_v7, 0.0  ;;  %v2911_v62 = vsel %vm1560_vm5, %v2895_v5, %v2620_v51  ;;  %v6528_v51 = vpack.c.bf16 %v6016_v40, %v6014_v20 }
 0x1e5   : > { %2697 = vrot.lane.b32.xlu1 %v5919_v35, %s10378_s22  ;;  %v2848_v52 = vsel %vm327_vm1, %v8348_v63, %v8719_v8  ;;  %v6026_v63 = vld [vmem:[%s10339_s5 + $0x588] sm:$0xff]  ;;  %v6028_v8 = vld [vmem:[%s10339_s5 + $0x598] sm:$0xff] }
 0x1e6   : > { %2451 = vrot.lane.b32.xlu0 %v8713_v19, %s10388_s9  ;;  %6515 = vmatpush1.bf16.msra.mxu1 %v6514_v15  ;;  %v6013_v15 = vld [vmem:[%s10339_s5 + $0x520] sm:$0xff] }
 0x1e7   : > { %2078 = vmatprep.mubr.f32.mxu1 %v1874_v45  ;;  %v2684_v35 = vpop.permute.xlu1 %2683  ;;  %6517 = vmatprep.subr.bf16.mxu1 %v6516_v29  ;;  %v5864_v45 = vld [vmem:[%s7115_s12 + $0x112] sm:$0xff] }
 0x1e8   : > { %v8740_v17 = vpop.permute.xlu0 %2437  ;;  %2079 = vmatmul.mubr.f32.gmra.mrb[6].mxu1 %v1873_v34  ;;  %v2927_v4 = vsel %vm1577_vm6, %v2911_v62, %v2684_v35  ;;  %v6020_v34 = vld [vmem:[%s10339_s5 + $0x558] sm:$0xff]  ;;  %v6019_v35 = vld [vmem:[%s10339_s5 + $0x550] sm:$0xff] }
 0x1e9   : > { %2761 = vrot.lane.b32.xlu1 %v5935_v9, %s10380_s21  ;;  %v6530_v9 = vpack.c.bf16 %v6015_v61, %v6013_v15  ;;  %v6532_v42 = vpack.c.bf16 %v6020_v34, %v6018_v60  ;;  %v6534_v57 = vpack.c.bf16 %v6019_v35, %v6017_v22  ;;  %v2864_v44 = vsel %vm1509_vm2, %v2848_v52, %v8740_v17  ;;  %v8849_v62 = vld [vmem:[%s7115_s12 + $0x18e] sm:$0xff]  ;;  %v6036_v35 = vld [vmem:[%s10339_s5 + $0x5d8] sm:$0xff] }
 0x1ea   : > { %2515 = vrot.lane.b32.xlu0 %v5878_v30, %s10381_s23  ;;  %6519 = vmatpush1.bf16.msra.mxu1 %v6518_v48 }
 0x1eb   : > { %v2748_v43 = vpop.permute.xlu1 %2747  ;;  %6521 = vmatprep.subr.bf16.mxu1 %v6520_v37  ;;  %v5936_v37 = vld [vmem:[%s7115_s12 + $0x206] sm:$0xff] }
 0x1ec   : > { %v8766_v6 = vpop.permute.xlu0 %2501  ;;  %v1796_v38 = vpop.f32.mrb[40].mxu0  ;;  %v2943_v53 = vsel %vm1594_vm7, %v2927_v4, %v2748_v43 }
 0x1ed   : > { %2817 = vrot.lane.b32.xlu1 %v5945_v1, %s10382_s0  ;;  %v1797_v2 = vadd.f32 %v1796_v38, %v8553_v59  ;;  %v1798_v56 = vpop.f32.mrb[41].mxu0  ;;  %v6538_v38 = vpack.c.bf16 %v6023_v31, %v6021_v36  ;;  %v2880_v20 = vsel %vm1526_vm3, %v2864_v44, %v8766_v6  ;;  %v5937_v31 = vld [vmem:[%s7115_s12 + $0x20e] sm:$0xff]  ;;  %v5880_v44 = vld [vmem:[%s7115_s12 + $0x1a2] sm:$0xff] }
 0x1ee   : > { %2579 = vrot.lane.b32.xlu0 %v8756_v0, %s10383_s17  ;;  %6523 = vmatpush1.bf16.msra.mxu1 %v6522_v54  ;;  %v1799_v10 = vadd.f32 %v1798_v56, %v8559_v32  ;;  %v6536_v54 = vpack.c.bf16 %v6024_v50, %v6022_v23  ;;  %v6025_v56 = vld [vmem:[%s10339_s5 + $0x580] sm:$0xff] }
 0x1ef   : > { %v2804_v41 = vpop.permute.xlu1 %2803  ;;  %6525 = vmatprep.subr.bf16.mxu1 %v6524_v26  ;;  %v1875_v18 = vmax.f32 %v1797_v2, 0.0  ;;  %v5921_v26 = vld [vmem:[%s7115_s12 + $0x20a] sm:$0xff]  ;;  %v6540_v2 = vpack.c.bf16 %v6028_v8, %v6026_v63  ;;  %v6033_v50 = vld [vmem:[%s10339_s5 + $0x5c0] sm:$0xff] }
 0x1f0   : > { %v2566_v49 = vpop.permute.xlu0 %2565  ;;  %v2959_v7 = vsel %vm1611_vm8, %v2943_v53, %v2804_v41  ;;  %v1876_v29 = vmax.f32 %v1799_v10, 0.0  ;;  %v6030_v10 = vld [vmem:[%s10339_s5 + $0x5a8] sm:$0xff]  ;;  %v6032_v41 = vld [vmem:[%s10339_s5 + $0x5b8] sm:$0xff] }
 0x1f1   : > { %2635 = vrot.lane.b32.xlu1 %v5879_v25, %s10379_s18  ;;  %5965 = vmatmul.mubr.msk.f32.gmra.mrb[72].mxu0 %vm1651_vm9, %v2959_v7  ;;  %v5856_v7 = vld [vmem:[%s7115_s12 + $0x126] sm:$0xff] }
 0x1f2   : > { %2389 = vrot.lane.b32.xlu0 %v8790_v12, %s10387_s29  ;;  %6527 = vmatpush1.bf16.msra.mxu1 %v6526_v27  ;;  %v2896_v27 = vsel %vm1543_vm4, %v2880_v20, %v2566_v49  ;;  %v5904_v49 = vld [vmem:[%s7115_s12 + $0x192] sm:$0xff] }
 0x1f3   : > { %2084 = vmatprep.mubr.f32.mxu1 %v1876_v29  ;;  %v2622_v30 = vpop.permute.xlu1 %2621  ;;  %3143 = vmatprep.mubr.f32.mxu0 %v10386_v47 }
 0x1f4   : > { %v8813_v48 = vpop.permute.xlu0 %2375  ;;  %2085 = vmatmul.mubr.f32.gmra.mrb[8].mxu1 %v1875_v18  ;;  %6529 = vmatprep.subr.bf16.mxu1 %v6528_v51  ;;  %v2912_v6 = vsel %vm1560_vm5, %v2896_v27, %v2622_v30  ;;  %v6034_v30 = vld [vmem:[%s10339_s5 + $0x5c8] sm:$0xff] }
 0x1f5   : > { %2699 = vrot.lane.b32.xlu1 %v5920_v39, %s10378_s22  ;;  %v6544_v39 = vpack.c.bf16 %v6032_v41, %v6030_v10  ;;  %v6548_v23 = vpack.c.bf16 %v6036_v35, %v6034_v30  ;;  %v5938_v30 = vld [vmem:[%s7115_s12 + $0x226] sm:$0xff] }
 0x1f6   : > { %2453 = vrot.lane.b32.xlu0 %v5864_v45, %s10388_s9  ;;  %6531 = vmatpush1.bf16.msra.mxu1 %v6530_v9  ;;  %v6029_v45 = vld [vmem:[%s10339_s5 + $0x5a0] sm:$0xff]  ;;  %v6031_v9 = vld [vmem:[%s10339_s5 + $0x5b0] sm:$0xff] }
 0x1f7   : > { %v2686_v1 = vpop.permute.xlu1 %2685  ;;  %6533 = vmatprep.subr.bf16.mxu1 %v6532_v42  ;;  %v8897_v42 = vld [vmem:[%s7115_s12 + $0x12a] sm:$0xff]  ;;  %v6546_v22 = vpack.c.bf16 %v6031_v9, %v6029_v45 }
 0x1f8   : > { %v8831_v3 = vpop.permute.xlu0 %2439  ;;  %v1802_v43 = vpop.f32.mrb[42].mxu0  ;;  %v2928_v15 = vsel %vm1577_vm6, %v2912_v6, %v2686_v1  ;;  %v6035_v1 = vld [vmem:[%s10339_s5 + $0x5d0] sm:$0xff] }
 0x1f9   : > { %2763 = vrot.lane.b32.xlu1 %v5936_v37, %s10380_s21  ;;  %v1803_v58 = vadd.f32 %v1802_v43, %v8553_v59  ;;  %v1804_v5 = vpop.f32.mrb[43].mxu0  ;;  %v5946_v6 = vld [vmem:[%s7115_s12 + $0x212] sm:$0xff] }
 0x1fa   : > { %2517 = vrot.lane.b32.xlu0 %v5879_v25, %s10381_s23  ;;  %6535 = vmatpush1.bf16.msra.mxu1 %v6534_v57  ;;  %v1805_v17 = vadd.f32 %v1804_v5, %v8559_v32  ;;  %v6027_v25 = vld [vmem:[%s10339_s5 + $0x590] sm:$0xff]  ;;  %v6038_v5 = vld [vmem:[%s10339_s5 + $0x5e8] sm:$0xff] }
 0x1fb   : > { %v2750_v40 = vpop.permute.xlu1 %2749  ;;  %6537 = vmatprep.subr.bf16.mxu1 %v6536_v54  ;;  %v1877_v61 = vmax.f32 %v1803_v58, 0.0  ;;  %v6542_v51 = vpack.c.bf16 %v6027_v25, %v6025_v56  ;;  %v5832_v54 = vld [vmem:[%s7115_s12 + $0xa2] sm:$0xff]  ;;  %v6550_v58 = vpack.c.bf16 %v6035_v1, %v6033_v50  ;;  %v5923_v50 = vld [vmem:[%s7115_s12 + $0x22a] sm:$0xff] }
 0x1fc   : > { %v8860_v4 = vpop.permute.xlu0 %2503  ;;  %v1878_v53 = vmax.f32 %v1805_v17, 0.0  ;;  %v2944_v29 = vsel %vm1594_vm7, %v2928_v15, %v2750_v40  ;;  %v6037_v17 = vld [vmem:[%s10339_s5 + $0x5e0] sm:$0xff]  ;;  %v6039_v40 = vld [vmem:[%s10339_s5 + $0x5f0] sm:$0xff] }
 0x1fd   : > { %2819 = vrot.lane.b32.xlu1 %v5921_v26, %s10382_s0 }
 0x1fe   : > { %2581 = vrot.lane.b32.xlu0 %v8849_v62, %s10383_s17  ;;  %6539 = vmatpush1.bf16.msra.mxu1 %v6538_v38  ;;  %v6040_v38 = vld [vmem:[%s10339_s5 + $0x5f8] sm:$0xff] }
 0x1ff   : > { %2090 = vmatprep.mubr.f32.mxu1 %v1878_v53  ;;  %v2806_v60 = vpop.permute.xlu1 %2805  ;;  %6541 = vmatprep.subr.bf16.mxu1 %v6540_v2  ;;  %v6552_v20 = vpack.c.bf16 %v6040_v38, %v6038_v5  ;;  %v2849_v2 = vsel %vm327_vm1, %v5832_v54, %v8813_v48  ;;  %v6554_v53 = vpack.c.bf16 %v6039_v40, %v6037_v17  ;;  %v5834_v40 = vld [vmem:[%s7115_s12 + $0xc2] sm:$0xff] }
 0x200   : > { %v2568_v18 = vpop.permute.xlu0 %2567  ;;  %v2960_v34 = vsel %vm1611_vm8, %v2944_v29, %v2806_v60  ;;  %2091 = vmatmul.mubr.f32.gmra.mrb[10].mxu1 %v1877_v61  ;;  %v2865_v25 = vsel %vm1509_vm2, %v2849_v2, %v8831_v3  ;;  %v6042_v2 = vld [vmem:[%s7115_s12 + $0xc0] sm:$0xff] }
 0x201   : > { %2637 = vrot.lane.b32.xlu1 %v5904_v49, %s10379_s18  ;;  %5966 = vmatmul.mubr.msk.f32.gmra.mrb[74].mxu0 %vm1651_vm9, %v2960_v34  ;;  %v2881_v10 = vsel %vm1526_vm3, %v2865_v25, %v8860_v4  ;;  %v6143_v25 = vld [vmem:[%s10336_s2 + $0xb8] sm:$0xff] }
 0x202   : > { %2391 = vrot.lane.b32.xlu0 %v5856_v7, %s10387_s29  ;;  %6543 = vmatpush1.bf16.msra.mxu1 %v6542_v51  ;;  %v2897_v48 = vsel %vm1543_vm4, %v2881_v10, %v2568_v18  ;;  %v5922_v18 = vld [vmem:[%s7115_s12 + $0x222] sm:$0xff] }
 0x203   : > { %v2624_v37 = vpop.permute.xlu1 %2623  ;;  %3149 = vmatprep.mubr.f32.mxu0 %v10386_v47  ;;  %6545 = vmatprep.subr.bf16.mxu1 %v6544_v39 }
 0x204   : > { %v8902_v57 = vpop.permute.xlu0 %2377  ;;  %v1808_v36 = vpop.f32.mrb[44].mxu0  ;;  %v2913_v61 = vsel %vm1560_vm5, %v2897_v48, %v2624_v37 }
 0x205   : > { %2701 = vrot.lane.b32.xlu1 %v5921_v26, %s10378_s22  ;;  %v1809_v52 = vadd.f32 %v1808_v36, %v8553_v59  ;;  %v1810_v43 = vpop.f32.mrb[45].mxu0  ;;  %v2850_v37 = vsel %vm327_vm1, %v8417_v28, %v8902_v57 }
 0x206   : > { %2455 = vrot.lane.b32.xlu0 %v8897_v42, %s10388_s9  ;;  %6547 = vmatpush1.bf16.msra.mxu1 %v6546_v22  ;;  %v1811_v26 = vadd.f32 %v1810_v43, %v8559_v32  ;;  %v3582_v43 = vld [vmem:[%s7115_s12 + $0x6] sm:$0xff] }
 0x207   : > { %v2688_v63 = vpop.permute.xlu1 %2687  ;;  %6549 = vmatprep.subr.bf16.mxu1 %v6548_v23  ;;  %v1879_v27 = vmax.f32 %v1809_v52, 0.0 }
 0x208   : > { %v2442_v8 = vpop.permute.xlu0 %2441  ;;  %v1880_v56 = vmax.f32 %v1811_v26, 0.0  ;;  %v2929_v3 = vsel %vm1577_vm6, %v2913_v61, %v2688_v63 }
 0x209   : > { %2765 = vrot.lane.b32.xlu1 %v5937_v31, %s10380_s21  ;;  %v2866_v23 = vsel %vm1509_vm2, %v2850_v37, %v2442_v8  ;;  %v3598_v8 = vld [vmem:[%s7115_s12 + $0xc] sm:$0xff] }
 0x20a   : > { %2519 = vrot.lane.b32.xlu0 %v5880_v44, %s10381_s23  ;;  %6551 = vmatpush1.bf16.msra.mxu1 %v6550_v58 }
 0x20b   : > { %2096 = vmatprep.mubr.f32.mxu1 %v1880_v56  ;;  %v2752_v41 = vpop.permute.xlu1 %2751  ;;  %6553 = vmatprep.subr.bf16.mxu1 %v6552_v20  ;;  %v6141_v56 = vld [vmem:[%s10336_s2 + $0xa8] sm:$0xff] }
 0x20c   : > { %v2506_v15 = vpop.permute.xlu0 %2505  ;;  %2097 = vmatmul.mubr.f32.gmra.mrb[12].mxu1 %v1879_v27  ;;  %v2945_v4 = vsel %vm1594_vm7, %v2929_v3, %v2752_v41  ;;  %v6140_v27 = vld [vmem:[%s10336_s2 + $0xa0] sm:$0xff]  ;;  %v6556_v10 = vpack.c.bf16 %v6143_v25, %v6141_v56  ;;  %v6142_v41 = vld [vmem:[%s10336_s2 + $0xb0] sm:$0xff] }
 0x20d   : > { %2821 = vrot.lane.b32.xlu1 %v5946_v6, %s10382_s0  ;;  %v6058_v3 = vld [vmem:[%s7115_s12 + $0xc6] sm:$0xff] }
 0x20e   : > { %2583 = vrot.lane.b32.xlu0 %v8456_v24, %s10383_s17  ;;  %6555 = vmatpush1.bf16.msra.mxu1 %v6554_v53 }
 0x20f   : > { %v2808_v49 = vpop.permute.xlu1 %2807  ;;  %6557 = vmatprep.subr.bf16.mxu0 %v6556_v10 }
 0x210   : > { %v2570_v7 = vpop.permute.xlu0 %2569  ;;  %v2961_v51 = vsel %vm1611_vm8, %v2945_v4, %v2808_v49  ;;  %v1814_v29 = vpop.f32.mrb[46].mxu0  ;;  %v5947_v4 = vld [vmem:[%s7115_s12 + $0x232] sm:$0xff] }
 0x211   : > { %2639 = vrot.lane.b32.xlu1 %v8467_v13, %s10379_s18  ;;  %v1815_v60 = vadd.f32 %v1814_v29, %v8553_v59  ;;  %v1816_v24 = vpop.f32.mrb[47].mxu0  ;;  %5967 = vmatmul.mubr.msk.f32.gmra.mrb[76].mxu0 %vm1651_vm9, %v2961_v51  ;;  %v6145_v29 = vld [vmem:[%s10336_s2 + $0xc8] sm:$0xff] }
 0x212   : > { %2393 = vrot.lane.b32.xlu0 %v8470_v55, %s10387_s29  ;;  %v1817_v39 = vadd.f32 %v1816_v24, %v8559_v32  ;;  %3155 = vmatprep.mubr.f32.mxu0 %v10386_v47  ;;  %v6144_v24 = vld [vmem:[%s10336_s2 + $0xc0] sm:$0xff] }
 0x213   : > { %v2626_v45 = vpop.permute.xlu1 %2625  ;;  %v1881_v55 = vmax.f32 %v1815_v60, 0.0  ;;  %v6147_v60 = vld [vmem:[%s10336_s2 + $0xd8] sm:$0xff] }
 0x214   : > { %v2380_v9 = vpop.permute.xlu0 %2379  ;;  %v1882_v34 = vmax.f32 %v1817_v39, 0.0 }
 0x215   : > { %2703 = vrot.lane.b32.xlu1 %v5922_v18, %s10378_s22  ;;  %v2851_v48 = vsel %vm327_vm1, %v5834_v40, %v2380_v9  ;;  %v6883_v40 = vld [vmem:[%s7115_s12 + $0xca] sm:$0xff] }
 0x216   : > { %2457 = vrot.lane.b32.xlu0 %v8481_v11, %s10388_s9  ;;  %2102 = vmatprep.mubr.f32.mxu1 %v1882_v34  ;;  %v2882_v11 = vsel %vm1526_vm3, %v2866_v23, %v2506_v15  ;;  %v6558_v15 = vpack.c.bf16 %v6142_v41, %v6140_v27  ;;  %v6560_v34 = vpack.c.bf16 %v6147_v60, %v6145_v29  ;;  %v6124_v27 = vld [vmem:[%s7115_s12 + $0x18c] sm:$0xff] }
 0x217   : > { %v2690_v22 = vpop.permute.xlu1 %2689  ;;  %2103 = vmatmul.mubr.f32.gmra.mrb[14].mxu1 %v1881_v55  ;;  %v2898_v36 = vsel %vm1543_vm4, %v2882_v11, %v2570_v7  ;;  %v6146_v55 = vld [vmem:[%s10336_s2 + $0xd0] sm:$0xff] }
 0x218   : > { %v2444_v35 = vpop.permute.xlu0 %2443  ;;  %v2914_v31 = vsel %vm1560_vm5, %v2898_v36, %v2626_v45  ;;  %6559 = vmatpush1.bf16.msra.mxu0 %v6558_v15  ;;  %v6074_v11 = vld [vmem:[%s7115_s12 + $0xcc] sm:$0xff] }
 0x219   : > { %2767 = vrot.lane.b32.xlu1 %v5938_v30, %s10380_s21  ;;  %v2930_v28 = vsel %vm1577_vm6, %v2914_v31, %v2690_v22  ;;  %v2867_v49 = vsel %vm1509_vm2, %v2851_v48, %v2444_v35  ;;  %v6562_v22 = vpack.c.bf16 %v6146_v55, %v6144_v24  ;;  %6561 = vmatprep.subr.bf16.mxu0 %v6560_v34  ;;  %v6075_v48 = vld [vmem:[%s7115_s12 + $0xd4] sm:$0xff]  ;;  %v6093_v24 = vld [vmem:[%s7115_s12 + $0x188] sm:$0xff] }
 0x21a   : > { %2521 = vrot.lane.b32.xlu0 %v8467_v13, %s10381_s23  ;;  %v5836_v55 = vld [vmem:[%s7115_s12 + $0xe2] sm:$0xff] }
 0x21b   : > { %v2754_v1 = vpop.permute.xlu1 %2753 }
 0x21c   : > { %v2508_v54 = vpop.permute.xlu0 %2507  ;;  %v1820_v52 = vpop.f32.mrb[48].mxu0  ;;  %v2946_v44 = vsel %vm1594_vm7, %v2930_v28, %v2754_v1  ;;  %v3583_v1 = vld [vmem:[%s7115_s12 + $0xe] sm:$0xff]  ;;  %6563 = vmatpush1.bf16.msra.mxu0 %v6562_v22  ;;  %v6044_v22 = vld [vmem:[%s7115_s12 + $0xe0] sm:$0xff] }
 0x21d   : > { %2823 = vrot.lane.b32.xlu1 %v5923_v50, %s10382_s0  ;;  %v1821_v13 = vadd.f32 %v1820_v52, %v8553_v59  ;;  %v1822_v57 = vpop.f32.mrb[49].mxu0  ;;  %v2883_v18 = vsel %vm1526_vm3, %v2867_v49, %v2508_v54  ;;  %v6149_v52 = vld [vmem:[%s10336_s2 + $0xe8] sm:$0xf] }
 0x21e   : > { %2585 = vrot.lane.b32.xlu0 %v8497_v16, %s10383_s17  ;;  %v1823_v58 = vadd.f32 %v1822_v57, %v8559_v32  ;;  %6151 = vmatprep.subr.msk.mxu0 %vm376_vm0, %v6149_v52  ;;  %v6092_v57 = vld [vmem:[%s7115_s12 + $0x180] sm:$0xff] }
 0x21f   : > { %v2810_v5 = vpop.permute.xlu1 %2809  ;;  %v1883_v16 = vmax.f32 %v1821_v13, 0.0  ;;  %v6148_v13 = vld [vmem:[%s10336_s2 + $0xe0] sm:$0xf] }
 0x220   : > { %v2572_v38 = vpop.permute.xlu0 %2571  ;;  %v2962_v26 = vsel %vm1611_vm8, %v2946_v44, %v2810_v5  ;;  %v1884_v63 = vmax.f32 %v1823_v58, 0.0  ;;  %6152 = vmatpush1.msk.msra.mxu0 %vm376_vm0, %v6148_v13  ;;  %v6885_v13 = vld [vmem:[%s7115_s12 + $0xe6] sm:$0xff] }
 0x221   : > { %3729 = vrot.lane.b32.xlu1 %v3582_v43, %s10387_s29  ;;  %5968 = vmatmul.mubr.msk.f32.gmra.mrb[78].mxu0 %vm1651_vm9, %v2962_v26  ;;  %v2899_v30 = vsel %vm1543_vm4, %v2883_v18, %v2572_v38  ;;  %v3599_v43 = vld [vmem:[%s7115_s12 + $0x14] sm:$0xff]  ;;  %v3600_v18 = vld [vmem:[%s7115_s12 + $0x2c] sm:$0xff] }
 0x222   : > { %2641 = vrot.lane.b32.xlu0 %v8506_v14, %s10379_s18  ;;  %2108 = vmatprep.mubr.f32.mxu1 %v1884_v63  ;;  %v5939_v14 = vld [vmem:[%s7115_s12 + $0x22e] sm:$0xff] }
 0x223   : > { %v2628_v20 = vpop.permute.xlu1 %2627  ;;  %3161 = vmatprep.mubr.f32.mxu0 %v10386_v47  ;;  %2109 = vmatmul.mubr.f32.gmra.mrb[16].mxu1 %v1883_v16  ;;  %v6043_v63 = vld [vmem:[%s7115_s12 + $0xc8] sm:$0xff] }
 0x224   : > { %v8986_v17 = vpop.permute.xlu0 %2381  ;;  %v2915_v35 = vsel %vm1560_vm5, %v2899_v30, %v2628_v20 }
 0x225   : > { %3793 = vrot.lane.b32.xlu1 %v3598_v8, %s10388_s9 }
 0x226   : > { %2705 = vrot.lane.b32.xlu0 %v5923_v50, %s10378_s22 }
 0x227   : > { %v2692_v6 = vpop.permute.xlu1 %2691 }
 0x228   : > { %v9003_v53 = vpop.permute.xlu0 %2445  ;;  %v1826_v61 = vpop.f32.mrb[50].mxu0  ;;  %v2931_v23 = vsel %vm1577_vm6, %v2915_v35, %v2692_v6 }
 0x229   : > { %3857 = vrot.lane.b32.xlu1 %v6042_v2, %s10381_s23  ;;  %v1827_v7 = vadd.f32 %v1826_v61, %v8553_v59  ;;  %v1828_v51 = vpop.f32.mrb[51].mxu0  ;;  %v2852_v2 = vsel %vm327_vm1, %v6883_v40, %v8986_v17  ;;  %v3584_v61 = vld [vmem:[%s7115_s12 + $0x26] sm:$0xff] }
 0x22a   : > { %2769 = vrot.lane.b32.xlu0 %v5939_v14, %s10380_s21  ;;  %v1829_v39 = vadd.f32 %v1828_v51, %v8559_v32  ;;  %v2868_v56 = vsel %vm1509_vm2, %v2852_v2, %v9003_v53  ;;  %v6094_v40 = vld [vmem:[%s7115_s12 + $0x1a0] sm:$0xff]  ;;  %v3601_v2 = vld [vmem:[%s7115_s12 + $0x34] sm:$0xff] }
 0x22b   : > { %v2756_v45 = vpop.permute.xlu1 %2755  ;;  %v1885_v50 = vmax.f32 %v1827_v7, 0.0 }
 0x22c   : > { %v2510_v9 = vpop.permute.xlu0 %2509  ;;  %v1886_v37 = vmax.f32 %v1829_v39, 0.0  ;;  %v2947_v54 = vsel %vm1594_vm7, %v2931_v23, %v2756_v45 }
 0x22d   : > { %3921 = vrot.lane.b32.xlu1 %v6058_v3, %s10383_s17  ;;  %v2884_v6 = vsel %vm1526_vm3, %v2868_v56, %v2510_v9 }
 0x22e   : > { %2825 = vrot.lane.b32.xlu0 %v5947_v4, %s10382_s0  ;;  %2114 = vmatprep.mubr.f32.mxu1 %v1886_v37 }
 0x22f   : > { %v2812_v36 = vpop.permute.xlu1 %2811  ;;  %2115 = vmatmul.mubr.f32.gmra.mrb[18].mxu1 %v1885_v50 }
 0x230   : > { %v2574_v31 = vpop.permute.xlu0 %2573  ;;  %v2963_v28 = vsel %vm1611_vm8, %v2947_v54, %v2812_v36 }
 0x231   : > { %3985 = vrot.lane.b32.xlu1 %v6074_v11, %s10379_s18  ;;  %5969 = vmatmul.mubr.msk.f32.gmra.mrb[80].mxu0 %vm1651_vm9, %v2963_v28  ;;  %v2900_v17 = vsel %vm1543_vm4, %v2884_v6, %v2574_v31  ;;  %v6125_v11 = vld [vmem:[%s7115_s12 + $0x194] sm:$0xff] }
 0x232   : > { %3731 = vrot.lane.b32.xlu0 %v3583_v1, %s10387_s29  ;;  %3167 = vmatprep.mubr.f32.mxu0 %v10386_v47 }
 0x233   : > { %v2630_v44 = vpop.permute.xlu1 %2629 }
 0x234   : > { %v2384_v58 = vpop.permute.xlu0 %2383  ;;  %v1832_v5 = vpop.f32.mrb[52].mxu0  ;;  %v2916_v15 = vsel %vm1560_vm5, %v2900_v17, %v2630_v44  ;;  %v6076_v44 = vld [vmem:[%s7115_s12 + $0xec] sm:$0xff] }
 0x235   : > { %4049 = vrot.lane.b32.xlu1 %v6092_v57, %s10378_s22  ;;  %v1833_v38 = vadd.f32 %v1832_v5, %v8553_v59  ;;  %v1834_v26 = vpop.f32.mrb[53].mxu0  ;;  %v2853_v23 = vsel %vm327_vm1, %v5836_v55, %v2384_v58  ;;  %v3585_v58 = vld [vmem:[%s7115_s12 + $0x2e] sm:$0xff] }
 0x236   : > { %3795 = vrot.lane.b32.xlu0 %v3599_v43, %s10388_s9  ;;  %v1835_v16 = vadd.f32 %v1834_v26, %v8559_v32 }
 0x237   : > { %v2694_v8 = vpop.permute.xlu1 %2693  ;;  %v1887_v25 = vmax.f32 %v1833_v38, 0.0 }
 0x238   : > { %v2448_v20 = vpop.permute.xlu0 %2447  ;;  %v1888_v14 = vmax.f32 %v1835_v16, 0.0  ;;  %v2932_v53 = vsel %vm1577_vm6, %v2916_v15, %v2694_v8 }
 0x239   : > { %4113 = vrot.lane.b32.xlu1 %v8756_v0, %s10380_s21  ;;  %v6884_v0 = vld [vmem:[%s7115_s12 + $0xce] sm:$0xff]  ;;  %v2869_v50 = vsel %vm1509_vm2, %v2853_v23, %v2448_v20 }
 0x23a   : > { %3859 = vrot.lane.b32.xlu0 %v6043_v63, %s10381_s23  ;;  %2120 = vmatprep.mubr.f32.mxu1 %v1888_v14 }
 0x23b   : > { %v2758_v10 = vpop.permute.xlu1 %2757  ;;  %2121 = vmatmul.mubr.f32.gmra.mrb[20].mxu1 %v1887_v25  ;;  %v6110_v25 = vld [vmem:[%s7115_s12 + $0x1a6] sm:$0xff] }
 0x23c   : > { %v2512_v41 = vpop.permute.xlu0 %2511  ;;  %v2948_v3 = vsel %vm1594_vm7, %v2932_v53, %v2758_v10 }
 0x23d   : > { %4177 = vrot.lane.b32.xlu1 %v6124_v27, %s10382_s0  ;;  %v2885_v1 = vsel %vm1526_vm3, %v2869_v50, %v2512_v41  ;;  %v6045_v27 = vld [vmem:[%s7115_s12 + $0xe8] sm:$0xff] }
 0x23e   : > { %3923 = vrot.lane.b32.xlu0 %v6884_v0, %s10383_s17  ;;  %v6886_v41 = vld [vmem:[%s7115_s12 + $0xea] sm:$0xff] }
 0x23f   : > { %v2814_v4 = vpop.permute.xlu1 %2813 }
 0x240   : > { %v2576_v49 = vpop.permute.xlu0 %2575  ;;  %v2964_v7 = vsel %vm1611_vm8, %v2948_v3, %v2814_v4  ;;  %v1838_v51 = vpop.f32.mrb[54].mxu0 }
 0x241   : > { %3987 = vrot.lane.b32.xlu1 %v6075_v48, %s10379_s18  ;;  %v1839_v29 = vadd.f32 %v1838_v51, %v8553_v59  ;;  %v1840_v60 = vpop.f32.mrb[55].mxu0  ;;  %5970 = vmatmul.mubr.msk.f32.gmra.mrb[82].mxu0 %vm1651_vm9, %v2964_v7  ;;  %v2901_v31 = vsel %vm1543_vm4, %v2885_v1, %v2576_v49  ;;  %v5838_v1 = vld [vmem:[%s7115_s12 + $0x102] sm:$0xff] }
 0x242   : > { %3733 = vrot.lane.b32.xlu0 %v3584_v61, %s10387_s29  ;;  %v1841_v39 = vadd.f32 %v1840_v60, %v8559_v32  ;;  %3173 = vmatprep.mubr.f32.mxu0 %v10386_v47  ;;  %v6126_v61 = vld [vmem:[%s7115_s12 + $0x1ac] sm:$0xff] }
 0x243   : > { %v2632_v45 = vpop.permute.xlu1 %2631  ;;  %v1889_v30 = vmax.f32 %v1839_v29, 0.0 }
 0x244   : > { %v2386_v9 = vpop.permute.xlu0 %2385  ;;  %v1890_v34 = vmax.f32 %v1841_v39, 0.0  ;;  %v2917_v52 = vsel %vm1560_vm5, %v2901_v31, %v2632_v45  ;;  %v6077_v45 = vld [vmem:[%s7115_s12 + $0xf4] sm:$0xff] }
 0x245   : > { %4051 = vrot.lane.b32.xlu1 %v6093_v24, %s10378_s22  ;;  %v2854_v17 = vsel %vm327_vm1, %v6886_v41, %v2386_v9  ;;  %v6887_v24 = vld [vmem:[%s7115_s12 + $0xee] sm:$0xff]  ;;  %v3586_v9 = vld [vmem:[%s7115_s12 + $0x46] sm:$0xff] }
 0x246   : > { %3797 = vrot.lane.b32.xlu0 %v3600_v18, %s10388_s9  ;;  %2126 = vmatprep.mubr.f32.mxu1 %v1890_v34  ;;  %v6111_v31 = vld [vmem:[%s7115_s12 + $0x1ae] sm:$0xff] }
 0x247   : > { %v2696_v35 = vpop.permute.xlu1 %2695  ;;  %2127 = vmatmul.mubr.f32.gmra.mrb[22].mxu1 %v1889_v30 }
 0x248   : > { %v2450_v37 = vpop.permute.xlu0 %2449 }
 0x249   : > { %4115 = vrot.lane.b32.xlu1 %v8849_v62, %s10380_s21  ;;  %v2933_v62 = vsel %vm1577_vm6, %v2917_v52, %v2696_v35  ;;  %v2870_v0 = vsel %vm1509_vm2, %v2854_v17, %v2450_v37  ;;  %v6095_v35 = vld [vmem:[%s7115_s12 + $0x1a8] sm:$0xff]  ;;  %v6046_v52 = vld [vmem:[%s7115_s12 + $0x100] sm:$0xff] }
 0x24a   : > { %3861 = vrot.lane.b32.xlu0 %v6044_v22, %s10381_s23  ;;  %v3602_v37 = vld [vmem:[%s7115_s12 + $0x4c] sm:$0xff] }
 0x24b   : > { %v2760_v54 = vpop.permute.xlu1 %2759 }
 0x24c   : > { %v2514_v36 = vpop.permute.xlu0 %2513  ;;  %v1844_v28 = vpop.f32.mrb[56].mxu0  ;;  %v2949_v5 = vsel %vm1594_vm7, %v2933_v62, %v2760_v54 }
 0x24d   : > { %4179 = vrot.lane.b32.xlu1 %v6125_v11, %s10382_s0  ;;  %v1845_v57 = vadd.f32 %v1844_v28, %v8553_v59  ;;  %v1846_v43 = vpop.f32.mrb[57].mxu0  ;;  %v2886_v3 = vsel %vm1526_vm3, %v2870_v0, %v2514_v36 }
 0x24e   : > { %3925 = vrot.lane.b32.xlu0 %v6885_v13, %s10383_s17  ;;  %v1847_v38 = vadd.f32 %v1846_v43, %v8559_v32 }
 0x24f   : > { %v2816_v26 = vpop.permute.xlu1 %2815  ;;  %v1891_v20 = vmax.f32 %v1845_v57, 0.0 }
 0x250   : > { %v2578_v63 = vpop.permute.xlu0 %2577  ;;  %v2965_v16 = vsel %vm1611_vm8, %v2949_v5, %v2816_v26  ;;  %v1892_v8 = vmax.f32 %v1847_v38, 0.0  ;;  %v6127_v5 = vld [vmem:[%s7115_s12 + $0x1b4] sm:$0xff] }
 0x251   : > { %3989 = vrot.lane.b32.xlu1 %v6076_v44, %s10379_s18  ;;  %5971 = vmatmul.mubr.msk.f32.gmra.mrb[84].mxu0 %vm1651_vm9, %v2965_v16  ;;  %v2902_v51 = vsel %vm1543_vm4, %v2886_v3, %v2578_v63 }
 0x252   : > { %3735 = vrot.lane.b32.xlu0 %v3585_v58, %s10387_s29  ;;  %2132 = vmatprep.mubr.f32.mxu1 %v1892_v8 }
 0x253   : > { %v2634_v14 = vpop.permute.xlu1 %2633  ;;  %3179 = vmatprep.mubr.f32.mxu0 %v10386_v47  ;;  %2133 = vmatmul.mubr.f32.gmra.mrb[24].mxu1 %v1891_v20 }
 0x254   : > { %v2388_v56 = vpop.permute.xlu0 %2387  ;;  %v2918_v29 = vsel %vm1560_vm5, %v2902_v51, %v2634_v14 }
 0x255   : > { %4053 = vrot.lane.b32.xlu1 %v6094_v40, %s10378_s22  ;;  %v2855_v57 = vsel %vm327_vm1, %v5838_v1, %v2388_v56  ;;  %v6078_v40 = vld [vmem:[%s7115_s12 + $0x10c] sm:$0xff] }
 0x256   : > { %3799 = vrot.lane.b32.xlu0 %v3601_v2, %s10388_s9  ;;  %v3587_v2 = vld [vmem:[%s7115_s12 + $0x4e] sm:$0xff] }
 0x257   : > { %v2698_v6 = vpop.permute.xlu1 %2697 }
 0x258   : > { %v2452_v10 = vpop.permute.xlu0 %2451  ;;  %v1850_v15 = vpop.f32.mrb[58].mxu0  ;;  %v2934_v18 = vsel %vm1577_vm6, %v2918_v29, %v2698_v6  ;;  %v6096_v6 = vld [vmem:[%s7115_s12 + $0x1c0] sm:$0xff]  ;;  %v6128_v29 = vld [vmem:[%s7115_s12 + $0x1cc] sm:$0xff] }
 0x259   : > { %4117 = vrot.lane.b32.xlu1 %v6110_v25, %s10380_s21  ;;  %v1851_v53 = vadd.f32 %v1850_v15, %v8553_v59  ;;  %v1852_v48 = vpop.f32.mrb[59].mxu0  ;;  %v2871_v44 = vsel %vm1509_vm2, %v2855_v57, %v2452_v10 }
 0x25a   : > { %3863 = vrot.lane.b32.xlu0 %v6045_v27, %s10381_s23  ;;  %v1853_v4 = vadd.f32 %v1852_v48, %v8559_v32  ;;  %v6047_v48 = vld [vmem:[%s7115_s12 + $0x108] sm:$0xff] }
 0x25b   : > { %v2762_v49 = vpop.permute.xlu1 %2761  ;;  %v1893_v39 = vmax.f32 %v1851_v53, 0.0  ;;  %v6112_v53 = vld [vmem:[%s7115_s12 + $0x1c6] sm:$0xff] }
 0x25c   : > { %v2516_v7 = vpop.permute.xlu0 %2515  ;;  %v1894_v60 = vmax.f32 %v1853_v4, 0.0  ;;  %v2950_v34 = vsel %vm1594_vm7, %v2934_v18, %v2762_v49 }
 0x25d   : > { %4181 = vrot.lane.b32.xlu1 %v6126_v61, %s10382_s0  ;;  %v2887_v38 = vsel %vm1526_vm3, %v2871_v44, %v2516_v7 }
 0x25e   : > { %3927 = vrot.lane.b32.xlu0 %v6887_v24, %s10383_s17  ;;  %2138 = vmatprep.mubr.f32.mxu1 %v1894_v60 }
 0x25f   : > { %v2818_v55 = vpop.permute.xlu1 %2817  ;;  %2139 = vmatmul.mubr.f32.gmra.mrb[26].mxu1 %v1893_v39 }
 0x260   : > { %v2580_v30 = vpop.permute.xlu0 %2579  ;;  %v2966_v22 = vsel %vm1611_vm8, %v2950_v34, %v2818_v55 }
 0x261   : > { %3991 = vrot.lane.b32.xlu1 %v6077_v45, %s10379_s18  ;;  %5972 = vmatmul.mubr.msk.f32.gmra.mrb[86].mxu0 %vm1651_vm9, %v2966_v22  ;;  %v2903_v16 = vsel %vm1543_vm4, %v2887_v38, %v2580_v30  ;;  %v6079_v45 = vld [vmem:[%s7115_s12 + $0x114] sm:$0xff]  ;;  %v5958_v22 = vld [vmem:[%s10338_s4 + $0x2] ss:$8 sm:$0x3] }
 0x262   : > { %3737 = vrot.lane.b32.xlu0 %v3586_v9, %s10387_s29  ;;  %3185 = vmatprep.mubr.f32.mxu0 %v10386_v47  ;;  %v3588_v9 = vld [vmem:[%s7115_s12 + $0x66] sm:$0xff]  ;;  %v9207_v1 = vrot.slane %v5958_v22, %v7876_v33 }
 0x263   : > { %v2636_v23 = vpop.permute.xlu1 %2635 }
 0x264   : > { %v2390_v50 = vpop.permute.xlu0 %2389  ;;  %v1856_v11 = vpop.f32.mrb[60].mxu0  ;;  %v2919_v8 = vsel %vm1560_vm5, %v2903_v16, %v2636_v23  ;;  %v3604_v23 = vld [vmem:[%s7115_s12 + $0x6c] sm:$0xff] }
 0x265   : > { %4055 = vrot.lane.b32.xlu1 %v6095_v35, %s10378_s22  ;;  %v1857_v54 = vadd.f32 %v1856_v11, %v8553_v59  ;;  %v1858_v36 = vpop.f32.mrb[61].mxu0  ;;  %v2856_v49 = vsel %vm327_vm1, %v8713_v19, %v2390_v50 }
 0x266   : > { %3801 = vrot.lane.b32.xlu0 %v3602_v37, %s10388_s9  ;;  %v1859_v28 = vadd.f32 %v1858_v36, %v8559_v32  ;;  %v6097_v37 = vld [vmem:[%s7115_s12 + $0x1c8] sm:$0xff] }
 0x267   : > { %v2700_v13 = vpop.permute.xlu1 %2699  ;;  %v1895_v58 = vmax.f32 %v1857_v54, 0.0  ;;  %v5840_v36 = vld [vmem:[%s7115_s12 + $0x122] sm:$0xff] }
 0x268   : > { %v2454_v62 = vpop.permute.xlu0 %2453  ;;  %v1896_v43 = vmax.f32 %v1859_v28, 0.0  ;;  %v2935_v20 = vsel %vm1577_vm6, %v2919_v8, %v2700_v13  ;;  %v6113_v28 = vld [vmem:[%s7115_s12 + $0x1ce] sm:$0xff]  ;;  %v6048_v13 = vld [vmem:[%s7115_s12 + $0x120] sm:$0xff] }
 0x269   : > { %4119 = vrot.lane.b32.xlu1 %v6111_v31, %s10380_s21  ;;  %v2872_v51 = vsel %vm1509_vm2, %v2856_v49, %v2454_v62 }
 0x26a   : > { %3865 = vrot.lane.b32.xlu0 %v6046_v52, %s10381_s23  ;;  %2144 = vmatprep.mubr.f32.mxu1 %v1896_v43 }
 0x26b   : > { %v2764_v26 = vpop.permute.xlu1 %2763  ;;  %2145 = vmatmul.mubr.f32.gmra.mrb[28].mxu1 %v1895_v58 }
 0x26c   : > { %v2518_v63 = vpop.permute.xlu0 %2517  ;;  %v2951_v14 = vsel %vm1594_vm7, %v2935_v20, %v2764_v26  ;;  %v6129_v26 = vld [vmem:[%s7115_s12 + $0x1d4] sm:$0xff] }
 0x26d   : > { %4183 = vrot.lane.b32.xlu1 %v6127_v5, %s10382_s0  ;;  %v2888_v60 = vsel %vm1526_vm3, %v2872_v51, %v2518_v63  ;;  %v6064_v63 = vld [vmem:[%s7115_s12 + $0x126] sm:$0xff] }
 0x26e   : > { %3929 = vrot.lane.b32.xlu0 %v8689_v46, %s10383_s17  ;;  %v3603_v46 = vld [vmem:[%s7115_s12 + $0x54] sm:$0xff] }
 0x26f   : > { %v2820_v56 = vpop.permute.xlu1 %2819 }
 0x270   : > { %v2582_v25 = vpop.permute.xlu0 %2581  ;;  %v2967_v27 = vsel %vm1611_vm8, %v2951_v14, %v2820_v56  ;;  %v6080_v56 = vld [vmem:[%s7115_s12 + $0x12c] sm:$0xff] }
 0x271   : > { %3993 = vrot.lane.b32.xlu1 %v6078_v40, %s10379_s18  ;;  %5973 = vmatmul.mubr.msk.f32.gmra.mrb[88].mxu0 %vm1651_vm9, %v2967_v27  ;;  %v2904_v18 = vsel %vm1543_vm4, %v2888_v60, %v2582_v25  ;;  %v3589_v25 = vld [vmem:[%s7115_s12 + $0x6e] sm:$0xff] }
 0x272   : > { %3739 = vrot.lane.b32.xlu0 %v3587_v2, %s10387_s29  ;;  %3191 = vmatprep.mubr.f32.mxu0 %v10386_v47 }
 0x273   : > { %v2638_v10 = vpop.permute.xlu1 %2637 }
 0x274   : > { %v2392_v41 = vpop.permute.xlu0 %2391  ;;  %v2920_v19 = vsel %vm1560_vm5, %v2904_v18, %v2638_v10  ;;  %v6065_v18 = vld [vmem:[%s7115_s12 + $0x12e] sm:$0xff] }
 0x275   : > { %v1862_v17 = vpop.f32.mrb[62].mxu0  ;;  %4057 = vrot.lane.b32.xlu1 %v6096_v6, %s10378_s22  ;;  %v2857_v44 = vsel %vm327_vm1, %v5840_v36, %v2392_v41  ;;  %v6098_v41 = vld [vmem:[%s7115_s12 + $0x1e0] sm:$0xff] }
 0x276   : > { %3803 = vrot.lane.b32.xlu0 %v3603_v46, %s10388_s9  ;;  %v1863_v15 = vadd.f32 %v1862_v17, %v8553_v59  ;;  %v1864_v0 = vpop.f32.mrb[63].mxu0  ;;  %v3605_v17 = vld [vmem:[%s7115_s12 + $0x74] sm:$0xff] }
 0x277   : > { %v1865_v61 = vadd.f32 %v1864_v0, %v8559_v32  ;;  %v2702_v3 = vpop.permute.xlu1 %2701 }
 0x278   : > { %v2456_v4 = vpop.permute.xlu0 %2455  ;;  %v1897_v59 = vmax.f32 %v1863_v15, 0.0  ;;  %v2936_v39 = vsel %vm1577_vm6, %v2920_v19, %v2702_v3  ;;  %v6114_v3 = vld [vmem:[%s7115_s12 + $0x1e6] sm:$0xff] }
 0x279   : > { %v1898_v7 = vmax.f32 %v1865_v61, 0.0  ;;  %4121 = vrot.lane.b32.xlu1 %v6112_v53, %s10380_s21  ;;  %v2873_v5 = vsel %vm1509_vm2, %v2857_v44, %v2456_v4  ;;  %v6049_v4 = vld [vmem:[%s7115_s12 + $0x128] sm:$0xff] }
 0x27a   : > { %3867 = vrot.lane.b32.xlu0 %v6047_v48, %s10381_s23 }
 0x27b   : > { %2150 = vmatprep.mubr.f32.mxu1 %v1898_v7  ;;  %v2766_v32 = vpop.permute.xlu1 %2765 }
 0x27c   : > { %v2520_v24 = vpop.permute.xlu0 %2519  ;;  %2151 = vmatmul.mubr.f32.gmra.mrb[30].mxu1 %v1897_v59  ;;  %v2952_v34 = vsel %vm1594_vm7, %v2936_v39, %v2766_v32 }
 0x27d   : > { %4185 = vrot.lane.b32.xlu1 %v6128_v29, %s10382_s0  ;;  %v2889_v16 = vsel %vm1526_vm3, %v2873_v5, %v2520_v24  ;;  %v6130_v24 = vld [vmem:[%s7115_s12 + $0x1ec] sm:$0xff] }
 0x27e   : > { %3931 = vrot.lane.b32.xlu0 %v8790_v12, %s10383_s17  ;;  %v9202_v12 = vrot.slane %v5958_v22, %v7867_v21 }
 0x27f   : > { %v2822_v55 = vpop.permute.xlu1 %2821 }
 0x280   : > { %v2584_v30 = vpop.permute.xlu0 %2583  ;;  %v2968_v35 = vsel %vm1611_vm8, %v2952_v34, %v2822_v55  ;;  %v6081_v55 = vld [vmem:[%s7115_s12 + $0x134] sm:$0xff] }
 0x281   : > { %3995 = vrot.lane.b32.xlu1 %v6079_v45, %s10379_s18  ;;  %5974 = vmatmul.mubr.msk.f32.gmra.mrb[90].mxu0 %vm1651_vm9, %v2968_v35  ;;  %v2905_v40 = vsel %vm1543_vm4, %v2889_v16, %v2584_v30  ;;  %v3590_v30 = vld [vmem:[%s7115_s12 + $0x86] sm:$0xff]  ;;  %v6131_v16 = vld [vmem:[%s7115_s12 + $0x1f4] sm:$0xff] }
 0x282   : > { %3741 = vrot.lane.b32.xlu0 %v3588_v9, %s10387_s29  ;;  %3197 = vmatprep.mubr.f32.mxu0 %v10386_v47 }
 0x283   : > { %v2640_v50 = vpop.permute.xlu1 %2639 }
 0x284   : > { %v2394_v11 = vpop.permute.xlu0 %2393  ;;  %v3115_v54 = vpop.f32.mrb[64].mxu0  ;;  %v2921_v2 = vsel %vm1560_vm5, %v2905_v40, %v2640_v50  ;;  %v6099_v50 = vld [vmem:[%s7115_s12 + $0x1e8] sm:$0xff] }
 0x285   : > { %4059 = vrot.lane.b32.xlu1 %v6097_v37, %s10378_s22  ;;  %v3116_v31 = vadd.f32 %v3115_v54, %v9202_v12  ;;  %v3117_v52 = vpop.f32.mrb[65].mxu0  ;;  %v2858_v59 = vsel %vm327_vm1, %v8897_v42, %v2394_v11  ;;  %v3606_v11 = vld [vmem:[%s7115_s12 + $0x8c] sm:$0xff] }
 0x286   : > { %3805 = vrot.lane.b32.xlu0 %v3604_v23, %s10388_s9  ;;  %v3118_v62 = vadd.f32 %v3117_v52, %v9207_v1  ;;  %v3566_v52 = vld [vmem:[%s7115_s12] sm:$0xff] }
 0x287   : > { %v2704_v57 = vpop.permute.xlu1 %2703  ;;  %v3210_v38 = vmax.f32 %v3116_v31, 0.0 }
 0x288   : > { %v2458_v43 = vpop.permute.xlu0 %2457  ;;  %v3211_v58 = vmax.f32 %v3118_v62, 0.0  ;;  %v2937_v14 = vsel %vm1577_vm6, %v2921_v2, %v2704_v57  ;;  %v6115_v62 = vld [vmem:[%s7115_s12 + $0x1ee] sm:$0xff]  ;;  %v6050_v57 = vld [vmem:[%s7115_s12 + $0x140] sm:$0xff] }
 0x289   : > { %4123 = vrot.lane.b32.xlu1 %v6113_v28, %s10380_s21  ;;  %v2874_v60 = vsel %vm1509_vm2, %v2858_v59, %v2458_v43 }
 0x28a   : > { %3869 = vrot.lane.b32.xlu0 %v6048_v13, %s10381_s23  ;;  %3403 = vmatprep.mubr.f32.mxu1 %v3211_v58 }
 0x28b   : > { %v2768_v8 = vpop.permute.xlu1 %2767  ;;  %3404 = vmatmul.mubr.f32.vlgmr.msra.gmra.mrb[0].mxu1 %v3210_v38 }
 0x28c   : > { %v2522_v20 = vpop.permute.xlu0 %2521  ;;  %v2953_v27 = vsel %vm1594_vm7, %v2937_v14, %v2768_v8  ;;  %v6066_v8 = vld [vmem:[%s7115_s12 + $0x146] sm:$0xff] }
 0x28d   : > { %4187 = vrot.lane.b32.xlu1 %v6129_v26, %s10382_s0  ;;  %v2890_v19 = vsel %vm1526_vm3, %v2874_v60, %v2522_v20 }
 0x28e   : > { %3933 = vrot.lane.b32.xlu0 %v6064_v63, %s10383_s17 }
 0x28f   : > { %v2824_v6 = vpop.permute.xlu1 %2823 }
 0x290   : > { %v2586_v46 = vpop.permute.xlu0 %2585  ;;  %v2969_v10 = vsel %vm1611_vm8, %v2953_v27, %v2824_v6  ;;  %v6082_v27 = vld [vmem:[%s7115_s12 + $0x14c] sm:$0xff] }
 0x291   : > { %3997 = vrot.lane.b32.xlu1 %v6080_v56, %s10379_s18  ;;  %5975 = vmatmul.mubr.msk.f32.gmra.mrb[92].mxu0 %vm1651_vm9, %v2969_v10  ;;  %v2906_v42 = vsel %vm1543_vm4, %v2890_v19, %v2586_v46  ;;  %v3591_v6 = vld [vmem:[%s7115_s12 + $0x8e] sm:$0xff] }
 0x292   : > { %3743 = vrot.lane.b32.xlu0 %v3589_v25, %s10387_s29  ;;  %3203 = vmatprep.mubr.f32.mxu0 %v10386_v47 }
 0x293   : > { %v3730_v15 = vpop.permute.xlu1 %3729 }
 0x294   : > { %v2642_v0 = vpop.permute.xlu0 %2641  ;;  %v3121_v53 = vpop.f32.mrb[66].mxu0  ;;  %v4225_v5 = vsel %vm327_vm1, %v3566_v52, %v3730_v15  ;;  %v6100_v15 = vld [vmem:[%s7115_s12 + $0x200] sm:$0xff] }
 0x295   : > { %4061 = vrot.lane.b32.xlu1 %v6098_v41, %s10378_s22  ;;  %v3122_v48 = vadd.f32 %v3121_v53, %v9202_v12  ;;  %v3123_v61 = vpop.f32.mrb[67].mxu0  ;;  %v2922_v9 = vsel %vm1560_vm5, %v2906_v42, %v2642_v0  ;;  %v3607_v0 = vld [vmem:[%s7115_s12 + $0x94] sm:$0xff] }
 0x296   : > { %3807 = vrot.lane.b32.xlu0 %v3605_v17, %s10388_s9  ;;  %v3124_v49 = vadd.f32 %v3123_v61, %v9207_v1 }
 0x297   : > { %v3794_v7 = vpop.permute.xlu1 %3793  ;;  %v3212_v32 = vmax.f32 %v3122_v48, 0.0 }
 0x298   : > { %v2706_v51 = vpop.permute.xlu0 %2705  ;;  %v3213_v29 = vmax.f32 %v3124_v49, 0.0  ;;  %v4241_v26 = vsel %vm1509_vm2, %v4225_v5, %v3794_v7  ;;  %v6116_v7 = vld [vmem:[%s7115_s12 + $0x206] sm:$0xff] }
 0x299   : > { %4125 = vrot.lane.b32.xlu1 %v6114_v3, %s10380_s21  ;;  %v2938_v34 = vsel %vm1577_vm6, %v2922_v9, %v2706_v51  ;;  %v3567_v3 = vld [vmem:[%s7115_s12 + $0x8] sm:$0xff] }
 0x29a   : > { %3871 = vrot.lane.b32.xlu0 %v6049_v4, %s10381_s23  ;;  %3409 = vmatprep.mubr.f32.mxu1 %v3213_v29  ;;  %v6051_v51 = vld [vmem:[%s7115_s12 + $0x148] sm:$0xff] }
 0x29b   : > { %v3858_v39 = vpop.permute.xlu1 %3857  ;;  %3410 = vmatmul.mubr.f32.gmra.mrb[2].mxu1 %v3212_v32 }
 0x29c   : > { %v2770_v45 = vpop.permute.xlu0 %2769  ;;  %v4257_v20 = vsel %vm1526_vm3, %v4241_v26, %v3858_v39  ;;  %v6132_v39 = vld [vmem:[%s7115_s12 + $0x20c] sm:$0xff] }
 0x29d   : > { %4189 = vrot.lane.b32.xlu1 %v6130_v24, %s10382_s0  ;;  %v2954_v22 = vsel %vm1594_vm7, %v2938_v34, %v2770_v45  ;;  %v6067_v45 = vld [vmem:[%s7115_s12 + $0x14e] sm:$0xff] }
 0x29e   : > { %3935 = vrot.lane.b32.xlu0 %v6065_v18, %s10383_s17 }
 0x29f   : > { %v3922_v35 = vpop.permute.xlu1 %3921 }
 0x2a0   : > { %v2826_v37 = vpop.permute.xlu0 %2825  ;;  %v4273_v14 = vsel %vm1543_vm4, %v4257_v20, %v3922_v35  ;;  %v6083_v35 = vld [vmem:[%s7115_s12 + $0x154] sm:$0xff]  ;;  %v6170_v20 = vld [vmem:[%s10339_s5 + $0x608] sm:$0xff] }
 0x2a1   : > { %v2970_v23 = vsel %vm1611_vm8, %v2954_v22, %v2826_v37  ;;  %3999 = vrot.lane.b32.xlu1 %v6081_v55, %s10379_s18  ;;  %v3592_v37 = vld [vmem:[%s7115_s12 + $0xa6] sm:$0xff] }
 0x2a2   : > { %3745 = vrot.lane.b32.xlu0 %v3590_v30, %s10387_s29  ;;  %5976 = vmatmul.mubr.msk.f32.gmra.mrb[94].mxu0 %vm1651_vm9, %v2970_v23 }
 0x2a3   : > { %v3986_v54 = vpop.permute.xlu1 %3985  ;;  %4495 = vmatprep.mubr.f32.mxu0 %v10386_v47 }
 0x2a4   : > { %v3732_v36 = vpop.permute.xlu0 %3731  ;;  %v3127_v31 = vpop.f32.mrb[68].mxu0  ;;  %v4289_v56 = vsel %vm1560_vm5, %v4273_v14, %v3986_v54 }
 0x2a5   : > { %4063 = vrot.lane.b32.xlu1 %v6099_v50, %s10378_s22  ;;  %v3128_v28 = vadd.f32 %v3127_v31, %v9202_v12  ;;  %v3129_v13 = vpop.f32.mrb[69].mxu0  ;;  %v4226_v32 = vsel %vm327_vm1, %v3567_v3, %v3732_v36  ;;  %v6101_v36 = vld [vmem:[%s7115_s12 + $0x208] sm:$0xff] }
 0x2a6   : > { %3809 = vrot.lane.b32.xlu0 %v3606_v11, %s10388_s9  ;;  %v3130_v43 = vadd.f32 %v3129_v13, %v9207_v1  ;;  %v3608_v31 = vld [vmem:[%s7115_s12 + $0xac] sm:$0xff] }
 0x2a7   : > { %v4050_v44 = vpop.permute.xlu1 %4049  ;;  %v3214_v63 = vmax.f32 %v3128_v28, 0.0 }
 0x2a8   : > { %v3796_v58 = vpop.permute.xlu0 %3795  ;;  %v3215_v38 = vmax.f32 %v3130_v43, 0.0  ;;  %v4305_v25 = vsel %vm1577_vm6, %v4289_v56, %v4050_v44  ;;  %v6117_v44 = vld [vmem:[%s7115_s12 + $0x20e] sm:$0xff]  ;;  %v6068_v56 = vld [vmem:[%s7115_s12 + $0x166] sm:$0xff] }
 0x2a9   : > { %4127 = vrot.lane.b32.xlu1 %v6115_v62, %s10380_s21  ;;  %v4242_v18 = vsel %vm1509_vm2, %v4226_v32, %v3796_v58  ;;  %v3568_v62 = vld [vmem:[%s7115_s12 + $0x20] sm:$0xff] }
 0x2aa   : > { %3873 = vrot.lane.b32.xlu0 %v6050_v57, %s10381_s23  ;;  %3415 = vmatprep.mubr.f32.mxu1 %v3215_v38  ;;  %v6052_v58 = vld [vmem:[%s7115_s12 + $0x160] sm:$0xff] }
 0x2ab   : > { %v4114_v40 = vpop.permute.xlu1 %4113  ;;  %3416 = vmatmul.mubr.f32.gmra.mrb[4].mxu1 %v3214_v63  ;;  %v6133_v63 = vld [vmem:[%s7115_s12 + $0x214] sm:$0xff] }
 0x2ac   : > { %v3860_v2 = vpop.permute.xlu0 %3859  ;;  %v4321_v46 = vsel %vm1594_vm7, %v4305_v25, %v4114_v40  ;;  %v6172_v40 = vld [vmem:[%s10339_s5 + $0x618] sm:$0xff] }
 0x2ad   : > { %4191 = vrot.lane.b32.xlu1 %v6131_v16, %s10382_s0  ;;  %v4258_v42 = vsel %vm1526_vm3, %v4242_v18, %v3860_v2  ;;  %v6564_v25 = vpack.c.bf16 %v6172_v40, %v6170_v20  ;;  %v6102_v18 = vld [vmem:[%s7115_s12 + $0x220] sm:$0xff] }
 0x2ae   : > { %3937 = vrot.lane.b32.xlu0 %v6066_v8, %s10383_s17 }
 0x2af   : > { %v4178_v10 = vpop.permute.xlu1 %4177  ;;  %6565 = vmatprep.subr.bf16.mxu1 %v6564_v25 }
 0x2b0   : > { %v3924_v41 = vpop.permute.xlu0 %3923  ;;  %v4337_v17 = vsel %vm1611_vm8, %v4321_v46, %v4178_v10 }
 0x2b1   : > { %4001 = vrot.lane.b32.xlu1 %v6082_v27, %s10379_s18  ;;  %6153 = vmatmul.mubr.msk.f32.vlgmr.msra.gmra.mrb[96].mxu0 %vm1651_vm9, %v4337_v17  ;;  %v4274_v55 = vsel %vm1543_vm4, %v4258_v42, %v3924_v41  ;;  %v6169_v27 = vld [vmem:[%s10339_s5 + $0x600] sm:$0xff] }
 0x2b2   : > { %3747 = vrot.lane.b32.xlu0 %v3591_v6, %s10387_s29  ;;  %4501 = vmatprep.mubr.f32.mxu0 %v10386_v47  ;;  %v6171_v6 = vld [vmem:[%s10339_s5 + $0x610] sm:$0xff] }
 0x2b3   : > { %v3988_v53 = vpop.permute.xlu1 %3987  ;;  %v6566_v17 = vpack.c.bf16 %v6171_v6, %v6169_v27 }
 0x2b4   : > { %v3734_v48 = vpop.permute.xlu0 %3733  ;;  %v3133_v61 = vpop.f32.mrb[70].mxu0  ;;  %v4290_v30 = vsel %vm1560_vm5, %v4274_v55, %v3988_v53 }
 0x2b5   : > { %4065 = vrot.lane.b32.xlu1 %v6100_v15, %s10378_s22  ;;  %v3134_v4 = vadd.f32 %v3133_v61, %v9202_v12  ;;  %v3135_v49 = vpop.f32.mrb[71].mxu0  ;;  %v4227_v16 = vsel %vm327_vm1, %v3568_v62, %v3734_v48  ;;  %v6174_v48 = vld [vmem:[%s10339_s5 + $0x628] sm:$0xff]  ;;  %v6176_v61 = vld [vmem:[%s10339_s5 + $0x638] sm:$0xff]  ;;  %6567 = vmatpush1.bf16.msra.mxu1 %v6566_v17  ;;  %v6183_v62 = vld [vmem:[%s10339_s5 + $0x670] sm:$0xff] }
 0x2b6   : > { %3811 = vrot.lane.b32.xlu0 %v3607_v0, %s10388_s9  ;;  %v3136_v59 = vadd.f32 %v3135_v49, %v9207_v1  ;;  %v6084_v0 = vld [vmem:[%s7115_s12 + $0x16c] sm:$0xff]  ;;  %v6568_v49 = vpack.c.bf16 %v6176_v61, %v6174_v48  ;;  %v5050_v17 = vld [vmem:[%s10337_s3] sm:$0xff] }
 0x2b7   : > { %v4052_v29 = vpop.permute.xlu1 %4051  ;;  %v3216_v19 = vmax.f32 %v3134_v4, 0.0  ;;  %v3593_v4 = vld [vmem:[%s7115_s12 + $0xae] sm:$0xff]  ;;  %v3594_v61 = vld [vmem:[%s7115_s12 + $0xc6] sm:$0xff] }
 0x2b8   : > { %v3798_v60 = vpop.permute.xlu0 %3797  ;;  %v3217_v24 = vmax.f32 %v3136_v59, 0.0  ;;  %v4306_v22 = vsel %vm1577_vm6, %v4290_v30, %v4052_v29  ;;  %6569 = vmatprep.subr.bf16.mxu1 %v6568_v49  ;;  %v6191_v49 = vld [vmem:[%s10339_s5 + $0x6b0] sm:$0xff] }
 0x2b9   : > { %4129 = vrot.lane.b32.xlu1 %v6116_v7, %s10380_s21  ;;  %v4243_v2 = vsel %vm1509_vm2, %v4227_v16, %v3798_v60  ;;  %v6173_v7 = vld [vmem:[%s10339_s5 + $0x620] sm:$0xff]  ;;  %v6186_v16 = vld [vmem:[%s10339_s5 + $0x688] sm:$0xff] }
 0x2ba   : > { %3875 = vrot.lane.b32.xlu0 %v6051_v51, %s10381_s23  ;;  %3421 = vmatprep.mubr.f32.mxu1 %v3217_v24  ;;  %v6175_v51 = vld [vmem:[%s10339_s5 + $0x630] sm:$0xff] }
 0x2bb   : > { %v4116_v9 = vpop.permute.xlu1 %4115  ;;  %3422 = vmatmul.mubr.f32.gmra.mrb[6].mxu1 %v3216_v19  ;;  %v6570_v32 = vpack.c.bf16 %v6175_v51, %v6173_v7  ;;  %v6178_v19 = vld [vmem:[%s10339_s5 + $0x648] sm:$0xff] }
 0x2bc   : > { %v3862_v34 = vpop.permute.xlu0 %3861  ;;  %v4322_v23 = vsel %vm1594_vm7, %v4306_v22, %v4116_v9  ;;  %v6177_v9 = vld [vmem:[%s10339_s5 + $0x640] sm:$0xff] }
 0x2bd   : > { %4193 = vrot.lane.b32.xlu1 %v6132_v39, %s10382_s0  ;;  %v4259_v46 = vsel %vm1526_vm3, %v4243_v2, %v3862_v34  ;;  %v6180_v39 = vld [vmem:[%s10339_s5 + $0x658] sm:$0xff]  ;;  %6571 = vmatpush1.bf16.msra.mxu1 %v6570_v32  ;;  %v6179_v34 = vld [vmem:[%s10339_s5 + $0x650] sm:$0xff]  ;;  %v6103_v32 = vld [vmem:[%s7115_s12 + $0x228] sm:$0xff] }
 0x2be   : > { %3939 = vrot.lane.b32.xlu0 %v6067_v45, %s10383_s17  ;;  %v3609_v45 = vld [vmem:[%s7115_s12 + $0xb4] sm:$0xff]  ;;  %v6572_v42 = vpack.c.bf16 %v6180_v39, %v6178_v19  ;;  %v6574_v22 = vpack.c.bf16 %v6179_v34, %v6177_v9  ;;  %v3610_v19 = vld [vmem:[%s7115_s12 + $0xcc] sm:$0xff] }
 0x2bf   : > { %v4180_v50 = vpop.permute.xlu1 %4179  ;;  %v6069_v2 = vld [vmem:[%s7115_s12 + $0x16e] sm:$0xff] }
 0x2c0   : > { %v3926_v11 = vpop.permute.xlu0 %3925  ;;  %v4338_v54 = vsel %vm1611_vm8, %v4322_v23, %v4180_v50  ;;  %6573 = vmatprep.subr.bf16.mxu1 %v6572_v42  ;;  %v6182_v50 = vld [vmem:[%s10339_s5 + $0x668] sm:$0xff]  ;;  %v6195_v42 = vld [vmem:[%s10339_s5 + $0x6d0] sm:$0xff] }
 0x2c1   : > { %4003 = vrot.lane.b32.xlu1 %v6083_v35, %s10379_s18  ;;  %6154 = vmatmul.mubr.msk.f32.gmra.mrb[98].mxu0 %vm1651_vm9, %v4338_v54  ;;  %v4275_v15 = vsel %vm1543_vm4, %v4259_v46, %v3926_v11  ;;  %v3569_v35 = vld [vmem:[%s7115_s12 + $0x28] sm:$0xff]  ;;  %v6184_v11 = vld [vmem:[%s10339_s5 + $0x678] sm:$0xff] }
 0x2c2   : > { %3749 = vrot.lane.b32.xlu0 %v3592_v37, %s10387_s29  ;;  %4507 = vmatprep.mubr.f32.mxu0 %v10386_v47  ;;  %v6118_v37 = vld [vmem:[%s7115_s12 + $0x226] sm:$0xff] }
 0x2c3   : > { %v3990_v52 = vpop.permute.xlu1 %3989  ;;  %6575 = vmatpush1.bf16.msra.mxu1 %v6574_v22  ;;  %v3570_v22 = vld [vmem:[%s7115_s12 + $0x40] sm:$0xff] }
 0x2c4   : > { %v9325_v28 = vpop.permute.xlu0 %3735  ;;  %v3139_v13 = vpop.f32.mrb[72].mxu0  ;;  %v4291_v53 = vsel %vm1560_vm5, %v4275_v15, %v3990_v52  ;;  %v6576_v52 = vpack.c.bf16 %v6184_v11, %v6182_v50  ;;  %v6200_v50 = vld [vmem:[%s10339_s5 + $0x6f8] sm:$0xff] }
 0x2c5   : > { %4067 = vrot.lane.b32.xlu1 %v6101_v36, %s10378_s22  ;;  %v3140_v57 = vadd.f32 %v3139_v13, %v9202_v12  ;;  %v3141_v43 = vpop.f32.mrb[73].mxu0  ;;  %v6181_v13 = vld [vmem:[%s10339_s5 + $0x660] sm:$0xff] }
 0x2c6   : > { %3813 = vrot.lane.b32.xlu0 %v3608_v31, %s10388_s9  ;;  %v3142_v5 = vadd.f32 %v3141_v43, %v9207_v1  ;;  %v6053_v31 = vld [vmem:[%s7115_s12 + $0x168] sm:$0xff]  ;;  %6577 = vmatprep.subr.bf16.mxu1 %v6576_v52  ;;  %v6197_v52 = vld [vmem:[%s10339_s5 + $0x6e0] sm:$0xff] }
 0x2c7   : > { %v4054_v38 = vpop.permute.xlu1 %4053  ;;  %v3218_v14 = vmax.f32 %v3140_v57, 0.0 }
 0x2c8   : > { %v9335_v26 = vpop.permute.xlu0 %3799  ;;  %v3219_v8 = vmax.f32 %v3142_v5, 0.0  ;;  %v4307_v3 = vsel %vm1577_vm6, %v4291_v53, %v4054_v38  ;;  %v6134_v5 = vld [vmem:[%s7115_s12 + $0x22c] sm:$0xff]  ;;  %v4228_v38 = vsel %vm327_vm1, %v3569_v35, %v9325_v28  ;;  %v6192_v53 = vld [vmem:[%s10339_s5 + $0x6b8] sm:$0xff] }
 0x2c9   : > { %4131 = vrot.lane.b32.xlu1 %v6117_v44, %s10380_s21  ;;  %v4244_v20 = vsel %vm1509_vm2, %v4228_v38, %v9335_v26  ;;  %v6119_v35 = vld [vmem:[%s7115_s12 + $0x22e] sm:$0xff] }
 0x2ca   : > { %3877 = vrot.lane.b32.xlu0 %v6052_v58, %s10381_s23  ;;  %3427 = vmatprep.mubr.f32.mxu1 %v3219_v8  ;;  %v6578_v58 = vpack.c.bf16 %v6183_v62, %v6181_v13  ;;  %v6188_v8 = vld [vmem:[%s10339_s5 + $0x698] sm:$0xff]  ;;  %v6199_v13 = vld [vmem:[%s10339_s5 + $0x6f0] sm:$0xff] }
 0x2cb   : > { %v4118_v10 = vpop.permute.xlu1 %4117  ;;  %3428 = vmatmul.mubr.f32.gmra.mrb[8].mxu1 %v3218_v14  ;;  %v6580_v28 = vpack.c.bf16 %v6188_v8, %v6186_v16  ;;  %v6185_v14 = vld [vmem:[%s10339_s5 + $0x680] sm:$0xff]  ;;  %v6202_v16 = vld [vmem:[%s10339_s5 + $0x708] sm:$0xff]  ;;  %v6204_v8 = vld [vmem:[%s10339_s5 + $0x718] sm:$0xff] }
 0x2cc   : > { %v9356_v41 = vpop.permute.xlu0 %3863  ;;  %v4323_v59 = vsel %vm1594_vm7, %v4307_v3, %v4118_v10  ;;  %6579 = vmatpush1.bf16.msra.mxu1 %v6578_v58  ;;  %v6085_v10 = vld [vmem:[%s7115_s12 + $0x174] sm:$0xff]  ;;  %v6594_v58 = vpack.c.bf16 %v6199_v13, %v6197_v52 }
 0x2cd   : > { %4195 = vrot.lane.b32.xlu1 %v6133_v63, %s10382_s0  ;;  %v4260_v25 = vsel %vm1526_vm3, %v4244_v20, %v9356_v41  ;;  %6581 = vmatprep.subr.bf16.mxu1 %v6580_v28  ;;  %v5054_v41 = vcombine.high %v5050_v17, %v5050_v17  ;;  %v6201_v28 = vld [vmem:[%s10339_s5 + $0x700] sm:$0xff] }
 0x2ce   : > { %3941 = vrot.lane.b32.xlu0 %v6068_v56, %s10383_s17  ;;  %v6187_v56 = vld [vmem:[%s10339_s5 + $0x690] sm:$0xff] }
 0x2cf   : > { %v4182_v29 = vpop.permute.xlu1 %4181  ;;  %v6582_v26 = vpack.c.bf16 %v6187_v56, %v6185_v14  ;;  %6266 = vmatprep.subr.msk.mxu0 %vm376_vm0, %v5054_v41  ;;  %v6203_v14 = vld [vmem:[%s10339_s5 + $0x710] sm:$0xff] }
 0x2d0   : > { %v3928_v60 = vpop.permute.xlu0 %3927  ;;  %v4339_v24 = vsel %vm1611_vm8, %v4323_v59, %v4182_v29  ;;  %6267 = vmatpush1.msk.msra.mxu0 %vm376_vm0, %v5050_v17  ;;  %v6208_v17 = vld [vmem:[%s10339_s5 + $0x738] sm:$0xff]  ;;  %v3595_v41 = vld [vmem:[%s7115_s12 + $0xce] sm:$0xff] }
 0x2d1   : > { %4005 = vrot.lane.b32.xlu1 %v6084_v0, %s10379_s18  ;;  %6155 = vmatmul.mubr.msk.f32.gmra.mrb[100].mxu0 %vm1651_vm9, %v4339_v24  ;;  %v4276_v46 = vsel %vm1543_vm4, %v4260_v25, %v3928_v60  ;;  %v6190_v0 = vld [vmem:[%s10339_s5 + $0x6a8] sm:$0xff] }
 0x2d2   : > { %3751 = vrot.lane.b32.xlu0 %v3593_v4, %s10387_s29  ;;  %4513 = vmatprep.mubr.f32.mxu0 %v10386_v47  ;;  %v6584_v3 = vpack.c.bf16 %v6192_v53, %v6190_v0  ;;  %v6189_v4 = vld [vmem:[%s10339_s5 + $0x6a0] sm:$0xff]  ;;  %v6194_v24 = vld [vmem:[%s10339_s5 + $0x6c8] sm:$0xff] }
 0x2d3   : > { %v3992_v55 = vpop.permute.xlu1 %3991  ;;  %6583 = vmatpush1.bf16.msra.mxu1 %v6582_v26  ;;  %v6586_v29 = vpack.c.bf16 %v6191_v49, %v6189_v4  ;;  %v6205_v53 = vld [vmem:[%s10339_s5 + $0x720] sm:$0xff] }
 0x2d4   : > { %v9396_v30 = vpop.permute.xlu0 %3737  ;;  %v3145_v23 = vpop.f32.mrb[74].mxu0  ;;  %v4292_v15 = vsel %vm1560_vm5, %v4276_v46, %v3992_v55  ;;  %6585 = vmatprep.subr.bf16.mxu1 %v6584_v3  ;;  %v6086_v46 = vld [vmem:[%s7115_s12 + $0x18c] sm:$0xff] }
 0x2d5   : > { %4069 = vrot.lane.b32.xlu1 %v6102_v18, %s10378_s22  ;;  %v3146_v54 = vadd.f32 %v3145_v23, %v9202_v12  ;;  %v3147_v36 = vpop.f32.mrb[75].mxu0  ;;  %v6196_v18 = vld [vmem:[%s10339_s5 + $0x6d8] sm:$0xff]  ;;  %v6198_v23 = vld [vmem:[%s10339_s5 + $0x6e8] sm:$0xff]  ;;  %v4229_v38 = vsel %vm327_vm1, %v3570_v22, %v9396_v30  ;;  %v6596_v30 = vpack.c.bf16 %v6204_v8, %v6202_v16 }
 0x2d6   : > { %3815 = vrot.lane.b32.xlu0 %v3609_v45, %s10388_s9  ;;  %v3148_v57 = vadd.f32 %v3147_v36, %v9207_v1  ;;  %v6588_v39 = vpack.c.bf16 %v6196_v18, %v6194_v24  ;;  %v6193_v45 = vld [vmem:[%s10339_s5 + $0x6c0] sm:$0xff]  ;;  %v6211_v18 = vld [vmem:[%s10339_s5 + $0x750] sm:$0xff]  ;;  %v6214_v22 = vld [vmem:[%s10339_s5 + $0x768] sm:$0xff] }
 0x2d7   : > { %v4056_v43 = vpop.permute.xlu1 %4055  ;;  %v3220_v40 = vmax.f32 %v3146_v54, 0.0  ;;  %6587 = vmatpush1.bf16.msra.mxu1 %v6586_v29  ;;  %v6590_v55 = vpack.c.bf16 %v6195_v42, %v6193_v45  ;;  %v6054_v36 = vld [vmem:[%s7115_s12 + $0x180] sm:$0xff]  ;;  %v6212_v29 = vld [vmem:[%s10339_s5 + $0x758] sm:$0xff]  ;;  %v3571_v42 = vld [vmem:[%s7115_s12 + $0x48] sm:$0xff] }
 0x2d8   : > { %v9418_v44 = vpop.permute.xlu0 %3801  ;;  %v3221_v63 = vmax.f32 %v3148_v57, 0.0  ;;  %v4308_v48 = vsel %vm1577_vm6, %v4292_v15, %v4056_v43  ;;  %6589 = vmatprep.subr.bf16.mxu1 %v6588_v39  ;;  %v6209_v24 = vld [vmem:[%s10339_s5 + $0x740] sm:$0xff] }
 0x2d9   : > { %4133 = vrot.lane.b32.xlu1 %v6118_v37, %s10380_s21  ;;  %v4245_v20 = vsel %vm1509_vm2, %v4229_v38, %v9418_v44  ;;  %v6598_v44 = vpack.c.bf16 %v6203_v14, %v6201_v28  ;;  %v6606_v45 = vpack.c.bf16 %v6211_v18, %v6209_v24  ;;  %v6218_v38 = vld [vmem:[%s10339_s5 + $0x788] sm:$0xff] }
 0x2da   : > { %3879 = vrot.lane.b32.xlu0 %v6053_v31, %s10381_s23  ;;  %3433 = vmatprep.mubr.f32.mxu1 %v3221_v63  ;;  %v6592_v31 = vpack.c.bf16 %v6200_v50, %v6198_v23  ;;  %v6055_v50 = vld [vmem:[%s7115_s12 + $0x188] sm:$0xff] }
 0x2db   : > { %v4120_v27 = vpop.permute.xlu1 %4119  ;;  %3434 = vmatmul.mubr.f32.gmra.mrb[10].mxu1 %v3220_v40 }
 0x2dc   : > { %v9442_v6 = vpop.permute.xlu0 %3865  ;;  %v4324_v7 = vsel %vm1594_vm7, %v4308_v48, %v4120_v27  ;;  %6591 = vmatpush1.bf16.msra.mxu1 %v6590_v55  ;;  %v6207_v48 = vld [vmem:[%s10339_s5 + $0x730] sm:$0xff] }
 0x2dd   : > { %4197 = vrot.lane.b32.xlu1 %v6134_v5, %s10382_s0  ;;  %v6135_v5 = vld [vmem:[%s7115_s12 + $0x234] sm:$0xff]  ;;  %6593 = vmatprep.subr.bf16.mxu1 %v6592_v31  ;;  %v4261_v56 = vsel %vm1526_vm3, %v4245_v20, %v9442_v6  ;;  %v6206_v6 = vld [vmem:[%s10339_s5 + $0x728] sm:$0xff]  ;;  %v6602_v49 = vpack.c.bf16 %v6207_v48, %v6205_v53 }
 0x2de   : > { %3943 = vrot.lane.b32.xlu0 %v6069_v2, %s10383_s17  ;;  %v6070_v2 = vld [vmem:[%s7115_s12 + $0x186] sm:$0xff]  ;;  %v6600_v0 = vpack.c.bf16 %v6208_v17, %v6206_v6  ;;  %v6071_v20 = vld [vmem:[%s7115_s12 + $0x18e] sm:$0xff] }
 0x2df   : > { %v4184_v51 = vpop.permute.xlu1 %4183  ;;  %v6221_v17 = vld [vmem:[%s10339_s5 + $0x7a0] sm:$0xff] }
 0x2e0   : > { %v3930_v59 = vpop.permute.xlu0 %3929  ;;  %v4340_v60 = vsel %vm1611_vm8, %v4324_v7, %v4184_v51  ;;  %6595 = vmatpush1.bf16.msra.mxu1 %v6594_v58  ;;  %v6104_v51 = vld [vmem:[%s7115_s12 + $0x240] sm:$0xff] }
 0x2e1   : > { %4007 = vrot.lane.b32.xlu1 %v6085_v10, %s10379_s18  ;;  %6156 = vmatmul.mubr.msk.f32.gmra.mrb[102].mxu0 %vm1651_vm9, %v4340_v60  ;;  %v4277_v26 = vsel %vm1543_vm4, %v4261_v56, %v3930_v59  ;;  %v6210_v59 = vld [vmem:[%s10339_s5 + $0x748] sm:$0xff]  ;;  %v3611_v60 = vld [vmem:[%s7115_s12 + $0xd4] sm:$0xff] }
 0x2e2   : > { %3753 = vrot.lane.b32.xlu0 %v3594_v61, %s10387_s29  ;;  %4519 = vmatprep.mubr.f32.mxu0 %v10386_v47 }
 0x2e3   : > { %v3994_v9 = vpop.permute.xlu1 %3993  ;;  %6597 = vmatprep.subr.bf16.mxu1 %v6596_v30 }
 0x2e4   : > { %v9487_v34 = vpop.permute.xlu0 %3739  ;;  %v3151_v37 = vpop.f32.mrb[76].mxu0  ;;  %v4293_v10 = vsel %vm1560_vm5, %v4277_v26, %v3994_v9  ;;  %6599 = vmatpush1.bf16.msra.mxu1 %v6598_v44  ;;  %v6120_v9 = vld [vmem:[%s7115_s12 + $0x246] sm:$0xff]  ;;  %v6224_v26 = vld [vmem:[%s10339_s5 + $0x7b8] sm:$0xff] }
 0x2e5   : > { %4071 = vrot.lane.b32.xlu1 %v6103_v32, %s10378_s22  ;;  %v3152_v11 = vadd.f32 %v3151_v37, %v9202_v12  ;;  %v3153_v54 = vpop.f32.mrb[77].mxu0  ;;  %6601 = vmatprep.subr.bf16.mxu1 %v6600_v0  ;;  %v6604_v32 = vpack.c.bf16 %v6212_v29, %v6210_v59  ;;  %v4230_v58 = vsel %vm327_vm1, %v3571_v42, %v9487_v34  ;;  %v3612_v59 = vld [vmem:[%s7115_s12 + $0xec] sm:$0xff] }
 0x2e6   : > { %3817 = vrot.lane.b32.xlu0 %v3610_v19, %s10388_s9  ;;  %v3154_v62 = vadd.f32 %v3153_v54, %v9207_v1  ;;  %v6213_v54 = vld [vmem:[%s10339_s5 + $0x760] sm:$0xff] }
 0x2e7   : > { %v4058_v57 = vpop.permute.xlu1 %4057  ;;  %v3222_v40 = vmax.f32 %v3152_v11, 0.0 }
 0x2e8   : > { %v9509_v43 = vpop.permute.xlu0 %3803  ;;  %v3223_v63 = vmax.f32 %v3154_v62, 0.0  ;;  %v4309_v15 = vsel %vm1577_vm6, %v4293_v10, %v4058_v57  ;;  %6603 = vmatpush1.bf16.msra.mxu1 %v6602_v49  ;;  %v6136_v57 = vld [vmem:[%s7115_s12 + $0x24c] sm:$0xff] }
 0x2e9   : > { %4135 = vrot.lane.b32.xlu1 %v6119_v35, %s10380_s21  ;;  %6605 = vmatprep.subr.bf16.mxu1 %v6604_v32  ;;  %v6216_v35 = vld [vmem:[%s10339_s5 + $0x778] sm:$0xff]  ;;  %v4246_v16 = vsel %vm1509_vm2, %v4230_v58, %v9509_v43  ;;  %v3596_v10 = vld [vmem:[%s7115_s12 + $0xe6] sm:$0xff]  ;;  %v6234_v49 = vld [vmem:[%s7112_s10 + $0xce] sm:$0xff] }
 0x2ea   : > { %3881 = vrot.lane.b32.xlu0 %v6054_v36, %s10381_s23  ;;  %3439 = vmatprep.mubr.f32.mxu1 %v3223_v63  ;;  %v6608_v11 = vpack.c.bf16 %v6216_v35, %v6214_v22  ;;  %v6215_v36 = vld [vmem:[%s10339_s5 + $0x770] sm:$0xff]  ;;  %v6220_v63 = vld [vmem:[%s10339_s5 + $0x798] sm:$0xff]  ;;  %v4980_v42 = vsel %vm327_vm1, %v6234_v49, 0.0  ;;  %v6235_v22 = vld [vmem:[%s7112_s10 + $0xe6] sm:$0xff] }
 0x2eb   : > { %v4122_v25 = vpop.permute.xlu1 %4121  ;;  %3440 = vmatmul.mubr.f32.gmra.mrb[12].mxu1 %v3222_v40  ;;  %v6610_v62 = vpack.c.bf16 %v6215_v36, %v6213_v54  ;;  %v6612_v34 = vpack.c.bf16 %v6220_v63, %v6218_v38  ;;  %v6217_v40 = vld [vmem:[%s10339_s5 + $0x780] sm:$0xff]  ;;  %v6227_v32 = vld [vmem:[%s10339_s5 + $0x7d0] sm:$0xff]  ;;  %v4982_v63 = vsel %vm327_vm1, %v6235_v22, 0.0 }
 0x2ec   : > { %v9533_v27 = vpop.permute.xlu0 %3867  ;;  %v4325_v61 = vsel %vm1594_vm7, %v4309_v15, %v4122_v25  ;;  %6607 = vmatpush1.bf16.msra.mxu1 %v6606_v45  ;;  %v6087_v25 = vld [vmem:[%s7115_s12 + $0x194] sm:$0xff]  ;;  %v6056_v54 = vld [vmem:[%s7115_s12 + $0x1a0] sm:$0xff] }
 0x2ed   : > { %4199 = vrot.lane.b32.xlu1 %v6135_v5, %s10382_s0  ;;  %6609 = vmatprep.subr.bf16.mxu1 %v6608_v11  ;;  %v4262_v30 = vsel %vm1526_vm3, %v4246_v16, %v9533_v27  ;;  %v6222_v27 = vld [vmem:[%s10339_s5 + $0x7a8] sm:$0xff]  ;;  %v6223_v15 = vld [vmem:[%s10339_s5 + $0x7b0] sm:$0xff] }
 0x2ee   : > { %3945 = vrot.lane.b32.xlu0 %v6070_v2, %s10383_s17  ;;  %v6219_v2 = vld [vmem:[%s10339_s5 + $0x790] sm:$0xff]  ;;  %v6616_v6 = vpack.c.bf16 %v6224_v26, %v6222_v27  ;;  %v6618_v48 = vpack.c.bf16 %v6223_v15, %v6221_v17 }
 0x2ef   : > { %v4186_v3 = vpop.permute.xlu1 %4185  ;;  %v6614_v43 = vpack.c.bf16 %v6219_v2, %v6217_v40  ;;  %v6236_v16 = vld [vmem:[%s7112_s10 + $0xee] sm:$0xff] }
 0x2f0   : > { %v3932_v4 = vpop.permute.xlu0 %3931  ;;  %v4341_v7 = vsel %vm1611_vm8, %v4325_v61, %v4186_v3  ;;  %6611 = vmatpush1.bf16.msra.mxu1 %v6610_v62  ;;  %v6105_v3 = vld [vmem:[%s7115_s12 + $0x248] sm:$0xff]  ;;  %v6137_v2 = vld [vmem:[%s7115_s12 + $0x254] sm:$0xff] }
 0x2f1   : > { %4009 = vrot.lane.b32.xlu1 %v6086_v46, %s10379_s18  ;;  %6157 = vmatmul.mubr.msk.f32.gmra.mrb[104].mxu0 %vm1651_vm9, %v4341_v7  ;;  %v4278_v56 = vsel %vm1543_vm4, %v4262_v30, %v3932_v4  ;;  %v6233_v4 = vld [vmem:[%s7112_s10 + $0xc6] sm:$0xff] }
 0x2f2   : > { %3755 = vrot.lane.b32.xlu0 %v3595_v41, %s10387_s29  ;;  %4525 = vmatprep.mubr.f32.mxu0 %v10386_v47  ;;  %v6226_v7 = vld [vmem:[%s10339_s5 + $0x7c8] sm:$0xff]  ;;  %v4979_v45 = vsel %vm327_vm1, %v6233_v4, 0.0 }
 0x2f3   : > { %v3996_v19 = vpop.permute.xlu1 %3995  ;;  %6613 = vmatprep.subr.bf16.mxu1 %v6612_v34  ;;  %v4981_v62 = vadd.f32 %v4980_v42, %v4979_v45  ;;  %v6072_v30 = vld [vmem:[%s7115_s12 + $0x1a6] sm:$0xff] }
 0x2f4   : > { %v9573_v39 = vpop.permute.xlu0 %3741  ;;  %v3157_v55 = vpop.f32.mrb[78].mxu0  ;;  %v4294_v44 = vsel %vm1560_vm5, %v4278_v56, %v3996_v19  ;;  %6615 = vmatpush1.bf16.msra.mxu1 %v6614_v43  ;;  %v6088_v26 = vld [vmem:[%s7115_s12 + $0x1ac] sm:$0xff] }
 0x2f5   : > { %4073 = vrot.lane.b32.xlu1 %v6104_v51, %s10378_s22  ;;  %v3158_v37 = vadd.f32 %v3157_v55, %v9202_v12  ;;  %v3159_v23 = vpop.f32.mrb[79].mxu0  ;;  %6617 = vmatprep.subr.bf16.mxu1 %v6616_v6  ;;  %v6228_v51 = vld [vmem:[%s10339_s5 + $0x7d8] sm:$0xff]  ;;  %v6121_v55 = vld [vmem:[%s7115_s12 + $0x24e] sm:$0xff] }
 0x2f6   : > { %3819 = vrot.lane.b32.xlu0 %v3611_v60, %s10388_s9  ;;  %v3160_v31 = vadd.f32 %v3159_v23, %v9207_v1  ;;  %v6620_v29 = vpack.c.bf16 %v6228_v51, %v6226_v7  ;;  %v6225_v60 = vld [vmem:[%s10339_s5 + $0x7c0] sm:$0xff]  ;;  %v6232_v23 = vld [vmem:[%s10339_s5 + $0x7f8] sm:$0xff] }
 0x2f7   : > { %v4060_v52 = vpop.permute.xlu1 %4059  ;;  %v3224_v8 = vmax.f32 %v3158_v37, 0.0  ;;  %v6622_v19 = vpack.c.bf16 %v6227_v32, %v6225_v60  ;;  %v6230_v37 = vld [vmem:[%s10339_s5 + $0x7e8] sm:$0xff] }
 0x2f8   : > { %v9595_v13 = vpop.permute.xlu0 %3805  ;;  %v3225_v5 = vmax.f32 %v3160_v31, 0.0  ;;  %v4310_v46 = vsel %vm1577_vm6, %v4294_v44, %v4060_v52  ;;  %6619 = vmatpush1.bf16.msra.mxu1 %v6618_v48  ;;  %v6624_v36 = vpack.c.bf16 %v6232_v23, %v6230_v37  ;;  %v6229_v31 = vld [vmem:[%s10339_s5 + $0x7e0] sm:$0xff]  ;;  %v6231_v52 = vld [vmem:[%s10339_s5 + $0x7f0] sm:$0xff] }
 0x2f9   : > { %4137 = vrot.lane.b32.xlu1 %v6120_v9, %s10380_s21  ;;  %v3572_v9 = vld [vmem:[%s7115_s12 + $0x60] sm:$0xff]  ;;  %6621 = vmatprep.subr.bf16.mxu1 %v6620_v29  ;;  %v6626_v38 = vpack.c.bf16 %v6231_v52, %v6229_v31  ;;  %v3573_v29 = vld [vmem:[%s7115_s12 + $0x68] sm:$0xff] }
 0x2fa   : > { %3883 = vrot.lane.b32.xlu0 %v6055_v50, %s10381_s23  ;;  %3445 = vmatprep.mubr.f32.mxu1 %v3225_v5  ;;  %v6106_v48 = vld [vmem:[%s7115_s12 + $0x260] sm:$0xff] }
 0x2fb   : > { %v4124_v28 = vpop.permute.xlu1 %4123  ;;  %3446 = vmatmul.mubr.f32.gmra.mrb[14].mxu1 %v3224_v8  ;;  %v4231_v8 = vsel %vm327_vm1, %v3572_v9, %v9573_v39  ;;  %v6239_v51 = vld [vmem:[%s7112_s10 + $0x126] sm:$0xff] }
 0x2fc   : > { %v9619_v14 = vpop.permute.xlu0 %3869  ;;  %v4326_v41 = vsel %vm1594_vm7, %v4310_v46, %v4124_v28  ;;  %6623 = vmatpush1.bf16.msra.mxu1 %v6622_v19  ;;  %v4247_v34 = vsel %vm1509_vm2, %v4231_v8, %v9595_v13  ;;  %v4983_v28 = vadd.f32 %v4982_v63, %v4981_v62  ;;  %v6237_v13 = vld [vmem:[%s7112_s10 + $0x106] sm:$0xff]  ;;  %v3597_v46 = vld [vmem:[%s7115_s12 + $0xee] sm:$0xff]  ;;  %v4990_v22 = vsel %vm327_vm1, %v6239_v51, 0.0 }
 0x2fd   : > { %4201 = vrot.lane.b32.xlu1 %v6136_v57, %s10382_s0  ;;  %6625 = vmatprep.subr.bf16.mxu1 %v6624_v36  ;;  %v4263_v43 = vsel %vm1526_vm3, %v4247_v34, %v9619_v14  ;;  %v6057_v19 = vld [vmem:[%s7115_s12 + $0x1a8] sm:$0xff] }
 0x2fe   : > { %3947 = vrot.lane.b32.xlu0 %v6071_v20, %s10383_s17  ;;  %v6073_v36 = vld [vmem:[%s7115_s12 + $0x1ae] sm:$0xff] }
 0x2ff   : > { %v4188_v0 = vpop.permute.xlu1 %4187 }
 0x300   : > { %v9641_v53 = vpop.permute.xlu0 %3933  ;;  %v4342_v61 = vsel %vm1611_vm8, %v4326_v41, %v4188_v0  ;;  %6627 = vmatpush1.bf16.msra.mxu1 %v6626_v38  ;;  %v4986_v41 = vsel %vm327_vm1, %v6237_v13, 0.0  ;;  %v6241_v38 = vld [vmem:[%s7112_s10 + $0x146] sm:$0xff]  ;;  %v6139_v13 = vld [vmem:[%s7115_s12 + $0x274] sm:$0xff] }
 0x301   : > { %4011 = vrot.lane.b32.xlu1 %v6087_v25, %s10379_s18  ;;  %6158 = vmatmul.mubr.msk.f32.gmra.mrb[106].mxu0 %vm1651_vm9, %v4342_v61  ;;  %v4984_v25 = vsel %vm327_vm1, %v6236_v16, 0.0  ;;  %v4279_v44 = vsel %vm1543_vm4, %v4263_v43, %v9641_v53  ;;  %v6238_v53 = vld [vmem:[%s7112_s10 + $0x10e] sm:$0xff] }
 0x302   : > { %3757 = vrot.lane.b32.xlu0 %v3596_v10, %s10387_s29  ;;  %4531 = vmatprep.mubr.f32.mxu0 %v10386_v47  ;;  %v4985_v10 = vadd.f32 %v4984_v25, %v4983_v28  ;;  %v3613_v61 = vld [vmem:[%s7115_s12 + $0xf4] sm:$0xff]  ;;  %v4988_v7 = vsel %vm327_vm1, %v6238_v53, 0.0 }
 0x303   : > { %v3998_v24 = vpop.permute.xlu1 %3997  ;;  %v6089_v16 = vld [vmem:[%s7115_s12 + $0x1b4] sm:$0xff] }
 0x304   : > { %v9663_v18 = vpop.permute.xlu0 %3743  ;;  %v3163_v35 = vpop.f32.mrb[80].mxu0  ;;  %v4295_v27 = vsel %vm1560_vm5, %v4279_v44, %v3998_v24  ;;  %v6122_v24 = vld [vmem:[%s7115_s12 + $0x266] sm:$0xff]  ;;  %v6242_v43 = vld [vmem:[%s7112_s10 + $0x14e] sm:$0xff] }
 0x305   : > { %4075 = vrot.lane.b32.xlu1 %v6105_v3, %s10378_s22  ;;  %v3164_v50 = vadd.f32 %v3163_v35, %v9202_v12  ;;  %v3165_v11 = vpop.f32.mrb[81].mxu0  ;;  %v4987_v3 = vadd.f32 %v4986_v41, %v4985_v10  ;;  %v6240_v35 = vld [vmem:[%s7112_s10 + $0x12e] sm:$0xff]  ;;  %v4232_v37 = vsel %vm327_vm1, %v3573_v29, %v9663_v18 }
 0x306   : > { %3821 = vrot.lane.b32.xlu0 %v3612_v59, %s10388_s9  ;;  %v3166_v57 = vadd.f32 %v3165_v11, %v9207_v1 }
 0x307   : > { %v4062_v58 = vpop.permute.xlu1 %4061  ;;  %v3226_v40 = vmax.f32 %v3164_v50, 0.0  ;;  %v4989_v45 = vadd.f32 %v4988_v7, %v4987_v3 }
 0x308   : > { %v9688_v5 = vpop.permute.xlu0 %3807  ;;  %v3227_v20 = vmax.f32 %v3166_v57, 0.0  ;;  %v4311_v14 = vsel %vm1577_vm6, %v4295_v27, %v4062_v58  ;;  %v4992_v57 = vsel %vm327_vm1, %v6240_v35, 0.0  ;;  %v4996_v27 = vsel %vm327_vm1, %v6242_v43, 0.0 }
 0x309   : > { %4139 = vrot.lane.b32.xlu1 %v6121_v55, %s10380_s21  ;;  %v4248_v50 = vsel %vm1509_vm2, %v4232_v37, %v9688_v5  ;;  %v4991_v31 = vadd.f32 %v4990_v22, %v4989_v45 }
 0x30a   : > { %3885 = vrot.lane.b32.xlu0 %v6056_v54, %s10381_s23  ;;  %3451 = vmatprep.mubr.f32.mxu1 %v3227_v20  ;;  %v6138_v54 = vld [vmem:[%s7115_s12 + $0x26c] sm:$0xff] }
 0x30b   : > { %v4126_v39 = vpop.permute.xlu1 %4125  ;;  %3452 = vmatmul.mubr.f32.gmra.mrb[16].mxu1 %v3226_v40  ;;  %v4993_v8 = vadd.f32 %v4992_v57, %v4991_v31  ;;  %v6247_v31 = vld [vmem:[%s7112_s10 + $0x1a6] sm:$0xff] }
 0x30c   : > { %v3872_v56 = vpop.permute.xlu0 %3871  ;;  %v4327_v6 = vsel %vm1594_vm7, %v4311_v14, %v4126_v39  ;;  %v6123_v39 = vld [vmem:[%s7115_s12 + $0x26e] sm:$0xff]  ;;  %v6243_v14 = vld [vmem:[%s7112_s10 + $0x166] sm:$0xff] }
 0x30d   : > { %4203 = vrot.lane.b32.xlu1 %v6137_v2, %s10382_s0  ;;  %v4264_v52 = vsel %vm1526_vm3, %v4248_v50, %v3872_v56  ;;  %v6107_v2 = vld [vmem:[%s7115_s12 + $0x268] sm:$0xff]  ;;  %v4998_v53 = vsel %vm327_vm1, %v6243_v14, 0.0 }
 0x30e   : > { %3949 = vrot.lane.b32.xlu0 %v6072_v30, %s10383_s17  ;;  %v4994_v30 = vsel %vm327_vm1, %v6241_v38, 0.0 }
 0x30f   : > { %v4190_v17 = vpop.permute.xlu1 %4189  ;;  %v4995_v56 = vadd.f32 %v4994_v30, %v4993_v8  ;;  %v6248_v8 = vld [vmem:[%s7112_s10 + $0x1ae] sm:$0xff] }
 0x310   : > { %v3936_v15 = vpop.permute.xlu0 %3935  ;;  %v4343_v0 = vsel %vm1611_vm8, %v4327_v6, %v4190_v17 }
 0x311   : > { %4013 = vrot.lane.b32.xlu1 %v6088_v26, %s10379_s18  ;;  %6159 = vmatmul.mubr.msk.f32.gmra.mrb[108].mxu0 %vm1651_vm9, %v4343_v0  ;;  %v4280_v58 = vsel %vm1543_vm4, %v4264_v52, %v3936_v15  ;;  %v4997_v17 = vadd.f32 %v4996_v27, %v4995_v56  ;;  %v5008_v56 = vsel %vm327_vm1, %v6248_v8, 0.0 }
 0x312   : > { %3759 = vrot.lane.b32.xlu0 %v3597_v46, %s10387_s29  ;;  %4537 = vmatprep.mubr.f32.mxu0 %v10386_v47  ;;  %v3574_v46 = vld [vmem:[%s7115_s12 + $0x80] sm:$0xff]  ;;  %s10281_s29 = scalar_lea.sflag [#allocation4], %s283_s20 }
 0x313   : > { %v4000_v4 = vpop.permute.xlu1 %3999  ;;  %v4999_v51 = vadd.f32 %v4998_v53, %v4997_v17 }
 0x314   : > { %v9721_v49 = vpop.permute.xlu0 %3745  ;;  %v3169_v59 = vpop.f32.mrb[82].mxu0  ;;  %v4296_v5 = vsel %vm1560_vm5, %v4280_v58, %v4000_v4 }
 0x315   : > { %4077 = vrot.lane.b32.xlu1 %v6106_v48, %s10378_s22  ;;  %v3170_v60 = vadd.f32 %v3169_v59, %v9202_v12  ;;  %v3171_v32 = vpop.f32.mrb[83].mxu0  ;;  %v6244_v48 = vld [vmem:[%s7112_s10 + $0x16e] sm:$0xff] }
 0x316   : > { %3823 = vrot.lane.b32.xlu0 %v3613_v61, %s10388_s9  ;;  %v3172_v42 = vadd.f32 %v3171_v32, %v9207_v1  ;;  %v4233_v61 = vsel %vm327_vm1, %v3574_v46, %v9721_v49  ;;  %v5000_v32 = vsel %vm327_vm1, %v6244_v48, 0.0 }
 0x317   : > { %v4064_v9 = vpop.permute.xlu1 %4063  ;;  %v3228_v11 = vmax.f32 %v3170_v60, 0.0 }
 0x318   : > { %v3810_v55 = vpop.permute.xlu0 %3809  ;;  %v3229_v23 = vmax.f32 %v3172_v42, 0.0  ;;  %v4312_v63 = vsel %vm1577_vm6, %v4296_v5, %v4064_v9  ;;  %v5001_v42 = vadd.f32 %v5000_v32, %v4999_v51 }
 0x319   : > { %4141 = vrot.lane.b32.xlu1 %v6122_v24, %s10380_s21  ;;  %v4249_v4 = vsel %vm1509_vm2, %v4233_v61, %v3810_v55  ;;  %v6251_v61 = vld [vmem:[%s7112_s10 + $0x1e6] sm:$0xff] }
 0x31a   : > { %3887 = vrot.lane.b32.xlu0 %v6057_v19, %s10381_s23  ;;  %3457 = vmatprep.mubr.f32.mxu1 %v3229_v23  ;;  %v6245_v19 = vld [vmem:[%s7112_s10 + $0x186] sm:$0xff]  ;;  %v6246_v23 = vld [vmem:[%s7112_s10 + $0x18e] sm:$0xff] }
 0x31b   : > { %v4128_v62 = vpop.permute.xlu1 %4127  ;;  %3458 = vmatmul.mubr.f32.gmra.mrb[18].mxu1 %v3228_v11  ;;  %v5002_v35 = vsel %vm327_vm1, %v6245_v19, 0.0  ;;  %v6252_v19 = vld [vmem:[%s7112_s10 + $0x1ee] sm:$0xff] }
 0x31c   : > { %v3874_v18 = vpop.permute.xlu0 %3873  ;;  %v4328_v20 = vsel %vm1594_vm7, %v4312_v63, %v4128_v62  ;;  %v5003_v50 = vadd.f32 %v5002_v35, %v5001_v42  ;;  %v3575_v62 = vld [vmem:[%s7115_s12 + $0x88] sm:$0xff] }
 0x31d   : > { %4205 = vrot.lane.b32.xlu1 %v6138_v54, %s10382_s0  ;;  %v4265_v59 = vsel %vm1526_vm3, %v4249_v4, %v3874_v18  ;;  %v3576_v4 = vld [vmem:[%s7115_s12 + $0xa0] sm:$0xff] }
 0x31e   : > { %3951 = vrot.lane.b32.xlu0 %v6073_v36, %s10383_s17  ;;  %v5004_v36 = vsel %vm327_vm1, %v6246_v23, 0.0  ;;  %v5016_v23 = vsel %vm327_vm1, %v6252_v19, 0.0 }
 0x31f   : > { %v4192_v34 = vpop.permute.xlu1 %4191  ;;  %v5005_v58 = vadd.f32 %v5004_v36, %v5003_v50 }
 0x320   : > { %v3938_v40 = vpop.permute.xlu0 %3937  ;;  %v4344_v28 = vsel %vm1611_vm8, %v4328_v20, %v4192_v34 }
 0x321   : > { %6160 = vmatmul.mubr.msk.f32.gmra.mrb[110].mxu0 %vm1651_vm9, %v4344_v28  ;;  %4079 = vrot.lane.b32.xlu1 %v6107_v2, %s10378_s22  ;;  %v4281_v24 = vsel %vm1543_vm4, %v4265_v59, %v3938_v40  ;;  %s6336_s22 = sshll.u32 %s6970_s28, 6 }
 0x322   : > { %4015 = vrot.lane.b32.xlu0 %v6089_v16, %s10379_s18  ;;  %4543 = vmatprep.mubr.f32.mxu0 %v10386_v47  ;;  %v5006_v16 = vsel %vm327_vm1, %v6247_v31, 0.0 }
 0x323   : > { %v4002_v25 = vpop.permute.xlu1 %4001  ;;  %v5007_v30 = vadd.f32 %v5006_v16, %v5005_v58 }
 0x324   : > { %v3748_v44 = vpop.permute.xlu0 %3747  ;;  %v3175_v26 = vpop.f32.mrb[84].mxu0  ;;  %v4297_v49 = vsel %vm1560_vm5, %v4281_v24, %v4002_v25  ;;  %v5014_v24 = vsel %vm327_vm1, %v6251_v61, 0.0 }
 0x325   : > { %v3176_v10 = vadd.f32 %v3175_v26, %v9202_v12  ;;  %v3177_v6 = vpop.f32.mrb[85].mxu0  ;;  %4207 = vrot.lane.b32.xlu1 %v6139_v13, %s10382_s0  ;;  %v4234_v20 = vsel %vm327_vm1, %v3575_v62, %v3748_v44  ;;  %v6249_v13 = vld [vmem:[%s7112_s10 + $0x1c6] sm:$0xff]  ;;  %v5009_v14 = vadd.f32 %v5008_v56, %v5007_v30 }
 0x326   : > { %4143 = vrot.lane.b32.xlu0 %v6123_v39, %s10380_s21  ;;  %v3178_v15 = vadd.f32 %v3177_v6, %v9207_v1  ;;  %v5010_v6 = vsel %vm327_vm1, %v6249_v13, 0.0  ;;  %v6256_v13 = vld [vmem:[%s7112_s10 + $0x22e] sm:$0xff] }
 0x327   : > { %v4066_v41 = vpop.permute.xlu1 %4065  ;;  %v3230_v7 = vmax.f32 %v3176_v10, 0.0 }
 0x328   : > { %v3812_v0 = vpop.permute.xlu0 %3811  ;;  %v3231_v3 = vmax.f32 %v3178_v15, 0.0  ;;  %v4313_v45 = vsel %vm1577_vm6, %v4297_v49, %v4066_v41  ;;  %v6250_v15 = vld [vmem:[%s7112_s10 + $0x1ce] sm:$0xff]  ;;  %v5011_v41 = vadd.f32 %v5010_v6, %v5009_v14 }
 0x329   : > { %v4250_v40 = vsel %vm1509_vm2, %v4234_v20, %v3812_v0  ;;  %v5012_v48 = vsel %vm327_vm1, %v6250_v15, 0.0  ;;  %v6255_v20 = vld [vmem:[%s7112_s10 + $0x226] sm:$0xff]  ;;  %v5024_v15 = vsel %vm327_vm1, %v6256_v13, 0.0 }
 0x32a   : > { %3463 = vmatprep.mubr.f32.mxu1 %v3231_v3  ;;  %v5013_v59 = vadd.f32 %v5012_v48, %v5011_v41 }
 0x32b   : > { %v4130_v29 = vpop.permute.xlu1 %4129  ;;  %3464 = vmatmul.mubr.f32.gmra.mrb[20].mxu1 %v3230_v7 }
 0x32c   : > { %v3876_v60 = vpop.permute.xlu0 %3875  ;;  %v4329_v9 = vsel %vm1594_vm7, %v4313_v45, %v4130_v29 }
 0x32d   : > { %v4266_v28 = vsel %vm1526_vm3, %v4250_v40, %v3876_v60  ;;  %v3577_v40 = vld [vmem:[%s7115_s12 + $0xa8] sm:$0xff] }
 0x32f   : > { %v4194_v55 = vpop.permute.xlu1 %4193 }
 0x330   : > { %v3940_v22 = vpop.permute.xlu0 %3939  ;;  %v4345_v37 = vsel %vm1611_vm8, %v4329_v9, %v4194_v55  ;;  %v5015_v55 = vadd.f32 %v5014_v24, %v5013_v59 }
 0x331   : > { %6161 = vmatmul.mubr.msk.f32.gmra.mrb[112].mxu0 %vm1651_vm9, %v4345_v37  ;;  %v4282_v25 = vsel %vm1543_vm4, %v4266_v28, %v3940_v22 }
 0x332   : > { %4549 = vmatprep.mubr.f32.mxu0 %v10386_v47  ;;  %v5017_v31 = vadd.f32 %v5016_v23, %v5015_v55 }
 0x333   : > { %v4004_v11 = vpop.permute.xlu1 %4003 }
 0x334   : > { %v3750_v54 = vpop.permute.xlu0 %3749  ;;  %v3181_v52 = vpop.f32.mrb[86].mxu0  ;;  %v4298_v44 = vsel %vm1560_vm5, %v4282_v25, %v4004_v11  ;;  %v6253_v11 = vld [vmem:[%s7112_s10 + $0x206] sm:$0xff]  ;;  %v5022_v25 = vsel %vm327_vm1, %v6255_v20, 0.0 }
 0x335   : > { %v3182_v18 = vadd.f32 %v3181_v52, %v9202_v12  ;;  %v3183_v57 = vpop.f32.mrb[87].mxu0  ;;  %v4235_v49 = vsel %vm327_vm1, %v3576_v4, %v3750_v54 }
 0x336   : > { %v3184_v38 = vadd.f32 %v3183_v57, %v9207_v1  ;;  %v5018_v57 = vsel %vm327_vm1, %v6253_v11, 0.0  ;;  %v6260_v11 = vld [vmem:[%s7112_s10 + $0x26e] sm:$0xff] }
 0x337   : > { %v4068_v5 = vpop.permute.xlu1 %4067  ;;  %v3232_v2 = vmax.f32 %v3182_v18, 0.0 }
 0x338   : > { %v3814_v63 = vpop.permute.xlu0 %3813  ;;  %v3233_v34 = vmax.f32 %v3184_v38, 0.0  ;;  %v4314_v27 = vsel %vm1577_vm6, %v4298_v44, %v4068_v5  ;;  %v6254_v38 = vld [vmem:[%s7112_s10 + $0x20e] sm:$0xff]  ;;  %v5019_v5 = vadd.f32 %v5018_v57, %v5017_v31 }
 0x339   : > { %v4251_v42 = vsel %vm1509_vm2, %v4235_v49, %v3814_v63  ;;  %v5020_v8 = vsel %vm327_vm1, %v6254_v38, 0.0  ;;  %v6259_v49 = vld [vmem:[%s7112_s10 + $0x266] sm:$0xff]  ;;  %v5032_v38 = vsel %vm327_vm1, %v6260_v11, 0.0 }
 0x33a   : > { %3469 = vmatprep.mubr.f32.mxu1 %v3233_v34  ;;  %v5021_v28 = vadd.f32 %v5020_v8, %v5019_v5 }
 0x33b   : > { %v4132_v43 = vpop.permute.xlu1 %4131  ;;  %3470 = vmatmul.mubr.f32.gmra.mrb[22].mxu1 %v3232_v2 }
 0x33c   : > { %v3878_v39 = vpop.permute.xlu0 %3877  ;;  %v4330_v26 = vsel %vm1594_vm7, %v4314_v27, %v4132_v43 }
 0x33d   : > { %v4267_v22 = vsel %vm1526_vm3, %v4251_v42, %v3878_v39  ;;  %v3578_v42 = vld [vmem:[%s7115_s12 + $0xc0] sm:$0xff] }
 0x33f   : > { %v4196_v46 = vpop.permute.xlu1 %4195 }
 0x340   : > { %v3942_v10 = vpop.permute.xlu0 %3941  ;;  %v4346_v17 = vsel %vm1611_vm8, %v4330_v26, %v4196_v46  ;;  %v5023_v46 = vadd.f32 %v5022_v25, %v5021_v28 }
 0x341   : > { %6162 = vmatmul.mubr.msk.f32.gmra.mrb[114].mxu0 %vm1651_vm9, %v4346_v17  ;;  %v4283_v50 = vsel %vm1543_vm4, %v4267_v22, %v3942_v10 }
 0x342   : > { %4555 = vmatprep.mubr.f32.mxu0 %v10386_v47  ;;  %v5025_v61 = vadd.f32 %v5024_v15, %v5023_v46 }
 0x343   : > { %v4006_v0 = vpop.permute.xlu1 %4005 }
 0x344   : > { %v3752_v53 = vpop.permute.xlu0 %3751  ;;  %v3187_v3 = vpop.f32.mrb[88].mxu0  ;;  %v4299_v54 = vsel %vm1560_vm5, %v4283_v50, %v4006_v0  ;;  %v6257_v0 = vld [vmem:[%s7112_s10 + $0x246] sm:$0xff]  ;;  %v5030_v50 = vsel %vm327_vm1, %v6259_v49, 0.0 }
 0x345   : > { %v3188_v7 = vadd.f32 %v3187_v3, %v9202_v12  ;;  %v3189_v51 = vpop.f32.mrb[89].mxu0  ;;  %v4236_v44 = vsel %vm327_vm1, %v3577_v40, %v3752_v53 }
 0x346   : > { %v3190_v29 = vadd.f32 %v3189_v51, %v9207_v1  ;;  %v5026_v51 = vsel %vm327_vm1, %v6257_v0, 0.0  ;;  %v6264_v0 = vld [vmem:[%s7112_s10 + $0x2ae] sm:$0xff] }
 0x347   : > { %v4070_v60 = vpop.permute.xlu1 %4069  ;;  %v3234_v9 = vmax.f32 %v3188_v7, 0.0 }
 0x348   : > { %v3816_v32 = vpop.permute.xlu0 %3815  ;;  %v3235_v45 = vmax.f32 %v3190_v29, 0.0  ;;  %v4315_v36 = vsel %vm1577_vm6, %v4299_v54, %v4070_v60  ;;  %v6258_v29 = vld [vmem:[%s7112_s10 + $0x24e] sm:$0xff]  ;;  %v5027_v60 = vadd.f32 %v5026_v51, %v5025_v61 }
 0x349   : > { %v4252_v14 = vsel %vm1509_vm2, %v4236_v44, %v3816_v32  ;;  %v5028_v19 = vsel %vm327_vm1, %v6258_v29, 0.0  ;;  %v6263_v44 = vld [vmem:[%s7112_s10 + $0x2a6] sm:$0xff] }
 0x34a   : > { %3475 = vmatprep.mubr.f32.mxu1 %v3235_v45  ;;  %v5029_v22 = vadd.f32 %v5028_v19, %v5027_v60 }
 0x34b   : > { %v4134_v35 = vpop.permute.xlu1 %4133  ;;  %3476 = vmatmul.mubr.f32.gmra.mrb[24].mxu1 %v3234_v9 }
 0x34c   : > { %v3880_v37 = vpop.permute.xlu0 %3879  ;;  %v4331_v52 = vsel %vm1594_vm7, %v4315_v36, %v4134_v35 }
 0x34d   : > { %v4268_v10 = vsel %vm1526_vm3, %v4252_v14, %v3880_v37  ;;  %v3579_v14 = vld [vmem:[%s7115_s12 + $0xc8] sm:$0xff] }
 0x34f   : > { %v4198_v62 = vpop.permute.xlu1 %4197 }
 0x350   : > { %v3944_v18 = vpop.permute.xlu0 %3943  ;;  %v4347_v58 = vsel %vm1611_vm8, %v4331_v52, %v4198_v62  ;;  %v5031_v62 = vadd.f32 %v5030_v50, %v5029_v22  ;;  %v3580_v50 = vld [vmem:[%s7115_s12 + $0xe0] sm:$0xff] }
 0x351   : > { %6163 = vmatmul.mubr.msk.f32.gmra.mrb[116].mxu0 %vm1651_vm9, %v4347_v58  ;;  %v4284_v41 = vsel %vm1543_vm4, %v4268_v10, %v3944_v18 }
 0x352   : > { %4561 = vmatprep.mubr.f32.mxu0 %v10386_v47  ;;  %v5033_v20 = vadd.f32 %v5032_v38, %v5031_v62 }
 0x353   : > { %v4008_v63 = vpop.permute.xlu1 %4007 }
 0x354   : > { %v3754_v16 = vpop.permute.xlu0 %3753  ;;  %v3193_v34 = vpop.f32.mrb[90].mxu0  ;;  %v4300_v53 = vsel %vm1560_vm5, %v4284_v41, %v4008_v63  ;;  %v6261_v63 = vld [vmem:[%s7112_s10 + $0x286] sm:$0xff]  ;;  %v5038_v41 = vsel %vm327_vm1, %v6263_v44, 0.0 }
 0x355   : > { %v3194_v2 = vadd.f32 %v3193_v34, %v9202_v12  ;;  %v3195_v30 = vpop.f32.mrb[91].mxu0  ;;  %v4237_v54 = vsel %vm327_vm1, %v3578_v42, %v3754_v16 }
 0x356   : > { %v3196_v43 = vadd.f32 %v3195_v30, %v9207_v1  ;;  %v5034_v30 = vsel %vm327_vm1, %v6261_v63, 0.0 }
 0x357   : > { %v4072_v39 = vpop.permute.xlu1 %4071  ;;  %v3236_v26 = vmax.f32 %v3194_v2, 0.0 }
 0x358   : > { %v3818_v56 = vpop.permute.xlu0 %3817  ;;  %v3237_v27 = vmax.f32 %v3196_v43, 0.0  ;;  %v4316_v48 = vsel %vm1577_vm6, %v4300_v53, %v4072_v39  ;;  %v6262_v43 = vld [vmem:[%s7112_s10 + $0x28e] sm:$0xff]  ;;  %v5035_v39 = vadd.f32 %v5034_v30, %v5033_v20  ;;  %s6347_s10 = sshll.u32 %s6966_s27, 5 }
 0x359   : > { %v4253_v31 = vsel %vm1509_vm2, %v4237_v54, %v3818_v56  ;;  %v5036_v13 = vsel %vm327_vm1, %v6262_v43, 0.0  ;;  %s10224_s27 = sadd.s32 %s6347_s10, %s6336_s22 }
 0x35a   : > { %3481 = vmatprep.mubr.f32.mxu1 %v3237_v27  ;;  %v5037_v10 = vadd.f32 %v5036_v13, %v5035_v39  ;;  %s6337_s28 = sshll.u32 %s10224_s27, 7 }
 0x35b   : > { %v4136_v6 = vpop.permute.xlu1 %4135  ;;  %3482 = vmatmul.mubr.f32.gmra.mrb[26].mxu1 %v3236_v26  ;;  %s10263_s0 = scalar_lea.hbm %s10341_s7, %s6337_s28 }
 0x35c   : > { %v3882_v17 = vpop.permute.xlu0 %3881  ;;  %v4332_v3 = vsel %vm1594_vm7, %v4316_v48, %v4136_v6 }
 0x35d   : > { %v4269_v18 = vsel %vm1526_vm3, %v4253_v31, %v3882_v17 }
 0x35f   : > { %v4200_v4 = vpop.permute.xlu1 %4199 }
 0x360   : > { %v3946_v7 = vpop.permute.xlu0 %3945  ;;  %v4348_v59 = vsel %vm1611_vm8, %v4332_v3, %v4200_v4  ;;  %v5039_v4 = vadd.f32 %v5038_v41, %v5037_v10 }
 0x361   : > { %6164 = vmatmul.mubr.msk.f32.gmra.mrb[118].mxu0 %vm1651_vm9, %v4348_v59  ;;  %v4285_v5 = vsel %vm1543_vm4, %v4269_v18, %v3946_v7  ;;  %v5040_v59 = vsel %vm327_vm1, %v6264_v0, 0.0 }
 0x362   : > { %4567 = vmatprep.mubr.f32.mxu0 %v10386_v47 }
 0x363   : > { %v4010_v32 = vpop.permute.xlu1 %4009 }
 0x364   : > { %v3756_v24 = vpop.permute.xlu0 %3755  ;;  %v3199_v45 = vpop.f32.mrb[92].mxu0  ;;  %v4301_v16 = vsel %vm1560_vm5, %v4285_v5, %v4010_v32  ;;  %v5041_v32 = vadd.f32 %v5040_v59, %v5039_v4 }
 0x365   : > { %v3200_v9 = vadd.f32 %v3199_v45, %v9202_v12  ;;  %v3201_v55 = vpop.f32.mrb[93].mxu0  ;;  %v4238_v53 = vsel %vm327_vm1, %v3579_v14, %v3756_v24  ;;  %v6150_v45 = vld [vmem:[%s10338_s4 + $0x3] ss:$8 sm:$0x3] }
 0x366   : > { %v3202_v35 = vadd.f32 %v3201_v55, %v9207_v1  ;;  %v5042_v55 = vrot.slane %v5041_v32, 4 }
 0x367   : > { %v4074_v37 = vpop.permute.xlu1 %4073  ;;  %v3238_v52 = vmax.f32 %v3200_v9, 0.0  ;;  %v9892_v9 = vrot.slane %v6150_v45, %v7867_v21 }
 0x368   : > { %v3820_v23 = vpop.permute.xlu0 %3819  ;;  %v3239_v36 = vmax.f32 %v3202_v35, 0.0  ;;  %v4317_v8 = vsel %vm1577_vm6, %v4301_v16, %v4074_v37  ;;  %v9896_v37 = vrot.slane %v6150_v45, %v7876_v33 }
 0x369   : > { %v4254_v61 = vsel %vm1509_vm2, %v4238_v53, %v3820_v23 }
 0x36a   : > { %3487 = vmatprep.mubr.f32.mxu1 %v3239_v36  ;;  %v5043_v36 = vadd.f32 %v5042_v55, %v5041_v32 }
 0x36b   : > { %v4138_v57 = vpop.permute.xlu1 %4137  ;;  %3488 = vmatmul.mubr.f32.gmra.mrb[28].mxu1 %v3238_v52 }
 0x36c   : > { %v3884_v58 = vpop.permute.xlu0 %3883  ;;  %v4333_v34 = vsel %vm1594_vm7, %v4317_v8, %v4138_v57  ;;  %v5044_v5 = vrot.slane %v5043_v36, 2 }
 0x36d   : > { %v4270_v7 = vsel %vm1526_vm3, %v4254_v61, %v3884_v58 }
 0x36e   : > { %v5045_v30 = vadd.f32 %v5044_v5, %v5043_v36  ;;  %v6274_v36 = vld [vmem:[%s10339_s5 + $0x828] sm:$0xff]  ;;  %v6277_v5 = vld [vmem:[%s10339_s5 + $0x840] sm:$0xff] }
 0x36f   : > { %v4202_v40 = vpop.permute.xlu1 %4201 }
 0x370   : > { %v3948_v2 = vpop.permute.xlu0 %3947  ;;  %v4349_v28 = vsel %vm1611_vm8, %v4333_v34, %v4202_v40  ;;  %v3581_v40 = vld [vmem:[%s7115_s12 + $0xe8] sm:$0xff]  ;;  %s10202_s12 = scalar_lea.vmem [#allocation3], %s10196_s16 }
 0x371   : > { %6165 = vmatmul.mubr.msk.f32.gmra.mrb[120].mxu0 %vm1651_vm9, %v4349_v28  ;;  %s5447_s18 = sshll.u32 %s10202_s12, 4  ;;  %s10269_s18 = int_to_ptr.vmem [resolvable:$true] %s5447_s18 }
 0x372   : > { %4573 = vmatprep.mubr.f32.mxu0 %v10386_v47  ;;  %s6888_s9 = scalar_lea.vmem %s10269_s18, 4096  ;;  %p6895_p2 = scmp.lt.s32.totalorder %s10269_s18, %s6893_s30 }
 0x373   : > { %v4012_v56 = vpop.permute.xlu1 %4011  ;;  %p6889_p13 = scmp.ne.s32.totalorder %s10269_s18, %s6888_s9  ;;  %p6896_p4 = scmp.lt.s32.totalorder %s6894_s19, %s6888_s9 }
 0x374   : > { %v3758_v25 = vpop.permute.xlu0 %3757 }
 0x375   : > { %v3205_v27 = vpop.f32.mrb[94].mxu0  ;;  %v4239_v18 = vsel %vm327_vm1, %v3580_v50, %v3758_v25  ;;  %p6890_p0 = pnand %p6889_p13, %p7086_p3  ;;  %p6897_p5 = por %p6896_p4, %p6895_p2 }
 0x376   : > { %v3206_v26 = vadd.f32 %v3205_v27, %v9202_v12  ;;  %v3207_v46 = vpop.f32.mrb[95].mxu0  ;;  %v5046_v27 = vrot.slane %v5045_v30, 1 }
 0x377   : > { %v3208_v6 = vadd.f32 %v3207_v46, %v9207_v1  ;;  %v4076_v17 = vpop.permute.xlu1 %4075  ;;  %v4286_v1 = vsel %vm1543_vm4, %v4270_v7, %v3948_v2  ;;  %p6891_p1 = pneg %p6890_p0 }
 0x378   : > { %v3822_v15 = vpop.permute.xlu0 %3821  ;;  %v3240_v3 = vmax.f32 %v3206_v26, 0.0  ;;  %v4302_v29 = vsel %vm1560_vm5, %v4286_v1, %v4012_v56  ;;  %v5047_v41 = vadd.f32 %v5046_v27, %v5045_v30  ;;  %v6283_v30 = vld [vmem:[%s10339_s5 + $0x870] sm:$0xff] }
 0x379   : > { %v3241_v48 = vmax.f32 %v3208_v6, 0.0  ;;  %v4318_v60 = vsel %vm1577_vm6, %v4302_v29, %v4076_v17  ;;  %v4255_v58 = vsel %vm1509_vm2, %v4239_v18, %v3822_v15  ;;  %v6275_v18 = vld [vmem:[%s10339_s5 + $0x830] sm:$0xff]  ;;  %p6898_p6 = pnand %p6897_p5, %p6891_p1 }
 0x37b   : > { %3493 = vmatprep.mubr.f32.mxu1 %v3241_v48  ;;  %v4140_v12 = vpop.permute.xlu1 %4139 }
 0x37c   : > { %v3886_v51 = vpop.permute.xlu0 %3885  ;;  %3494 = vmatmul.mubr.f32.gmra.mrb[30].mxu1 %v3240_v3  ;;  %v4334_v24 = vsel %vm1594_vm7, %v4318_v60, %v4140_v12 }
 0x37d   : > { %v4271_v63 = vsel %vm1526_vm3, %v4255_v58, %v3886_v51  ;;  %v5049_v51 = vmul.f32 0.00390625, %v5047_v41 }
 0x37f   : > { %v4204_v19 = vpop.permute.xlu1 %4203 }
 0x380   : > { %v3950_v49 = vpop.permute.xlu0 %3949  ;;  %v4350_v42 = vsel %vm1611_vm8, %v4334_v24, %v4204_v19 }
 0x381   : > { %6166 = vmatmul.mubr.msk.f32.gmra.mrb[122].mxu0 %vm1651_vm9, %v4350_v42  ;;  %v4287_v20 = vsel %vm1543_vm4, %v4271_v63, %v3950_v49  ;;  %v6272_v42 = vld [vmem:[%s10339_s5 + $0x818] sm:$0xff]  ;;  %v6279_v63 = vld [vmem:[%s10339_s5 + $0x850] sm:$0xff] }
 0x382   : > { %4579 = vmatprep.mubr.f32.mxu0 %v10386_v47 }
 0x383   : > { %v4014_v22 = vpop.permute.xlu1 %4013 }
 0x384   : > { %v3760_v35 = vpop.permute.xlu0 %3759  ;;  %v4497_v23 = vpop.f32.mrb[96].mxu0  ;;  %v4303_v34 = vsel %vm1560_vm5, %v4287_v20, %v4014_v22  ;;  %v6284_v20 = vld [vmem:[%s10339_s5 + $0x878] sm:$0xff] }
 0x385   : > { %v4498_v11 = vadd.f32 %v4497_v23, %v9892_v9  ;;  %v4499_v54 = vpop.f32.mrb[97].mxu0  ;;  %v4240_v56 = vsel %vm327_vm1, %v3581_v40, %v3760_v35  ;;  %v6269_v35 = vld [vmem:[%s10339_s5 + $0x800] sm:$0xff]  ;;  %v6271_v23 = vld [vmem:[%s10339_s5 + $0x810] sm:$0xff] }
 0x386   : > { %v4500_v31 = vadd.f32 %v4499_v54, %v9896_v37  ;;  %v6630_v50 = vpack.c.bf16 %v6271_v23, %v6269_v35  ;;  %v6301_v35 = vld [vmem:[%s10339_s5 + $0x900] sm:$0xff]  ;;  %v6303_v23 = vld [vmem:[%s10339_s5 + $0x910] sm:$0xff] }
 0x387   : > { %v4078_v52 = vpop.permute.xlu1 %4077  ;;  %v4592_v38 = vmax.f32 %v4498_v11, 0.0 }
 0x388   : > { %v3824_v62 = vpop.permute.xlu0 %3823  ;;  %v4593_v57 = vmax.f32 %v4500_v31, 0.0  ;;  %v4319_v2 = vsel %vm1577_vm6, %v4303_v34, %v4078_v52  ;;  %v6276_v31 = vld [vmem:[%s10339_s5 + $0x838] sm:$0xff]  ;;  %v6638_v34 = vpack.c.bf16 %v6279_v63, %v6277_v5  ;;  %v6309_v63 = vld [vmem:[%s10339_s5 + $0x940] sm:$0xff] }
 0x389   : > { %v4256_v13 = vsel %vm1509_vm2, %v4240_v56, %v3824_v62  ;;  %v6632_v52 = vpack.c.bf16 %v6276_v31, %v6274_v36  ;;  %v6273_v62 = vld [vmem:[%s10339_s5 + $0x820] sm:$0xff]  ;;  %v6306_v36 = vld [vmem:[%s10339_s5 + $0x928] sm:$0xff]  ;;  %v6308_v31 = vld [vmem:[%s10339_s5 + $0x938] sm:$0xff] }
 0x38a   : > { %4785 = vmatprep.mubr.f32.mxu1 %v4593_v57  ;;  %v6278_v57 = vld [vmem:[%s10339_s5 + $0x848] sm:$0xff]  ;;  %v6634_v58 = vpack.c.bf16 %v6275_v18, %v6273_v62  ;;  %v6305_v62 = vld [vmem:[%s10339_s5 + $0x920] sm:$0xff]  ;;  %v6307_v18 = vld [vmem:[%s10339_s5 + $0x930] sm:$0xff] }
 0x38b   : > { %v4142_v16 = vpop.permute.xlu1 %4141  ;;  %4786 = vmatmul.mubr.f32.vlgmr.msra.gmra.mrb[0].mxu1 %v4592_v38  ;;  %v6280_v38 = vld [vmem:[%s10339_s5 + $0x858] sm:$0xff] }
 0x38c   : > { %v3888_v8 = vpop.permute.xlu0 %3887  ;;  %v4335_v28 = vsel %vm1594_vm7, %v4319_v2, %v4142_v16  ;;  %v6636_v16 = vpack.c.bf16 %v6280_v38, %v6278_v57  ;;  %v6281_v2 = vld [vmem:[%s10339_s5 + $0x860] sm:$0xff]  ;;  %v6666_v57 = vpack.c.bf16 %v6307_v18, %v6305_v62  ;;  %v6312_v38 = vld [vmem:[%s10339_s5 + $0x958] sm:$0xff] }
 0x38d   : > { %v4272_v44 = vsel %vm1526_vm3, %v4256_v13, %v3888_v8  ;;  %v6282_v8 = vld [vmem:[%s10339_s5 + $0x868] sm:$0xff]  ;;  %v6288_v13 = vld [vmem:[%s10339_s5 + $0x898] sm:$0xff] }
 0x38e   : > { %v6640_v40 = vpack.c.bf16 %v6284_v20, %v6282_v8  ;;  %v6314_v20 = vld [vmem:[%s10339_s5 + $0x968] sm:$0xff] }
 0x38f   : > { %v4206_v43 = vpop.permute.xlu1 %4205 }
 0x390   : > { %v3952_v39 = vpop.permute.xlu0 %3951  ;;  %v4351_v25 = vsel %vm1611_vm8, %v4335_v28, %v4206_v43  ;;  %v6642_v28 = vpack.c.bf16 %v6283_v30, %v6281_v2  ;;  %v6313_v2 = vld [vmem:[%s10339_s5 + $0x960] sm:$0xff]  ;;  %v6315_v30 = vld [vmem:[%s10339_s5 + $0x970] sm:$0xff] }
 0x391   : > { %6167 = vmatmul.mubr.msk.f32.gmra.mrb[124].mxu0 %vm1651_vm9, %v4351_v25  ;;  %v4288_v14 = vsel %vm1543_vm4, %v4272_v44, %v3952_v39  ;;  %v6286_v25 = vld [vmem:[%s10339_s5 + $0x888] sm:$0xff] }
 0x392   : > { %4585 = vmatprep.mubr.f32.mxu0 %v10386_v47  ;;  %v6644_v27 = vpack.c.bf16 %v6288_v13, %v6286_v25  ;;  %v6318_v25 = vld [vmem:[%s10339_s5 + $0x988] sm:$0xff]  ;;  %v6320_v13 = vld [vmem:[%s10339_s5 + $0x998] sm:$0xff] }
 0x393   : > { %v4080_v10 = vpop.permute.xlu1 %4079 }
 0x394   : > { %v4016_v26 = vpop.permute.xlu0 %4015  ;;  %v4503_v6 = vpop.f32.mrb[98].mxu0 }
 0x395   : > { %v4304_v46 = vsel %vm1560_vm5, %v4288_v14, %v4016_v26  ;;  %v4504_v17 = vadd.f32 %v4503_v6, %v9892_v9  ;;  %v4505_v15 = vpop.f32.mrb[99].mxu0  ;;  %v6285_v14 = vld [vmem:[%s10339_s5 + $0x880] sm:$0xff]  ;;  %v6287_v26 = vld [vmem:[%s10339_s5 + $0x890] sm:$0xff] }
 0x396   : > { %v4320_v0 = vsel %vm1577_vm6, %v4304_v46, %v4080_v10  ;;  %v4506_v53 = vadd.f32 %v4505_v15, %v9896_v37  ;;  %v6646_v46 = vpack.c.bf16 %v6287_v26, %v6285_v14  ;;  %v6292_v15 = vld [vmem:[%s10339_s5 + $0x8b8] sm:$0xff]  ;;  %v6317_v14 = vld [vmem:[%s10339_s5 + $0x980] sm:$0xff]  ;;  %v6319_v26 = vld [vmem:[%s10339_s5 + $0x990] sm:$0xff] }
 0x397   : > { %v4208_v3 = vpop.permute.xlu1 %4207  ;;  %v4594_v12 = vmax.f32 %v4504_v17, 0.0  ;;  %v6290_v17 = vld [vmem:[%s10339_s5 + $0x8a8] sm:$0xff] }
 0x398   : > { %v4144_v48 = vpop.permute.xlu0 %4143  ;;  %v4595_v4 = vmax.f32 %v4506_v53, 0.0  ;;  %v6648_v41 = vpack.c.bf16 %v6292_v15, %v6290_v17  ;;  %v6291_v53 = vld [vmem:[%s10339_s5 + $0x8b0] sm:$0xff]  ;;  %v6322_v17 = vld [vmem:[%s10339_s5 + $0x9a8] sm:$0xff]  ;;  %v6324_v15 = vld [vmem:[%s10339_s5 + $0x9b8] sm:$0xff] }
 0x399   : > { %v4336_v61 = vsel %vm1594_vm7, %v4320_v0, %v4144_v48  ;;  %v6289_v0 = vld [vmem:[%s10339_s5 + $0x8a0] sm:$0xff]  ;;  %v6294_v48 = vld [vmem:[%s10339_s5 + $0x8c8] sm:$0xff] }
 0x39a   : > { %v4352_v7 = vsel %vm1611_vm8, %v4336_v61, %v4208_v3  ;;  %4791 = vmatprep.mubr.f32.mxu1 %v4595_v4  ;;  %v6650_v61 = vpack.c.bf16 %v6291_v53, %v6289_v0  ;;  %v6296_v3 = vld [vmem:[%s10339_s5 + $0x8d8] sm:$0xff]  ;;  %v6293_v4 = vld [vmem:[%s10339_s5 + $0x8c0] sm:$0xff]  ;;  %v6323_v53 = vld [vmem:[%s10339_s5 + $0x9b0] sm:$0xff] }
 0x39b   : > { %6168 = vmatmul.mubr.msk.f32.gmra.mrb[126].mxu0 %vm1651_vm9, %v4352_v7  ;;  %4792 = vmatmul.mubr.f32.gmra.mrb[2].mxu1 %v4594_v12  ;;  %v6295_v7 = vld [vmem:[%s10339_s5 + $0x8d0] sm:$0xff]  ;;  %v6652_v12 = vpack.c.bf16 %v6296_v3, %v6294_v48  ;;  %v6321_v0 = vld [vmem:[%s10339_s5 + $0x9a0] sm:$0xff]  ;;  %v6328_v3 = vld [vmem:[%s10339_s5 + $0x9d8] sm:$0xff] }
 0x39c   : > { %5137 = vmatprep.mubr.f32.mxu0 %v10386_v47  ;;  %v6270_v47 = vld [vmem:[%s10339_s5 + $0x808] sm:$0xff]  ;;  %v6682_v48 = vpack.c.bf16 %v6323_v53, %v6321_v0 }
 0x39d   : > { %v6628_v22 = vpack.c.bf16 %v6272_v42, %v6270_v47  ;;  %v6302_v47 = vld [vmem:[%s10339_s5 + $0x908] sm:$0xff]  ;;  %v6304_v42 = vld [vmem:[%s10339_s5 + $0x918] sm:$0xff] }
 0x39f   : > { %6268 = vmatmul.mubr.msk.f32.vlgmr.msra.gmra.mrb[128].mxu0 %vm327_vm1, %v5049_v51  ;;  %6629 = vmatprep.subr.bf16.mxu1 %v6628_v22  ;;  %v6298_v51 = vld [vmem:[%s10339_s5 + $0x8e8] sm:$0xff]  ;;  %v6660_v22 = vpack.c.bf16 %v6304_v42, %v6302_v47 }
 0x3a0   : > { %6631 = vmatpush1.bf16.msra.mxu1 %v6630_v50  ;;  %v6662_v50 = vpack.c.bf16 %v6303_v23, %v6301_v35 }
 0x3a1   : > { %6633 = vmatprep.subr.bf16.mxu1 %v6632_v52  ;;  %v6664_v52 = vpack.c.bf16 %v6308_v31, %v6306_v36 }
 0x3a4   : > { %v4509_v59 = vpop.f32.mrb[100].mxu0  ;;  %6635 = vmatpush1.bf16.msra.mxu1 %v6634_v58  ;;  %v6310_v58 = vld [vmem:[%s10339_s5 + $0x948] sm:$0xff] }
 0x3a5   : > { %v4510_v1 = vadd.f32 %v4509_v59, %v9892_v9  ;;  %v4511_v29 = vpop.f32.mrb[101].mxu0  ;;  %6637 = vmatprep.subr.bf16.mxu1 %v6636_v16  ;;  %v6300_v59 = vld [vmem:[%s10339_s5 + $0x8f8] sm:$0xff]  ;;  %v6668_v5 = vpack.c.bf16 %v6312_v38, %v6310_v58  ;;  %v6311_v16 = vld [vmem:[%s10339_s5 + $0x950] sm:$0xff] }
 0x3a6   : > { %v4512_v60 = vadd.f32 %v4511_v29, %v9896_v37  ;;  %v6656_v29 = vpack.c.bf16 %v6300_v59, %v6298_v51  ;;  %v6670_v8 = vpack.c.bf16 %v6311_v16, %v6309_v63  ;;  %v6330_v59 = vld [vmem:[%s10339_s5 + $0x9e8] sm:$0xff] }
 0x3a7   : > { %v4596_v24 = vmax.f32 %v4510_v1, 0.0  ;;  %v6654_v1 = vpack.c.bf16 %v6295_v7, %v6293_v4  ;;  %v6325_v7 = vld [vmem:[%s10339_s5 + $0x9c0] sm:$0xff] }
 0x3a8   : > { %v4597_v32 = vmax.f32 %v4512_v60, 0.0  ;;  %6639 = vmatpush1.bf16.msra.mxu1 %v6638_v34  ;;  %v6297_v60 = vld [vmem:[%s10339_s5 + $0x8e0] sm:$0xff]  ;;  %v6316_v34 = vld [vmem:[%s10339_s5 + $0x978] sm:$0xff] }
 0x3a9   : > { %6641 = vmatprep.subr.bf16.mxu1 %v6640_v40  ;;  %v6672_v40 = vpack.c.bf16 %v6316_v34, %v6314_v20 }
 0x3aa   : > { %4797 = vmatprep.mubr.f32.mxu1 %v4597_v32  ;;  %v6299_v32 = vld [vmem:[%s10339_s5 + $0x8f0] sm:$0xff] }
 0x3ab   : > { %4798 = vmatmul.mubr.f32.gmra.mrb[4].mxu1 %v4596_v24  ;;  %v6658_v24 = vpack.c.bf16 %v6299_v32, %v6297_v60  ;;  %v6329_v60 = vld [vmem:[%s10339_s5 + $0x9e0] sm:$0xff]  ;;  %v6331_v32 = vld [vmem:[%s10339_s5 + $0x9f0] sm:$0xff] }
 0x3ac   : > { %6643 = vmatpush1.bf16.msra.mxu1 %v6642_v28  ;;  %v6674_v28 = vpack.c.bf16 %v6315_v30, %v6313_v2 }
 0x3ad   : > { %6645 = vmatprep.subr.bf16.mxu1 %v6644_v27  ;;  %v6676_v27 = vpack.c.bf16 %v6320_v13, %v6318_v25 }
 0x3b0   : > { %6647 = vmatpush1.bf16.msra.mxu1 %v6646_v46  ;;  %v6678_v46 = vpack.c.bf16 %v6319_v26, %v6317_v14 }
 0x3b1   : > { %6649 = vmatprep.subr.bf16.mxu1 %v6648_v41  ;;  %v6680_v41 = vpack.c.bf16 %v6324_v15, %v6322_v17 }
 0x3b4   : > { %v4515_v19 = vpop.f32.mrb[102].mxu0  ;;  %6651 = vmatpush1.bf16.msra.mxu1 %v6650_v61  ;;  %v6326_v61 = vld [vmem:[%s10339_s5 + $0x9c8] sm:$0xff] }
 0x3b5   : > { %v4516_v49 = vadd.f32 %v4515_v19, %v9892_v9  ;;  %v4517_v45 = vpop.f32.mrb[103].mxu0  ;;  %6653 = vmatprep.subr.bf16.mxu1 %v6652_v12  ;;  %v6684_v4 = vpack.c.bf16 %v6328_v3, %v6326_v61  ;;  %v6327_v12 = vld [vmem:[%s10339_s5 + $0x9d0] sm:$0xff] }
 0x3b6   : > { %v4518_v55 = vadd.f32 %v4517_v45, %v9896_v37  ;;  %v6686_v51 = vpack.c.bf16 %v6327_v12, %v6325_v7 }
 0x3b7   : > { %v4598_v54 = vmax.f32 %v4516_v49, 0.0 }
 0x3b8   : > { %v4599_v11 = vmax.f32 %v4518_v55, 0.0  ;;  %6655 = vmatpush1.bf16.msra.mxu1 %v6654_v1  ;;  %v6332_v1 = vld [vmem:[%s10339_s5 + $0x9f8] sm:$0xff] }
 0x3b9   : > { %6657 = vmatprep.subr.bf16.mxu1 %v6656_v29  ;;  %v6688_v29 = vpack.c.bf16 %v6332_v1, %v6330_v59 }
 0x3ba   : > { %4803 = vmatprep.mubr.f32.mxu1 %v4599_v11 }
 0x3bb   : > { %4804 = vmatmul.mubr.f32.gmra.mrb[6].mxu1 %v4598_v54 }
 0x3bc   : > { %6659 = vmatpush1.bf16.msra.mxu1 %v6658_v24 }
 0x3bd   : > { %6661 = vmatprep.subr.bf16.mxu1 %v6660_v22 }
 0x3c0   : > { %6663 = vmatpush1.bf16.msra.mxu1 %v6662_v50 }
 0x3c1   : > { %6665 = vmatprep.subr.bf16.mxu1 %v6664_v52 }
 0x3c4   : > { %v4521_v43 = vpop.f32.mrb[104].mxu0  ;;  %6667 = vmatpush1.bf16.msra.mxu1 %v6666_v57 }
 0x3c5   : > { %v4522_v39 = vadd.f32 %v4521_v43, %v9892_v9  ;;  %v4523_v56 = vpop.f32.mrb[105].mxu0  ;;  %6669 = vmatprep.subr.bf16.mxu1 %v6668_v5 }
 0x3c6   : > { %v4524_v44 = vadd.f32 %v4523_v56, %v9896_v37 }
 0x3c7   : > { %v4600_v6 = vmax.f32 %v4522_v39, 0.0 }
 0x3c8   : > { %v4601_v10 = vmax.f32 %v4524_v44, 0.0  ;;  %6671 = vmatpush1.bf16.msra.mxu1 %v6670_v8 }
 0x3c9   : > { %6673 = vmatprep.subr.bf16.mxu1 %v6672_v40 }
 0x3ca   : > { %4809 = vmatprep.mubr.f32.mxu1 %v4601_v10 }
 0x3cb   : > { %4810 = vmatmul.mubr.f32.gmra.mrb[8].mxu1 %v4600_v6 }
 0x3cc   : > { %6675 = vmatpush1.bf16.msra.mxu1 %v6674_v28 }
 0x3cd   : > { %6677 = vmatprep.subr.bf16.mxu1 %v6676_v27 }
 0x3d0   : > { %6679 = vmatpush1.bf16.msra.mxu1 %v6678_v46 }
 0x3d1   : > { %6681 = vmatprep.subr.bf16.mxu1 %v6680_v41 }
 0x3d4   : > { %v4527_v19 = vpop.f32.mrb[106].mxu0  ;;  %6683 = vmatpush1.bf16.msra.mxu1 %v6682_v48 }
 0x3d5   : > { %v4528_v49 = vadd.f32 %v4527_v19, %v9892_v9  ;;  %v4529_v45 = vpop.f32.mrb[107].mxu0  ;;  %6685 = vmatprep.subr.bf16.mxu1 %v6684_v4  ;;  %v6690_v19 = vpack.c.bf16 %v6331_v32, %v6329_v60  ;;  %v6265_v4 = vld [vmem:[%s10338_s4 + $0x4] ss:$8 sm:$0x3] }
 0x3d6   : > { %v4530_v55 = vadd.f32 %v4529_v45, %v9896_v37  ;;  %v5059_v59 = vrot.slane %v6265_v4, %v7867_v21  ;;  %v5063_v60 = vrot.slane %v6265_v4, %v7876_v33 }
 0x3d7   : > { %v4602_v54 = vmax.f32 %v4528_v49, 0.0 }
 0x3d8   : > { %v4603_v11 = vmax.f32 %v4530_v55, 0.0  ;;  %6687 = vmatpush1.bf16.msra.mxu1 %v6686_v51 }
 0x3d9   : > { %6689 = vmatprep.subr.bf16.mxu1 %v6688_v29 }
 0x3da   : > { %4815 = vmatprep.mubr.f32.mxu1 %v4603_v11 }
 0x3db   : > { %4816 = vmatmul.mubr.f32.gmra.mrb[10].mxu1 %v4602_v54 }
 0x3dc   : > { %6691 = vmatpush1.bf16.msra.mxu1 %v6690_v19 }
 0x3e4   : > { %v4533_v43 = vpop.f32.mrb[108].mxu0 }
 0x3e5   : > { %v4534_v39 = vadd.f32 %v4533_v43, %v9892_v9  ;;  %v4535_v56 = vpop.f32.mrb[109].mxu0 }
 0x3e6   : > { %v4536_v44 = vadd.f32 %v4535_v56, %v9896_v37 }
 0x3e7   : > { %v4604_v6 = vmax.f32 %v4534_v39, 0.0 }
 0x3e8   : > { %v4605_v10 = vmax.f32 %v4536_v44, 0.0 }
 0x3ea   : > { %4821 = vmatprep.mubr.f32.mxu1 %v4605_v10 }
 0x3eb   : > { %4822 = vmatmul.mubr.f32.gmra.mrb[12].mxu1 %v4604_v6 }
 0x3f4   : > { %v4539_v24 = vpop.f32.mrb[110].mxu0 }
 0x3f5   : > { %v4540_v49 = vadd.f32 %v4539_v24, %v9892_v9  ;;  %v4541_v45 = vpop.f32.mrb[111].mxu0 }
 0x3f6   : > { %v4542_v47 = vadd.f32 %v4541_v45, %v9896_v37 }
 0x3f7   : > { %v4606_v55 = vmax.f32 %v4540_v49, 0.0 }
 0x3f8   : > { %v4607_v42 = vmax.f32 %v4542_v47, 0.0 }
 0x3fa   : > { %4827 = vmatprep.mubr.f32.mxu1 %v4607_v42 }
 0x3fb   : > { %4828 = vmatmul.mubr.f32.gmra.mrb[14].mxu1 %v4606_v55 }
 0x404   : > { %v4545_v22 = vpop.f32.mrb[112].mxu0 }
 0x405   : > { %v4546_v35 = vadd.f32 %v4545_v22, %v9892_v9  ;;  %v4547_v23 = vpop.f32.mrb[113].mxu0 }
 0x406   : > { %v4548_v50 = vadd.f32 %v4547_v23, %v9896_v37 }
 0x407   : > { %v4608_v54 = vmax.f32 %v4546_v35, 0.0 }
 0x408   : > { %v4609_v11 = vmax.f32 %v4548_v50, 0.0 }
 0x40a   : > { %4833 = vmatprep.mubr.f32.mxu1 %v4609_v11 }
 0x40b   : > { %4834 = vmatmul.mubr.f32.gmra.mrb[16].mxu1 %v4608_v54 }
 0x414   : > { %v4551_v36 = vpop.f32.mrb[114].mxu0 }
 0x415   : > { %v4552_v31 = vadd.f32 %v4551_v36, %v9892_v9  ;;  %v4553_v52 = vpop.f32.mrb[115].mxu0 }
 0x416   : > { %v4554_v62 = vadd.f32 %v4553_v52, %v9896_v37 }
 0x417   : > { %v4610_v57 = vmax.f32 %v4552_v31, 0.0 }
 0x418   : > { %v4611_v18 = vmax.f32 %v4554_v62, 0.0 }
 0x41a   : > { %4839 = vmatprep.mubr.f32.mxu1 %v4611_v18 }
 0x41b   : > { %4840 = vmatmul.mubr.f32.gmra.mrb[18].mxu1 %v4610_v57 }
 0x424   : > { %v4557_v58 = vpop.f32.mrb[116].mxu0 }
 0x425   : > { %v4558_v38 = vadd.f32 %v4557_v58, %v9892_v9  ;;  %v4559_v5 = vpop.f32.mrb[117].mxu0 }
 0x426   : > { %v4560_v63 = vadd.f32 %v4559_v5, %v9896_v37 }
 0x427   : > { %v4612_v8 = vmax.f32 %v4558_v38, 0.0 }
 0x428   : > { %v4613_v16 = vmax.f32 %v4560_v63, 0.0 }
 0x42a   : > { %4845 = vmatprep.mubr.f32.mxu1 %v4613_v16 }
 0x42b   : > { %4846 = vmatmul.mubr.f32.gmra.mrb[20].mxu1 %v4612_v8 }
 0x434   : > { %v4563_v20 = vpop.f32.mrb[118].mxu0 }
 0x435   : > { %v4564_v34 = vadd.f32 %v4563_v20, %v9892_v9  ;;  %v4565_v40 = vpop.f32.mrb[119].mxu0 }
 0x436   : > { %v4566_v2 = vadd.f32 %v4565_v40, %v9896_v37 }
 0x437   : > { %v4614_v28 = vmax.f32 %v4564_v34, 0.0 }
 0x438   : > { %v4615_v30 = vmax.f32 %v4566_v2, 0.0 }
 0x43a   : > { %4851 = vmatprep.mubr.f32.mxu1 %v4615_v30 }
 0x43b   : > { %4852 = vmatmul.mubr.f32.gmra.mrb[22].mxu1 %v4614_v28 }
 0x444   : > { %v4569_v43 = vpop.f32.mrb[120].mxu0 }
 0x445   : > { %v4570_v39 = vadd.f32 %v4569_v43, %v9892_v9  ;;  %v4571_v56 = vpop.f32.mrb[121].mxu0 }
 0x446   : > { %v4572_v25 = vadd.f32 %v4571_v56, %v9896_v37 }
 0x447   : > { %v4616_v44 = vmax.f32 %v4570_v39, 0.0  ;;  %v5211_v39 = vld [vmem:[%s10340_s6] sm:$0x3] }
 0x448   : > { %v4617_v13 = vmax.f32 %v4572_v25, 0.0 }
 0x44a   : > { %4857 = vmatprep.mubr.f32.mxu1 %v4617_v13  ;;  %v5216_v13 = vrot.slane %v5211_v39, %v7867_v21 }
 0x44b   : > { %4858 = vmatmul.mubr.f32.gmra.mrb[24].mxu1 %v4616_v44  ;;  %v5220_v44 = vrot.slane %v5211_v39, %v7876_v33 }
 0x454   : > { %v4575_v27 = vpop.f32.mrb[122].mxu0 }
 0x455   : > { %v4576_v14 = vadd.f32 %v4575_v27, %v9892_v9  ;;  %v4577_v26 = vpop.f32.mrb[123].mxu0 }
 0x456   : > { %v4578_v46 = vadd.f32 %v4577_v26, %v9896_v37 }
 0x457   : > { %v4618_v6 = vmax.f32 %v4576_v14, 0.0 }
 0x458   : > { %v4619_v10 = vmax.f32 %v4578_v46, 0.0 }
 0x45a   : > { %4863 = vmatprep.mubr.f32.mxu1 %v4619_v10 }
 0x45b   : > { %4864 = vmatmul.mubr.f32.gmra.mrb[26].mxu1 %v4618_v6 }
 0x45e   : > { %v10141_v17 = vpop.f32.mrb[0].mxu1 }
 0x45f   : > { %v10143_v15 = vpop.f32.mrb[1].mxu1 }
 0x464   : > { %v4581_v41 = vpop.f32.mrb[124].mxu0 }
 0x465   : > { %v4582_v0 = vadd.f32 %v4581_v41, %v9892_v9  ;;  %v4583_v53 = vpop.f32.mrb[125].mxu0 }
 0x466   : > { %v4584_v48 = vadd.f32 %v4583_v53, %v9896_v37 }
 0x467   : > { %v4620_v3 = vmax.f32 %v4582_v0, 0.0 }
 0x468   : > { %v4621_v61 = vmax.f32 %v4584_v48, 0.0 }
 0x46a   : > { %4869 = vmatprep.mubr.f32.mxu1 %v4621_v61 }
 0x46b   : > { %4870 = vmatmul.mubr.f32.gmra.mrb[28].mxu1 %v4620_v3 }
 0x46e   : > { %v4587_v7 = vpop.f32.mrb[126].mxu0  ;;  %v4793_v29 = vpop.f32.mrb[2].mxu1 }
 0x46f   : > { %v4588_v12 = vadd.f32 %v4587_v7, %v9892_v9  ;;  %v4589_v51 = vpop.f32.mrb[127].mxu0  ;;  %v10154_v32 = vpop.f32.mrb[3].mxu1 }
 0x470   : > { %v4590_v1 = vadd.f32 %v4589_v51, %v9896_v37 }
 0x471   : > { %v4622_v49 = vmax.f32 %v4588_v12, 0.0 }
 0x472   : > { %v4623_v24 = vmax.f32 %v4590_v1, 0.0  ;;  %v5139_v19 = vpop.f32.mrb[128].mxu0 }
 0x473   : > { %v5140_v45 = vadd.f32 %v5139_v19, %v5059_v59  ;;  %v5141_v47 = vpop.f32.mrb[129].mxu0 }
 0x474   : > { %v5142_v42 = vadd.f32 %v5141_v47, %v5063_v60  ;;  %4875 = vmatprep.mubr.f32.mxu1 %v4623_v24 }
 0x475   : > { %4876 = vmatmul.mubr.f32.gmra.mrb[30].mxu1 %v4622_v49  ;;  %v5144_v9 = vmax.f32 %v5140_v45, 0.0 }
 0x476   : > { %v5145_v55 = vmax.f32 %v5142_v42, 0.0 }
 0x478   : > { %5287 = vmatprep.mubr.f32.mxu1 %v5145_v55 }
 0x479   : > { %5288 = vmatmul.mubr.f32.vlgmr.msra.gmra.mrb[32].mxu1 %v5144_v9 }
 0x47e   : > { %v4799_v22 = vpop.f32.mrb[4].mxu1 }
 0x47f   : > { %v10156_v35 = vpop.f32.mrb[5].mxu1 }
 0x48e   : > { %v4805_v37 = vpop.f32.mrb[6].mxu1 }
 0x48f   : > { %v10158_v23 = vpop.f32.mrb[7].mxu1 }
 0x49e   : > { %v4811_v50 = vpop.f32.mrb[8].mxu1 }
 0x49f   : > { %v10160_v11 = vpop.f32.mrb[9].mxu1 }
 0x4ae   : > { %v4817_v54 = vpop.f32.mrb[10].mxu1 }
 0x4af   : > { %v10162_v36 = vpop.f32.mrb[11].mxu1 }
 0x4be   : > { %v4823_v31 = vpop.f32.mrb[12].mxu1 }
 0x4bf   : > { %v10164_v52 = vpop.f32.mrb[13].mxu1 }
 0x4ce   : > { %v4829_v62 = vpop.f32.mrb[14].mxu1 }
 0x4cf   : > { %v10166_v18 = vpop.f32.mrb[15].mxu1 }
 0x4de   : > { %v4835_v57 = vpop.f32.mrb[16].mxu1 }
 0x4df   : > { %v10168_v58 = vpop.f32.mrb[17].mxu1 }
 0x4ee   : > { %v4841_v38 = vpop.f32.mrb[18].mxu1 }
 0x4ef   : > { %v10170_v5 = vpop.f32.mrb[19].mxu1 }
 0x4fe   : > { %v4847_v63 = vpop.f32.mrb[20].mxu1 }
 0x4ff   : > { %v10172_v16 = vpop.f32.mrb[21].mxu1 }
 0x50e   : > { %v4853_v8 = vpop.f32.mrb[22].mxu1 }
 0x50f   : > { %v10174_v20 = vpop.f32.mrb[23].mxu1 }
 0x51e   : > { %v4859_v34 = vpop.f32.mrb[24].mxu1 }
 0x51f   : > { %v10176_v40 = vpop.f32.mrb[25].mxu1 }
 0x52e   : > { %v4865_v2 = vpop.f32.mrb[26].mxu1 }
 0x52f   : > { %v10178_v30 = vpop.f32.mrb[27].mxu1 }
 0x53e   : > { %v4871_v28 = vpop.f32.mrb[28].mxu1 }
 0x53f   : > { %v10180_v43 = vpop.f32.mrb[29].mxu1 }
 0x548   : > { %v4877_v56 = vpop.f32.mrb[30].mxu1 }
 0x549   : > { %v10185_v25 = vpop.f32.mrb[31].mxu1 }
 0x54c   : > { %v5289_v27 = vpop.f32.mrb[32].mxu1 }
 0x54d   : > { %v5290_v14 = vadd.f32 %v5289_v27, %v5216_v13  ;;  %v5291_v26 = vpop.f32.mrb[33].mxu1 }
 0x54e   : > { %v5292_v46 = vadd.f32 %v5291_v26, %v5220_v44 }
 0x54f   : > { %v5329_v10 = vrot.slane %v5290_v14, %v7867_v21 }
 0x550   : > { %v10192_v6 = vrot.slane %v5292_v46, %v7867_v21 }
 0x551   : > { %v5334_v41 = vadd.f32 %v5329_v10, %v10141_v17  ;;  %v5336_v0 = vadd.f32 %v5329_v10, %v4793_v29  ;;  %v5338_v53 = vadd.f32 %v5329_v10, %v4799_v22  ;;  %v5340_v48 = vadd.f32 %v5329_v10, %v4805_v37 }
 0x552   : > { %v5342_v61 = vadd.f32 %v5329_v10, %v4811_v50  ;;  %v5344_v33 = vadd.f32 %v5329_v10, %v4817_v54  ;;  %v5346_v3 = vadd.f32 %v5329_v10, %v4823_v31  ;;  %v5348_v4 = vadd.f32 %v5329_v10, %v4829_v62 }
 0x553   : > { %v5350_v7 = vadd.f32 %v5329_v10, %v4835_v57  ;;  %v5352_v12 = vadd.f32 %v5329_v10, %v4841_v38  ;;  %v5354_v51 = vadd.f32 %v5329_v10, %v4847_v63  ;;  %v5356_v59 = vadd.f32 %v5329_v10, %v4853_v8 }
 0x554   : > { %v5358_v21 = vadd.f32 %v5329_v10, %v4859_v34  ;;  %v5360_v1 = vadd.f32 %v5329_v10, %v4865_v2  ;;  %v5362_v60 = vadd.f32 %v5329_v10, %v4871_v28  ;;  %v5364_v24 = vadd.f32 %v5329_v10, %v4877_v56 }
 0x555   : > { %v5366_v19 = vmax.f32 %v5334_v41, 0.0  ;;  %v5368_v17 = vmax.f32 %v5336_v0, 0.0  ;;  %v5370_v29 = vmax.f32 %v5338_v53, 0.0  ;;  %v5372_v49 = vmax.f32 %v5340_v48, 0.0 }
 0x556   : > { %v5374_v45 = vmax.f32 %v5342_v61, 0.0  ;;  %v5376_v47 = vmax.f32 %v5344_v33, 0.0  ;;  %v5378_v42 = vmax.f32 %v5346_v3, 0.0  ;;  %v5380_v55 = vmax.f32 %v5348_v4, 0.0 }
 0x557   : > { %v5382_v9 = vmax.f32 %v5350_v7, 0.0  ;;  %v5384_v22 = vmax.f32 %v5352_v12, 0.0  ;;  %v5386_v37 = vmax.f32 %v5354_v51, 0.0  ;;  %v5388_v50 = vmax.f32 %v5356_v59, 0.0  ;;  %5398 = vst [vmem:[%s10202_s12] sm:$0xff] %v5366_v19  ;;  %5400 = vst [vmem:[%s10202_s12 + $0x10] sm:$0xff] %v5368_v17 }
 0x558   : > { %5402 = vst [vmem:[%s10202_s12 + $0x20] sm:$0xff] %v5370_v29  ;;  %5404 = vst [vmem:[%s10202_s12 + $0x30] sm:$0xff] %v5372_v49  ;;  %v5390_v54 = vmax.f32 %v5358_v21, 0.0  ;;  %v5392_v31 = vmax.f32 %v5360_v1, 0.0  ;;  %v5394_v62 = vmax.f32 %v5362_v60, 0.0  ;;  %v5396_v57 = vmax.f32 %v5364_v24, 0.0 }
 0x559   : > { %5406 = vst [vmem:[%s10202_s12 + $0x40] sm:$0xff] %v5374_v45  ;;  %5408 = vst [vmem:[%s10202_s12 + $0x50] sm:$0xff] %v5376_v47  ;;  %v5335_v38 = vadd.f32 %v10192_v6, %v10143_v15  ;;  %v5337_v63 = vadd.f32 %v10192_v6, %v10154_v32  ;;  %v5339_v8 = vadd.f32 %v10192_v6, %v10156_v35 }
 0x55a   : > { %5410 = vst [vmem:[%s10202_s12 + $0x60] sm:$0xff] %v5378_v42  ;;  %5412 = vst [vmem:[%s10202_s12 + $0x70] sm:$0xff] %v5380_v55  ;;  %v5341_v34 = vadd.f32 %v10192_v6, %v10158_v23  ;;  %v5343_v2 = vadd.f32 %v10192_v6, %v10160_v11  ;;  %v5345_v15 = vadd.f32 %v10192_v6, %v10162_v36 }
 0x55b   : > { %5414 = vst [vmem:[%s10202_s12 + $0x80] sm:$0xff] %v5382_v9  ;;  %5416 = vst [vmem:[%s10202_s12 + $0x90] sm:$0xff] %v5384_v22  ;;  %v5347_v32 = vadd.f32 %v10192_v6, %v10164_v52  ;;  %v5349_v35 = vadd.f32 %v10192_v6, %v10166_v18  ;;  %v5351_v23 = vadd.f32 %v10192_v6, %v10168_v58 }
 0x55c   : > { %5418 = vst [vmem:[%s10202_s12 + $0xa0] sm:$0xff] %v5386_v37  ;;  %5420 = vst [vmem:[%s10202_s12 + $0xb0] sm:$0xff] %v5388_v50  ;;  %v5353_v28 = vadd.f32 %v10192_v6, %v10170_v5  ;;  %v5355_v39 = vadd.f32 %v10192_v6, %v10172_v16  ;;  %v5357_v11 = vadd.f32 %v10192_v6, %v10174_v20  ;;  %v5367_v5 = vmax.f32 %v5335_v38, 0.0 }
 0x55d   : > { %5422 = vst [vmem:[%s10202_s12 + $0xc0] sm:$0xff] %v5390_v54  ;;  %5424 = vst [vmem:[%s10202_s12 + $0xd0] sm:$0xff] %v5392_v31  ;;  %v5359_v36 = vadd.f32 %v10192_v6, %v10176_v40  ;;  %v5361_v52 = vadd.f32 %v10192_v6, %v10178_v30  ;;  %v5363_v18 = vadd.f32 %v10192_v6, %v10180_v43  ;;  %v5369_v16 = vmax.f32 %v5337_v63, 0.0 }
 0x55e   : > { %5426 = vst [vmem:[%s10202_s12 + $0xe0] sm:$0xff] %v5394_v62  ;;  %5428 = vst [vmem:[%s10202_s12 + $0xf0] sm:$0xff] %v5396_v57  ;;  %v5365_v58 = vadd.f32 %v10192_v6, %v10185_v25  ;;  %v5371_v20 = vmax.f32 %v5339_v8, 0.0  ;;  %v5373_v56 = vmax.f32 %v5341_v34, 0.0  ;;  %v5375_v40 = vmax.f32 %v5343_v2, 0.0 }
 0x55f   : > { %v5377_v13 = vmax.f32 %v5345_v15, 0.0  ;;  %v5379_v30 = vmax.f32 %v5347_v32, 0.0  ;;  %v5381_v44 = vmax.f32 %v5349_v35, 0.0  ;;  %v5383_v43 = vmax.f32 %v5351_v23, 0.0  ;;  %5399 = vst [vmem:[%s10202_s12 + $0x8] sm:$0xff] %v5367_v5  ;;  %5401 = vst [vmem:[%s10202_s12 + $0x18] sm:$0xff] %v5369_v16 }
 0x560   : > { %v5385_v27 = vmax.f32 %v5353_v28, 0.0  ;;  %v5387_v25 = vmax.f32 %v5355_v39, 0.0  ;;  %v5389_v14 = vmax.f32 %v5357_v11, 0.0  ;;  %5403 = vst [vmem:[%s10202_s12 + $0x28] sm:$0xff] %v5371_v20  ;;  %5405 = vst [vmem:[%s10202_s12 + $0x38] sm:$0xff] %v5373_v56  ;;  %v5391_v26 = vmax.f32 %v5359_v36, 0.0 }
 0x561   : > { %v5393_v46 = vmax.f32 %v5361_v52, 0.0  ;;  %v5395_v10 = vmax.f32 %v5363_v18, 0.0  ;;  %v5397_v6 = vmax.f32 %v5365_v58, 0.0  ;;  %5407 = vst [vmem:[%s10202_s12 + $0x48] sm:$0xff] %v5375_v40  ;;  %5409 = vst [vmem:[%s10202_s12 + $0x58] sm:$0xff] %v5377_v13 }
 0x562   : > { %5411 = vst [vmem:[%s10202_s12 + $0x68] sm:$0xff] %v5379_v30  ;;  %5413 = vst [vmem:[%s10202_s12 + $0x78] sm:$0xff] %v5381_v44 }
 0x563   : > { %5415 = vst [vmem:[%s10202_s12 + $0x88] sm:$0xff] %v5383_v43  ;;  %5417 = vst [vmem:[%s10202_s12 + $0x98] sm:$0xff] %v5385_v27 }
 0x564   : > { %5419 = vst [vmem:[%s10202_s12 + $0xa8] sm:$0xff] %v5387_v25  ;;  %5421 = vst [vmem:[%s10202_s12 + $0xb8] sm:$0xff] %v5389_v14 }
 0x565   : > { %5423 = vst [vmem:[%s10202_s12 + $0xc8] sm:$0xff] %v5391_v26  ;;  %5425 = vst [vmem:[%s10202_s12 + $0xd8] sm:$0xff] %v5393_v46 }
 0x566   : > { %5427 = vst [vmem:[%s10202_s12 + $0xe8] sm:$0xff] %v5395_v10  ;;  %5429 = vst [vmem:[%s10202_s12 + $0xf8] sm:$0xff] %v5397_v6 }
 0x567   : > { %6901 = shalt.err (!%p6898_p6)
}
 0x568   : > { %s6902_s1 = scalar_lea.hbm %s10263_s0, 4096  ;;  %s6906_s20 = scalar_lea.hbm %s10341_s7, 16384 }
 0x569   : > { %p6903_p7 = scmp.ne.s32.totalorder %s10263_s0, %s6902_s1  ;;  %p6907_p11 = scmp.lt.u32.totalorder %s10263_s0, %s10341_s7 }
 0x56a   : > { %p6908_p12 = scmp.lt.u32.totalorder %s6906_s20, %s6902_s1  ;;  %p6910_p0 = scmp.lt.u32.totalorder %s6902_s1, %s10263_s0 }
 0x56b   : > { %p6904_p9 = pnand %p6903_p7, %p7086_p3 }
 0x56c   : > { %p6909_p13 = por %p6908_p12, %p6907_p11 }
 0x56d   : > { %p6905_p10 = pneg %p6904_p9 }
 0x56e   : > { %p6911_p1 = por %p6910_p0, %p6909_p13 }
 0x570   : > { %p6912_p2 = pnand %p6911_p1, %p6905_p10 }
 0x572   : > { %6915 = shalt.err (!%p6912_p2)
}
 0x573   : > { %s6994_s22 = smov 256  }
 0x574   : > { %6789 = dma.vmem_to_hbm [thread:$0]  (%p7086_p3), %s10269_s18, 4096, %s10263_s0, %s10281_s29, %s6994_s22, %s6994_s22, %s10383_s17  }
 0x575 PF: > { %p6795_p4 = scmp.ge.s32.totalorder %s6982_s8, 2  ;;  %s5462_s12 = sand.u32 1, %s6954_s24  }
 0x576   : > { %s5463_s27 = scalar_lea.sflag [#allocation4], %s5462_s12 }
 0x577   : > { %p6792_p5 = pnand %p6795_p4, %p7095_p8 }
 0x579   : > { %6949 = dma.done.wait (!%p6792_p5), %s5463_s27, 4096  }
 0x57a   : > { %6951 = vsyncadd (!%p6792_p5), %s5463_s27, 4294963200  ;;  %s20_s8 = sadd.s32 1, %s6982_s8   ;;  %s10392_s14 = sld [smem:[#allocation6_spill]] }
 0x57b   : > { %p17_p6 = scmp.ge.s32.totalorder %s20_s8, 6   ;;  %s10393_s26 = sld [smem:[#allocation11_spill]] }
 0x57c   : > { %s10394_s27 = sld [smem:[#allocation7_spill]]  ;;  %s10395_s28 = sld [smem:[#allocation8_spill]] }
 0x57d   : > { %s10396_s29 = sld [smem:[#allocation9_spill]]  ;;  %s10397_s30 = sld [smem:[#allocation10_spill]] }
 0x57e   : > { %s10398_s24 = smov %s6958_s25  ;;  %19 = sbr.rel (!%p17_p6) target bundleno = 8 (0x8), region = 101 }
 0x580   : > { %s10399_s25 = smov %s10392_s14 }
 0x585   :  { %5468 = vsyncpa [#allocation4], 1 }
 0x586   :  { %5470 = vsyncpa [#allocation4 + $0x1], 1 }

</bundles_post_ra>
